<compile_context>
chip_gen: v5e
topology: v5e:2x2
jax: 0.10.0
libtpu: 0.0.40
codegen_flags: <defaults>
</compile_context>

<pallas_src>
import functools

import jax
import jax.numpy as jnp
from jax.experimental import pallas as pl
from jax.experimental.pallas import tpu as pltpu


def _round_up(v: int, m: int) -> int:
    return (v + m - 1) // m * m


_VMEM_SPEC = pl.BlockSpec(memory_space=pltpu.MemorySpace.VMEM)


# ----------------------------------------------------------------------------
# Pallas kernels
# ----------------------------------------------------------------------------
def _conv_pool_kernel(p_ref, w_ref, b_ref, u_ref, o_ref, *, drop_p):
    """Fused conv-as-matmul + bias + dropout + relu + 2x2 max-pool.

    p_ref: [4, R, Kp]  im2col patch matrices, one per 2x2 pool-window tap.
    w_ref: [Kp, Cp]    flattened conv weight (zero padded).
    b_ref: [1,  Cp]    bias (zero padded).
    u_ref: [4, R, Cp]  uniform(0,1) randoms for the per-tap dropout masks.
    o_ref: [R,  Cp]    pooled output = max over the four taps.
    """
    w = w_ref[...]
    b = b_ref[...]
    out = None
    for t in range(4):                         # unrolled at trace time
        y = jnp.dot(p_ref[t], w, preferred_element_type=jnp.float32) + b
        if drop_p > 0.0:
            keep = (u_ref[t] >= jnp.float32(drop_p)).astype(jnp.float32)
            y = y * keep * jnp.float32(1.0 / (1.0 - drop_p))
        y = jnp.maximum(y, 0.0)                # relu(dropout(conv))
        out = y if out is None else jnp.maximum(out, y)   # 2x2 max-pool
    o_ref[...] = out


def _fc_stack_kernel(x_ref, w1_ref, b1_ref, w2_ref, b2_ref, w3_ref, b3_ref,
                     u_ref, o_ref, *, drop_p):
    """relu(dropout(fc1)) -> relu(dropout(fc2)) -> fc3, all in one kernel."""
    def dropout(h, u):
        if drop_p > 0.0:
            keep = (u >= jnp.float32(drop_p)).astype(jnp.float32)
            h = h * keep * jnp.float32(1.0 / (1.0 - drop_p))
        return h

    h = x_ref[...]
    h = jnp.dot(h, w1_ref[...], preferred_element_type=jnp.float32) + b1_ref[...]
    h = jnp.maximum(dropout(h, u_ref[0]), 0.0)
    h = jnp.dot(h, w2_ref[...], preferred_element_type=jnp.float32) + b2_ref[...]
    h = jnp.maximum(dropout(h, u_ref[1]), 0.0)
    o_ref[...] = (jnp.dot(h, w3_ref[...], preferred_element_type=jnp.float32)
                  + b3_ref[...])


# ----------------------------------------------------------------------------
# Pallas wrappers (single invocation, everything resident in VMEM)
# ----------------------------------------------------------------------------
def _conv_pool_stage(patches, w, b, uniforms, drop_p):
    _, rows, _ = patches.shape
    cp = w.shape[1]
    kernel = functools.partial(_conv_pool_kernel, drop_p=float(drop_p))
    return pl.pallas_call(
        kernel,
        out_shape=jax.ShapeDtypeStruct((rows, cp), jnp.float32),
        in_specs=[_VMEM_SPEC] * 4,
        out_specs=_VMEM_SPEC,
    )(patches, w, b, uniforms)


def _fc_stage(flat, pp, uniforms, drop_p):
    kernel = functools.partial(_fc_stack_kernel, drop_p=float(drop_p))
    return pl.pallas_call(
        kernel,
        out_shape=jax.ShapeDtypeStruct(
            (flat.shape[0], pp["fc3_w"].shape[1]), jnp.float32),
        in_specs=[_VMEM_SPEC] * 8,
        out_specs=_VMEM_SPEC,
    )(flat, pp["fc1_w"], pp["fc1_b"], pp["fc2_w"], pp["fc2_b"],
      pp["fc3_w"], pp["fc3_b"], uniforms)


# ----------------------------------------------------------------------------
# Glue (runs under jax.jit, fused by XLA)
# ----------------------------------------------------------------------------
def _pool_tap_patches(x_nhwc, k):
    """im2col patches of a valid k x k conv, split into the four 2x2 pool taps.

    Returns [4, N*Po*Qo, C*k*k]; feature order (cin, kh, kw) matches PyTorch's
    Conv2d weight flattening w.reshape(Cout, Cin*k*k)."""
    n, h, w, c = x_nhwc.shape
    po, qo = (h - k + 1) // 2, (w - k + 1) // 2
    taps = []
    for a in (0, 1):
        for b in (0, 1):
            cols = []
            for di in range(k):
                for dj in range(k):
                    cols.append(
                        x_nhwc[:, a + di:a + di + 2 * po - 1:2,
                                  b + dj:b + dj + 2 * qo - 1:2, :])  # [N,Po,Qo,C]
            patch = jnp.stack(cols, axis=-1)          # [N, Po, Qo, C, k*k]
            taps.append(patch.reshape(n * po * qo, c * k * k))
    return jnp.stack(taps, axis=0)                    # [4, N*Po*Qo, C*k*k]


def _pad_last(a, size):
    pad = size - a.shape[-1]
    if pad == 0:
        return a.astype(jnp.float32)
    widths = [(0, 0)] * (a.ndim - 1) + [(0, pad)]
    return jnp.pad(a.astype(jnp.float32), widths)


def _pad_to(a, shape):
    out = jnp.zeros(shape, jnp.float32)
    idx = tuple(slice(0, s) for s in a.shape)
    return out.at[idx].set(a.astype(jnp.float32))


def prepare_params(params):
    """Reshape to matmul layout and zero-pad to MXU shapes ONCE at init."""
    return {
        "w1": _pad_to(params["conv1_w"].reshape(6, -1).T, (128, 128)),   # [25,6]
        "b1": _pad_to(params["conv1_b"][None, :], (1, 128)),
        "w2": _pad_to(params["conv2_w"].reshape(16, -1).T, (256, 128)),  # [150,16]
        "b2": _pad_to(params["conv2_b"][None, :], (1, 128)),
        "fc1_w": _pad_to(params["fc1_w"].T, (256, 128)),                 # [256,120]
        "fc1_b": _pad_to(params["fc1_b"][None, :], (1, 128)),
        "fc2_w": _pad_to(params["fc2_w"].T, (128, 128)),                 # [120,84]
        "fc2_b": _pad_to(params["fc2_b"][None, :], (1, 128)),
        "fc3_w": _pad_to(params["fc3_w"].T, (128, 128)),                 # [84,10]
        "fc3_b": _pad_to(params["fc3_b"][None, :], (1, 128)),
    }


@functools.partial(jax.jit, static_argnames=("drop_rate",))
def lenet5_dropout_forward(x, padded_params, key, drop_rate=0.5):
    """x: [N, 1, 28, 28] f32 NCHW (like PyTorch) -> logits [N, 10]."""
    pp = padded_params
    n = x.shape[0]
    k1, k2, k3 = jax.random.split(key, 3)
    conv_p = drop_rate * 0.5

    # conv1 (1->6, 5x5) + dropout + relu + 2x2 pool : one pallas_call
    x_nhwc = jnp.transpose(x.astype(jnp.float32), (0, 2, 3, 1))      # [N,28,28,1]
    p1 = _pad_last(_pool_tap_patches(x_nhwc, 5), pp["w1"].shape[0])  # [4,288,128]
    u1 = jax.random.uniform(k1, (4, p1.shape[1], pp["w1"].shape[1]), jnp.float32)
    y1 = _conv_pool_stage(p1, pp["w1"], pp["b1"], u1, conv_p)        # [288,128]
    ph1, pw1 = (x.shape[2] - 4) // 2, (x.shape[3] - 4) // 2
    y1 = y1[:, :6].reshape(n, ph1, pw1, 6)                           # NHWC

    # conv2 (6->16, 5x5) + dropout + relu + 2x2 pool : one pallas_call
    p2 = _pad_last(_pool_tap_patches(y1, 5), pp["w2"].shape[0])      # [4,32,256]
    u2 = jax.random.uniform(k2, (4, p2.shape[1], pp["w2"].shape[1]), jnp.float32)
    y2 = _conv_pool_stage(p2, pp["w2"], pp["b2"], u2, conv_p)        # [32,128]
    ph2, pw2 = (ph1 - 4) // 2, (pw1 - 4) // 2
    y2 = y2[:, :16].reshape(n, ph2, pw2, 16)                         # NHWC

    # flatten in PyTorch NCHW order, then fc1+fc2+fc3 : one pallas_call
    flat = jnp.transpose(y2, (0, 3, 1, 2)).reshape(n, 16 * ph2 * pw2)
    rp = _round_up(n, 8)
    flat = jnp.pad(flat, ((0, rp - n), (0, 0)))                      # [8,256]
    u3 = jax.random.uniform(k3, (2, rp, pp["fc1_w"].shape[1]), jnp.float32)
    logits = _fc_stage(flat, pp, u3, drop_rate)                      # [8,128]
    return logits[:n, :10]


# ----------------------------------------------------------------------------
# Main
# ----------------------------------------------------------------------------
if __name__ == "__main__":
    key = jax.random.PRNGKey(0)
    ks = jax.random.split(key, 12)

    # Deterministic synthetic parameters (shapes from LeNet5.__init__).
    params = {
        "conv1_w": 0.1 * jax.random.normal(ks[0], (6, 1, 5, 5), jnp.float32),
        "conv1_b": 0.1 * jax.random.normal(ks[1], (6,), jnp.float32),
        "conv2_w": 0.1 * jax.random.normal(ks[2], (16, 6, 5, 5), jnp.float32),
        "conv2_b": 0.1 * jax.random.normal(ks[3], (16,), jnp.float32),
        "fc1_w": 0.1 * jax.random.normal(ks[4], (120, 256), jnp.float32),
        "fc1_b": 0.1 * jax.random.normal(ks[5], (120,), jnp.float32),
        "fc2_w": 0.1 * jax.random.normal(ks[6], (84, 120), jnp.float32),
        "fc2_b": 0.1 * jax.random.normal(ks[7], (84,), jnp.float32),
        "fc3_w": 0.1 * jax.random.normal(ks[8], (10, 84), jnp.float32),
        "fc3_b": 0.1 * jax.random.normal(ks[9], (10,), jnp.float32),
    }
    padded_params = prepare_params(params)   # one-time padding, device-resident

    # MNIST-like input: batch=2, NCHW [2, 1, 28, 28].
    x = jax.random.normal(ks[10], (2, 1, 28, 28), jnp.float32)

    logits = lenet5_dropout_forward(x, padded_params, ks[11], drop_rate=0.5)
    logits = jax.block_until_ready(logits)

    assert logits.shape == (2, 10), logits.shape
    assert bool(jnp.all(jnp.isfinite(logits)))
    print("KERNEL_OK")
</pallas_src>

<mosaic_0001>
module attributes {stable_mosaic.version = 11 : i64} {
  func.func @_conv_pool_kernel(%arg0: memref<4x288x128xf32, #tpu.memory_space<vmem>>, %arg1: memref<128x128xf32, #tpu.memory_space<vmem>>, %arg2: memref<1x128xf32, #tpu.memory_space<vmem>>, %arg3: memref<4x288x128xf32, #tpu.memory_space<vmem>>, %arg4: memref<288x128xf32, #tpu.memory_space<vmem>>) attributes {dimension_semantics = [], scalar_prefetch = 0 : i64, scratch_operands = 0 : i64, tpu.core_type = #tpu.core_type<tc>} {
    %c0 = arith.constant 0 : index
    %c0_0 = arith.constant 0 : index
    %0 = vector.load %arg1[%c0, %c0_0] : memref<128x128xf32, #tpu.memory_space<vmem>>, vector<128x128xf32>
    %c0_1 = arith.constant 0 : index
    %c0_2 = arith.constant 0 : index
    %1 = vector.load %arg2[%c0_1, %c0_2] : memref<1x128xf32, #tpu.memory_space<vmem>>, vector<1x128xf32>
    %c0_3 = arith.constant 0 : index
    %c0_4 = arith.constant 0 : index
    %c0_5 = arith.constant 0 : index
    %2 = vector.load %arg0[%c0_3, %c0_4, %c0_5] : memref<4x288x128xf32, #tpu.memory_space<vmem>>, vector<1x288x128xf32>
    %3 = vector.shape_cast %2 : vector<1x288x128xf32> to vector<288x128xf32>
    %cst = arith.constant dense<0.000000e+00> : vector<288x128xf32>
    %4 = tpu.matmul %3, %0, %cst {dimension_numbers = #tpu.dot_dimension_numbers<[1], [0], [0], [1], [0, 0, 1, 1], [], []>} : vector<288x128xf32>, vector<128x128xf32>, vector<288x128xf32> -> vector<288x128xf32>
    %5 = vector.broadcast %1 : vector<1x128xf32> to vector<288x128xf32>
    %6 = arith.addf %4, %5 : vector<288x128xf32>
    %c0_6 = arith.constant 0 : index
    %c0_7 = arith.constant 0 : index
    %c0_8 = arith.constant 0 : index
    %7 = vector.load %arg3[%c0_6, %c0_7, %c0_8] : memref<4x288x128xf32, #tpu.memory_space<vmem>>, vector<1x288x128xf32>
    %8 = vector.shape_cast %7 : vector<1x288x128xf32> to vector<288x128xf32>
    %cst_9 = arith.constant 2.500000e-01 : f32
    %9 = vector.broadcast %cst_9 : f32 to vector<288x128xf32>
    %10 = arith.cmpf oge, %8, %9 : vector<288x128xf32>
    %11 = arith.extui %10 : vector<288x128xi1> to vector<288x128xi32>
    %12 = arith.sitofp %11 : vector<288x128xi32> to vector<288x128xf32>
    %13 = arith.mulf %6, %12 : vector<288x128xf32>
    %cst_10 = arith.constant 1.33333337 : f32
    %14 = vector.broadcast %cst_10 : f32 to vector<288x128xf32>
    %15 = arith.mulf %13, %14 : vector<288x128xf32>
    %cst_11 = arith.constant 0.000000e+00 : f32
    %16 = vector.broadcast %cst_11 : f32 to vector<288x128xf32>
    %17 = arith.maximumf %15, %16 : vector<288x128xf32>
    %c1 = arith.constant 1 : index
    %c0_12 = arith.constant 0 : index
    %c0_13 = arith.constant 0 : index
    %18 = vector.load %arg0[%c1, %c0_12, %c0_13] : memref<4x288x128xf32, #tpu.memory_space<vmem>>, vector<1x288x128xf32>
    %19 = vector.shape_cast %18 : vector<1x288x128xf32> to vector<288x128xf32>
    %cst_14 = arith.constant dense<0.000000e+00> : vector<288x128xf32>
    %20 = tpu.matmul %19, %0, %cst_14 {dimension_numbers = #tpu.dot_dimension_numbers<[1], [0], [0], [1], [0, 0, 1, 1], [], []>} : vector<288x128xf32>, vector<128x128xf32>, vector<288x128xf32> -> vector<288x128xf32>
    %21 = vector.broadcast %1 : vector<1x128xf32> to vector<288x128xf32>
    %22 = arith.addf %20, %21 : vector<288x128xf32>
    %c1_15 = arith.constant 1 : index
    %c0_16 = arith.constant 0 : index
    %c0_17 = arith.constant 0 : index
    %23 = vector.load %arg3[%c1_15, %c0_16, %c0_17] : memref<4x288x128xf32, #tpu.memory_space<vmem>>, vector<1x288x128xf32>
    %24 = vector.shape_cast %23 : vector<1x288x128xf32> to vector<288x128xf32>
    %cst_18 = arith.constant 2.500000e-01 : f32
    %25 = vector.broadcast %cst_18 : f32 to vector<288x128xf32>
    %26 = arith.cmpf oge, %24, %25 : vector<288x128xf32>
    %27 = arith.extui %26 : vector<288x128xi1> to vector<288x128xi32>
    %28 = arith.sitofp %27 : vector<288x128xi32> to vector<288x128xf32>
    %29 = arith.mulf %22, %28 : vector<288x128xf32>
    %cst_19 = arith.constant 1.33333337 : f32
    %30 = vector.broadcast %cst_19 : f32 to vector<288x128xf32>
    %31 = arith.mulf %29, %30 : vector<288x128xf32>
    %cst_20 = arith.constant 0.000000e+00 : f32
    %32 = vector.broadcast %cst_20 : f32 to vector<288x128xf32>
    %33 = arith.maximumf %31, %32 : vector<288x128xf32>
    %34 = arith.maximumf %17, %33 : vector<288x128xf32>
    %c2 = arith.constant 2 : index
    %c0_21 = arith.constant 0 : index
    %c0_22 = arith.constant 0 : index
    %35 = vector.load %arg0[%c2, %c0_21, %c0_22] : memref<4x288x128xf32, #tpu.memory_space<vmem>>, vector<1x288x128xf32>
    %36 = vector.shape_cast %35 : vector<1x288x128xf32> to vector<288x128xf32>
    %cst_23 = arith.constant dense<0.000000e+00> : vector<288x128xf32>
    %37 = tpu.matmul %36, %0, %cst_23 {dimension_numbers = #tpu.dot_dimension_numbers<[1], [0], [0], [1], [0, 0, 1, 1], [], []>} : vector<288x128xf32>, vector<128x128xf32>, vector<288x128xf32> -> vector<288x128xf32>
    %38 = vector.broadcast %1 : vector<1x128xf32> to vector<288x128xf32>
    %39 = arith.addf %37, %38 : vector<288x128xf32>
    %c2_24 = arith.constant 2 : index
    %c0_25 = arith.constant 0 : index
    %c0_26 = arith.constant 0 : index
    %40 = vector.load %arg3[%c2_24, %c0_25, %c0_26] : memref<4x288x128xf32, #tpu.memory_space<vmem>>, vector<1x288x128xf32>
    %41 = vector.shape_cast %40 : vector<1x288x128xf32> to vector<288x128xf32>
    %cst_27 = arith.constant 2.500000e-01 : f32
    %42 = vector.broadcast %cst_27 : f32 to vector<288x128xf32>
    %43 = arith.cmpf oge, %41, %42 : vector<288x128xf32>
    %44 = arith.extui %43 : vector<288x128xi1> to vector<288x128xi32>
    %45 = arith.sitofp %44 : vector<288x128xi32> to vector<288x128xf32>
    %46 = arith.mulf %39, %45 : vector<288x128xf32>
    %cst_28 = arith.constant 1.33333337 : f32
    %47 = vector.broadcast %cst_28 : f32 to vector<288x128xf32>
    %48 = arith.mulf %46, %47 : vector<288x128xf32>
    %cst_29 = arith.constant 0.000000e+00 : f32
    %49 = vector.broadcast %cst_29 : f32 to vector<288x128xf32>
    %50 = arith.maximumf %48, %49 : vector<288x128xf32>
    %51 = arith.maximumf %34, %50 : vector<288x128xf32>
    %c3 = arith.constant 3 : index
    %c0_30 = arith.constant 0 : index
    %c0_31 = arith.constant 0 : index
    %52 = vector.load %arg0[%c3, %c0_30, %c0_31] : memref<4x288x128xf32, #tpu.memory_space<vmem>>, vector<1x288x128xf32>
    %53 = vector.shape_cast %52 : vector<1x288x128xf32> to vector<288x128xf32>
    %cst_32 = arith.constant dense<0.000000e+00> : vector<288x128xf32>
    %54 = tpu.matmul %53, %0, %cst_32 {dimension_numbers = #tpu.dot_dimension_numbers<[1], [0], [0], [1], [0, 0, 1, 1], [], []>} : vector<288x128xf32>, vector<128x128xf32>, vector<288x128xf32> -> vector<288x128xf32>
    %55 = vector.broadcast %1 : vector<1x128xf32> to vector<288x128xf32>
    %56 = arith.addf %54, %55 : vector<288x128xf32>
    %c3_33 = arith.constant 3 : index
    %c0_34 = arith.constant 0 : index
    %c0_35 = arith.constant 0 : index
    %57 = vector.load %arg3[%c3_33, %c0_34, %c0_35] : memref<4x288x128xf32, #tpu.memory_space<vmem>>, vector<1x288x128xf32>
    %58 = vector.shape_cast %57 : vector<1x288x128xf32> to vector<288x128xf32>
    %cst_36 = arith.constant 2.500000e-01 : f32
    %59 = vector.broadcast %cst_36 : f32 to vector<288x128xf32>
    %60 = arith.cmpf oge, %58, %59 : vector<288x128xf32>
    %61 = arith.extui %60 : vector<288x128xi1> to vector<288x128xi32>
    %62 = arith.sitofp %61 : vector<288x128xi32> to vector<288x128xf32>
    %63 = arith.mulf %56, %62 : vector<288x128xf32>
    %cst_37 = arith.constant 1.33333337 : f32
    %64 = vector.broadcast %cst_37 : f32 to vector<288x128xf32>
    %65 = arith.mulf %63, %64 : vector<288x128xf32>
    %cst_38 = arith.constant 0.000000e+00 : f32
    %66 = vector.broadcast %cst_38 : f32 to vector<288x128xf32>
    %67 = arith.maximumf %65, %66 : vector<288x128xf32>
    %68 = arith.maximumf %51, %67 : vector<288x128xf32>
    %c0_39 = arith.constant 0 : index
    %c0_40 = arith.constant 0 : index
    %69 = vector.load %arg4[%c0_39, %c0_40] : memref<288x128xf32, #tpu.memory_space<vmem>>, vector<288x128xf32>
    tpu.vector_store %arg4[%c0_39, %c0_40], %68 {strides = array<i32>} : memref<288x128xf32, #tpu.memory_space<vmem>>, vector<288x128xf32>,
    return
  }
}

module attributes {stable_mosaic.version = 11 : i64} {
  func.func @_conv_pool_kernel(%arg0: memref<4x32x256xf32, #tpu.memory_space<vmem>>, %arg1: memref<256x128xf32, #tpu.memory_space<vmem>>, %arg2: memref<1x128xf32, #tpu.memory_space<vmem>>, %arg3: memref<4x32x128xf32, #tpu.memory_space<vmem>>, %arg4: memref<32x128xf32, #tpu.memory_space<vmem>>) attributes {dimension_semantics = [], scalar_prefetch = 0 : i64, scratch_operands = 0 : i64, tpu.core_type = #tpu.core_type<tc>} {
    %c0 = arith.constant 0 : index
    %c0_0 = arith.constant 0 : index
    %0 = vector.load %arg1[%c0, %c0_0] : memref<256x128xf32, #tpu.memory_space<vmem>>, vector<256x128xf32>
    %c0_1 = arith.constant 0 : index
    %c0_2 = arith.constant 0 : index
    %1 = vector.load %arg2[%c0_1, %c0_2] : memref<1x128xf32, #tpu.memory_space<vmem>>, vector<1x128xf32>
    %c0_3 = arith.constant 0 : index
    %c0_4 = arith.constant 0 : index
    %c0_5 = arith.constant 0 : index
    %2 = vector.load %arg0[%c0_3, %c0_4, %c0_5] : memref<4x32x256xf32, #tpu.memory_space<vmem>>, vector<1x32x256xf32>
    %3 = vector.shape_cast %2 : vector<1x32x256xf32> to vector<32x256xf32>
    %cst = arith.constant dense<0.000000e+00> : vector<32x128xf32>
    %4 = tpu.matmul %3, %0, %cst {dimension_numbers = #tpu.dot_dimension_numbers<[1], [0], [0], [1], [0, 0, 1, 1], [], []>} : vector<32x256xf32>, vector<256x128xf32>, vector<32x128xf32> -> vector<32x128xf32>
    %5 = vector.broadcast %1 : vector<1x128xf32> to vector<32x128xf32>
    %6 = arith.addf %4, %5 : vector<32x128xf32>
    %c0_6 = arith.constant 0 : index
    %c0_7 = arith.constant 0 : index
    %c0_8 = arith.constant 0 : index
    %7 = vector.load %arg3[%c0_6, %c0_7, %c0_8] : memref<4x32x128xf32, #tpu.memory_space<vmem>>, vector<1x32x128xf32>
    %8 = vector.shape_cast %7 : vector<1x32x128xf32> to vector<32x128xf32>
    %cst_9 = arith.constant 2.500000e-01 : f32
    %9 = vector.broadcast %cst_9 : f32 to vector<32x128xf32>
    %10 = arith.cmpf oge, %8, %9 : vector<32x128xf32>
    %11 = arith.extui %10 : vector<32x128xi1> to vector<32x128xi32>
    %12 = arith.sitofp %11 : vector<32x128xi32> to vector<32x128xf32>
    %13 = arith.mulf %6, %12 : vector<32x128xf32>
    %cst_10 = arith.constant 1.33333337 : f32
    %14 = vector.broadcast %cst_10 : f32 to vector<32x128xf32>
    %15 = arith.mulf %13, %14 : vector<32x128xf32>
    %cst_11 = arith.constant 0.000000e+00 : f32
    %16 = vector.broadcast %cst_11 : f32 to vector<32x128xf32>
    %17 = arith.maximumf %15, %16 : vector<32x128xf32>
    %c1 = arith.constant 1 : index
    %c0_12 = arith.constant 0 : index
    %c0_13 = arith.constant 0 : index
    %18 = vector.load %arg0[%c1, %c0_12, %c0_13] : memref<4x32x256xf32, #tpu.memory_space<vmem>>, vector<1x32x256xf32>
    %19 = vector.shape_cast %18 : vector<1x32x256xf32> to vector<32x256xf32>
    %cst_14 = arith.constant dense<0.000000e+00> : vector<32x128xf32>
    %20 = tpu.matmul %19, %0, %cst_14 {dimension_numbers = #tpu.dot_dimension_numbers<[1], [0], [0], [1], [0, 0, 1, 1], [], []>} : vector<32x256xf32>, vector<256x128xf32>, vector<32x128xf32> -> vector<32x128xf32>
    %21 = vector.broadcast %1 : vector<1x128xf32> to vector<32x128xf32>
    %22 = arith.addf %20, %21 : vector<32x128xf32>
    %c1_15 = arith.constant 1 : index
    %c0_16 = arith.constant 0 : index
    %c0_17 = arith.constant 0 : index
    %23 = vector.load %arg3[%c1_15, %c0_16, %c0_17] : memref<4x32x128xf32, #tpu.memory_space<vmem>>, vector<1x32x128xf32>
    %24 = vector.shape_cast %23 : vector<1x32x128xf32> to vector<32x128xf32>
    %cst_18 = arith.constant 2.500000e-01 : f32
    %25 = vector.broadcast %cst_18 : f32 to vector<32x128xf32>
    %26 = arith.cmpf oge, %24, %25 : vector<32x128xf32>
    %27 = arith.extui %26 : vector<32x128xi1> to vector<32x128xi32>
    %28 = arith.sitofp %27 : vector<32x128xi32> to vector<32x128xf32>
    %29 = arith.mulf %22, %28 : vector<32x128xf32>
    %cst_19 = arith.constant 1.33333337 : f32
    %30 = vector.broadcast %cst_19 : f32 to vector<32x128xf32>
    %31 = arith.mulf %29, %30 : vector<32x128xf32>
    %cst_20 = arith.constant 0.000000e+00 : f32
    %32 = vector.broadcast %cst_20 : f32 to vector<32x128xf32>
    %33 = arith.maximumf %31, %32 : vector<32x128xf32>
    %34 = arith.maximumf %17, %33 : vector<32x128xf32>
    %c2 = arith.constant 2 : index
    %c0_21 = arith.constant 0 : index
    %c0_22 = arith.constant 0 : index
    %35 = vector.load %arg0[%c2, %c0_21, %c0_22] : memref<4x32x256xf32, #tpu.memory_space<vmem>>, vector<1x32x256xf32>
    %36 = vector.shape_cast %35 : vector<1x32x256xf32> to vector<32x256xf32>
    %cst_23 = arith.constant dense<0.000000e+00> : vector<32x128xf32>
    %37 = tpu.matmul %36, %0, %cst_23 {dimension_numbers = #tpu.dot_dimension_numbers<[1], [0], [0], [1], [0, 0, 1, 1], [], []>} : vector<32x256xf32>, vector<256x128xf32>, vector<32x128xf32> -> vector<32x128xf32>
    %38 = vector.broadcast %1 : vector<1x128xf32> to vector<32x128xf32>
    %39 = arith.addf %37, %38 : vector<32x128xf32>
    %c2_24 = arith.constant 2 : index
    %c0_25 = arith.constant 0 : index
    %c0_26 = arith.constant 0 : index
    %40 = vector.load %arg3[%c2_24, %c0_25, %c0_26] : memref<4x32x128xf32, #tpu.memory_space<vmem>>, vector<1x32x128xf32>
    %41 = vector.shape_cast %40 : vector<1x32x128xf32> to vector<32x128xf32>
    %cst_27 = arith.constant 2.500000e-01 : f32
    %42 = vector.broadcast %cst_27 : f32 to vector<32x128xf32>
    %43 = arith.cmpf oge, %41, %42 : vector<32x128xf32>
    %44 = arith.extui %43 : vector<32x128xi1> to vector<32x128xi32>
    %45 = arith.sitofp %44 : vector<32x128xi32> to vector<32x128xf32>
    %46 = arith.mulf %39, %45 : vector<32x128xf32>
    %cst_28 = arith.constant 1.33333337 : f32
    %47 = vector.broadcast %cst_28 : f32 to vector<32x128xf32>
    %48 = arith.mulf %46, %47 : vector<32x128xf32>
    %cst_29 = arith.constant 0.000000e+00 : f32
    %49 = vector.broadcast %cst_29 : f32 to vector<32x128xf32>
    %50 = arith.maximumf %48, %49 : vector<32x128xf32>
    %51 = arith.maximumf %34, %50 : vector<32x128xf32>
    %c3 = arith.constant 3 : index
    %c0_30 = arith.constant 0 : index
    %c0_31 = arith.constant 0 : index
    %52 = vector.load %arg0[%c3, %c0_30, %c0_31] : memref<4x32x256xf32, #tpu.memory_space<vmem>>, vector<1x32x256xf32>
    %53 = vector.shape_cast %52 : vector<1x32x256xf32> to vector<32x256xf32>
    %cst_32 = arith.constant dense<0.000000e+00> : vector<32x128xf32>
    %54 = tpu.matmul %53, %0, %cst_32 {dimension_numbers = #tpu.dot_dimension_numbers<[1], [0], [0], [1], [0, 0, 1, 1], [], []>} : vector<32x256xf32>, vector<256x128xf32>, vector<32x128xf32> -> vector<32x128xf32>
    %55 = vector.broadcast %1 : vector<1x128xf32> to vector<32x128xf32>
    %56 = arith.addf %54, %55 : vector<32x128xf32>
    %c3_33 = arith.constant 3 : index
    %c0_34 = arith.constant 0 : index
    %c0_35 = arith.constant 0 : index
    %57 = vector.load %arg3[%c3_33, %c0_34, %c0_35] : memref<4x32x128xf32, #tpu.memory_space<vmem>>, vector<1x32x128xf32>
    %58 = vector.shape_cast %57 : vector<1x32x128xf32> to vector<32x128xf32>
    %cst_36 = arith.constant 2.500000e-01 : f32
    %59 = vector.broadcast %cst_36 : f32 to vector<32x128xf32>
    %60 = arith.cmpf oge, %58, %59 : vector<32x128xf32>
    %61 = arith.extui %60 : vector<32x128xi1> to vector<32x128xi32>
    %62 = arith.sitofp %61 : vector<32x128xi32> to vector<32x128xf32>
    %63 = arith.mulf %56, %62 : vector<32x128xf32>
    %cst_37 = arith.constant 1.33333337 : f32
    %64 = vector.broadcast %cst_37 : f32 to vector<32x128xf32>
    %65 = arith.mulf %63, %64 : vector<32x128xf32>
    %cst_38 = arith.constant 0.000000e+00 : f32
    %66 = vector.broadcast %cst_38 : f32 to vector<32x128xf32>
    %67 = arith.maximumf %65, %66 : vector<32x128xf32>
    %68 = arith.maximumf %51, %67 : vector<32x128xf32>
    %c0_39 = arith.constant 0 : index
    %c0_40 = arith.constant 0 : index
    %69 = vector.load %arg4[%c0_39, %c0_40] : memref<32x128xf32, #tpu.memory_space<vmem>>, vector<32x128xf32>
    tpu.vector_store %arg4[%c0_39, %c0_40], %68 {strides = array<i32>} : memref<32x128xf32, #tpu.memory_space<vmem>>, vector<32x128xf32>,
    return
  }
}

module attributes {stable_mosaic.version = 11 : i64} {
  func.func @_fc_stack_kernel(%arg0: memref<8x256xf32, #tpu.memory_space<vmem>>, %arg1: memref<256x128xf32, #tpu.memory_space<vmem>>, %arg2: memref<1x128xf32, #tpu.memory_space<vmem>>, %arg3: memref<128x128xf32, #tpu.memory_space<vmem>>, %arg4: memref<1x128xf32, #tpu.memory_space<vmem>>, %arg5: memref<128x128xf32, #tpu.memory_space<vmem>>, %arg6: memref<1x128xf32, #tpu.memory_space<vmem>>, %arg7: memref<2x8x128xf32, #tpu.memory_space<vmem>>, %arg8: memref<8x128xf32, #tpu.memory_space<vmem>>) attributes {dimension_semantics = [], scalar_prefetch = 0 : i64, scratch_operands = 0 : i64, tpu.core_type = #tpu.core_type<tc>} {
    %c0 = arith.constant 0 : index
    %c0_0 = arith.constant 0 : index
    %0 = vector.load %arg0[%c0, %c0_0] : memref<8x256xf32, #tpu.memory_space<vmem>>, vector<8x256xf32>
    %c0_1 = arith.constant 0 : index
    %c0_2 = arith.constant 0 : index
    %1 = vector.load %arg1[%c0_1, %c0_2] : memref<256x128xf32, #tpu.memory_space<vmem>>, vector<256x128xf32>
    %cst = arith.constant dense<0.000000e+00> : vector<8x128xf32>
    %2 = tpu.matmul %0, %1, %cst {dimension_numbers = #tpu.dot_dimension_numbers<[1], [0], [0], [1], [0, 0, 1, 1], [], []>} : vector<8x256xf32>, vector<256x128xf32>, vector<8x128xf32> -> vector<8x128xf32>
    %c0_3 = arith.constant 0 : index
    %c0_4 = arith.constant 0 : index
    %3 = vector.load %arg2[%c0_3, %c0_4] : memref<1x128xf32, #tpu.memory_space<vmem>>, vector<1x128xf32>
    %4 = vector.broadcast %3 : vector<1x128xf32> to vector<8x128xf32>
    %5 = arith.addf %2, %4 : vector<8x128xf32>
    %c0_5 = arith.constant 0 : index
    %c0_6 = arith.constant 0 : index
    %c0_7 = arith.constant 0 : index
    %6 = vector.load %arg7[%c0_5, %c0_6, %c0_7] : memref<2x8x128xf32, #tpu.memory_space<vmem>>, vector<1x8x128xf32>
    %7 = vector.shape_cast %6 : vector<1x8x128xf32> to vector<8x128xf32>
    %cst_8 = arith.constant 5.000000e-01 : f32
    %8 = vector.broadcast %cst_8 : f32 to vector<8x128xf32>
    %9 = arith.cmpf oge, %7, %8 : vector<8x128xf32>
    %10 = arith.extui %9 : vector<8x128xi1> to vector<8x128xi32>
    %11 = arith.sitofp %10 : vector<8x128xi32> to vector<8x128xf32>
    %12 = arith.mulf %5, %11 : vector<8x128xf32>
    %cst_9 = arith.constant 2.000000e+00 : f32
    %13 = vector.broadcast %cst_9 : f32 to vector<8x128xf32>
    %14 = arith.mulf %12, %13 : vector<8x128xf32>
    %cst_10 = arith.constant 0.000000e+00 : f32
    %15 = vector.broadcast %cst_10 : f32 to vector<8x128xf32>
    %16 = arith.maximumf %14, %15 : vector<8x128xf32>
    %c0_11 = arith.constant 0 : index
    %c0_12 = arith.constant 0 : index
    %17 = vector.load %arg3[%c0_11, %c0_12] : memref<128x128xf32, #tpu.memory_space<vmem>>, vector<128x128xf32>
    %cst_13 = arith.constant dense<0.000000e+00> : vector<8x128xf32>
    %18 = tpu.matmul %16, %17, %cst_13 {dimension_numbers = #tpu.dot_dimension_numbers<[1], [0], [0], [1], [0, 0, 1, 1], [], []>} : vector<8x128xf32>, vector<128x128xf32>, vector<8x128xf32> -> vector<8x128xf32>
    %c0_14 = arith.constant 0 : index
    %c0_15 = arith.constant 0 : index
    %19 = vector.load %arg4[%c0_14, %c0_15] : memref<1x128xf32, #tpu.memory_space<vmem>>, vector<1x128xf32>
    %20 = vector.broadcast %19 : vector<1x128xf32> to vector<8x128xf32>
    %21 = arith.addf %18, %20 : vector<8x128xf32>
    %c1 = arith.constant 1 : index
    %c0_16 = arith.constant 0 : index
    %c0_17 = arith.constant 0 : index
    %22 = vector.load %arg7[%c1, %c0_16, %c0_17] : memref<2x8x128xf32, #tpu.memory_space<vmem>>, vector<1x8x128xf32>
    %23 = vector.shape_cast %22 : vector<1x8x128xf32> to vector<8x128xf32>
    %cst_18 = arith.constant 5.000000e-01 : f32
    %24 = vector.broadcast %cst_18 : f32 to vector<8x128xf32>
    %25 = arith.cmpf oge, %23, %24 : vector<8x128xf32>
    %26 = arith.extui %25 : vector<8x128xi1> to vector<8x128xi32>
    %27 = arith.sitofp %26 : vector<8x128xi32> to vector<8x128xf32>
    %28 = arith.mulf %21, %27 : vector<8x128xf32>
    %cst_19 = arith.constant 2.000000e+00 : f32
    %29 = vector.broadcast %cst_19 : f32 to vector<8x128xf32>
    %30 = arith.mulf %28, %29 : vector<8x128xf32>
    %cst_20 = arith.constant 0.000000e+00 : f32
    %31 = vector.broadcast %cst_20 : f32 to vector<8x128xf32>
    %32 = arith.maximumf %30, %31 : vector<8x128xf32>
    %c0_21 = arith.constant 0 : index
    %c0_22 = arith.constant 0 : index
    %33 = vector.load %arg5[%c0_21, %c0_22] : memref<128x128xf32, #tpu.memory_space<vmem>>, vector<128x128xf32>
    %cst_23 = arith.constant dense<0.000000e+00> : vector<8x128xf32>
    %34 = tpu.matmul %32, %33, %cst_23 {dimension_numbers = #tpu.dot_dimension_numbers<[1], [0], [0], [1], [0, 0, 1, 1], [], []>} : vector<8x128xf32>, vector<128x128xf32>, vector<8x128xf32> -> vector<8x128xf32>
    %c0_24 = arith.constant 0 : index
    %c0_25 = arith.constant 0 : index
    %35 = vector.load %arg6[%c0_24, %c0_25] : memref<1x128xf32, #tpu.memory_space<vmem>>, vector<1x128xf32>
    %36 = vector.broadcast %35 : vector<1x128xf32> to vector<8x128xf32>
    %37 = arith.addf %34, %36 : vector<8x128xf32>
    %c0_26 = arith.constant 0 : index
    %c0_27 = arith.constant 0 : index
    %38 = vector.load %arg8[%c0_26, %c0_27] : memref<8x128xf32, #tpu.memory_space<vmem>>, vector<8x128xf32>
    tpu.vector_store %arg8[%c0_26, %c0_27], %37 {strides = array<i32>} : memref<8x128xf32, #tpu.memory_space<vmem>>, vector<8x128xf32>,
    return
  }
}

</mosaic_0001>

<bundles_post_ra>
// kernel: lenet5_dropout_forward.5
= control target key start
LH: loop header
LB: loop body
LE: loop exit
PB: predicated region body
PF: predicated region fallthrough
CT: control target
= control target key end

     0   :  { %s3662_s1 = inlined_call_operand.vmem [shape: f32[128,128], index: 1, kind: input, shape index: {}]   ;;  %s3663_s0 = inlined_call_operand.vmem [shape: f32[4,288,128], index: 0, kind: input, shape index: {}]   ;;  %s3664_s2 = inlined_call_operand.vmem [shape: f32[1,128], index: 2, kind: input, shape index: {}]   ;;  %s3665_s3 = inlined_call_operand.vmem [shape: f32[4,288,128], index: 3, kind: input, shape index: {}]   ;;  %s3666_s4 = inlined_call_operand.vmem [shape: f32[288,128], index: 4, kind: output, shape index: {}]  }
   0x1   :  { %v32_v0 = vld [vmem:[%s3662_s1 + $0x78] sm:$0xff]  ;;  %v31_v1 = vld [vmem:[%s3662_s1 + $0x70] sm:$0xff]  ;;  %v30_v2 = vld [vmem:[%s3662_s1 + $0x68] sm:$0xff] }
   0x2   :  { %938 = vmatpush.msra.mxu2 %v32_v0  ;;  %1389 = vmatpush.msra.mxu3 %v32_v0  ;;  %v29_v3 = vld [vmem:[%s3662_s1 + $0x60] sm:$0xff]  ;;  %v28_v4 = vld [vmem:[%s3662_s1 + $0x58] sm:$0xff]  ;;  %v27_v5 = vld [vmem:[%s3662_s1 + $0x50] sm:$0xff] }
   0x3   :  { %73 = vmatpush.msra.mxu0 %v32_v0  ;;  %487 = vmatpush.msra.mxu1 %v32_v0  ;;  %v26_v6 = vld [vmem:[%s3662_s1 + $0x48] sm:$0xff]  ;;  %v25_v7 = vld [vmem:[%s3662_s1 + $0x40] sm:$0xff]  ;;  %v24_v8 = vld [vmem:[%s3662_s1 + $0x38] sm:$0xff] }
   0x4   :  { %939 = vmatpush.msra.mxu2 %v31_v1  ;;  %1390 = vmatpush.msra.mxu3 %v31_v1  ;;  %v23_v9 = vld [vmem:[%s3662_s1 + $0x30] sm:$0xff]  ;;  %v22_v10 = vld [vmem:[%s3662_s1 + $0x28] sm:$0xff]  ;;  %v21_v11 = vld [vmem:[%s3662_s1 + $0x20] sm:$0xff] }
   0x5   :  { %74 = vmatpush.msra.mxu0 %v31_v1  ;;  %488 = vmatpush.msra.mxu1 %v31_v1  ;;  %v20_v12 = vld [vmem:[%s3662_s1 + $0x18] sm:$0xff]  ;;  %v19_v13 = vld [vmem:[%s3662_s1 + $0x10] sm:$0xff]  ;;  %v18_v14 = vld [vmem:[%s3662_s1 + $0x8] sm:$0xff] }
   0x6   :  { %940 = vmatpush.msra.mxu2 %v30_v2  ;;  %1391 = vmatpush.msra.mxu3 %v30_v2  ;;  %v17_v15 = vld [vmem:[%s3662_s1] sm:$0xff]  ;;  %v1988_v20 = vld [vmem:[%s3663_s0 + $0x248] sm:$0xff]  ;;  %v1989_v24 = vld [vmem:[%s3663_s0 + $0x250] sm:$0xff] }
   0x7   :  { %75 = vmatpush.msra.mxu0 %v30_v2  ;;  %489 = vmatpush.msra.mxu1 %v30_v2  ;;  %v1987_v16 = vld [vmem:[%s3663_s0 + $0x240] sm:$0xff]  ;;  %v2096_v21 = vld [vmem:[%s3663_s0 + $0x368] sm:$0xff]  ;;  %v2097_v25 = vld [vmem:[%s3663_s0 + $0x370] sm:$0xff] }
   0x8   :  { %941 = vmatpush.msra.mxu2 %v29_v3  ;;  %1392 = vmatpush.msra.mxu3 %v29_v3  ;;  %v2095_v17 = vld [vmem:[%s3663_s0 + $0x360] sm:$0xff]  ;;  %v35_v22 = vld [vmem:[%s3663_s0 + $0x8] sm:$0xff]  ;;  %v36_v26 = vld [vmem:[%s3663_s0 + $0x10] sm:$0xff] }
   0x9   :  { %76 = vmatpush.msra.mxu0 %v29_v3  ;;  %490 = vmatpush.msra.mxu1 %v29_v3  ;;  %v34_v18 = vld [vmem:[%s3663_s0] sm:$0xff]  ;;  %v1880_v23 = vld [vmem:[%s3663_s0 + $0x128] sm:$0xff]  ;;  %v1881_v27 = vld [vmem:[%s3663_s0 + $0x130] sm:$0xff] }
   0xa   :  { %942 = vmatpush.msra.mxu2 %v28_v4  ;;  %1393 = vmatpush.msra.mxu3 %v28_v4  ;;  %v1879_v19 = vld [vmem:[%s3663_s0 + $0x120] sm:$0xff]  ;;  %v1990_v28 = vld [vmem:[%s3663_s0 + $0x258] sm:$0xff]  ;;  %v1992_v36 = vld [vmem:[%s3663_s0 + $0x268] sm:$0xff] }
   0xb   :  { %77 = vmatpush.msra.mxu0 %v28_v4  ;;  %491 = vmatpush.msra.mxu1 %v28_v4  ;;  %v2098_v29 = vld [vmem:[%s3663_s0 + $0x378] sm:$0xff]  ;;  %v1991_v32 = vld [vmem:[%s3663_s0 + $0x260] sm:$0xff]  ;;  %v2100_v37 = vld [vmem:[%s3663_s0 + $0x388] sm:$0xff] }
   0xc   :  { %943 = vmatpush.msra.mxu2 %v27_v5  ;;  %1394 = vmatpush.msra.mxu3 %v27_v5  ;;  %v37_v30 = vld [vmem:[%s3663_s0 + $0x18] sm:$0xff]  ;;  %v2099_v33 = vld [vmem:[%s3663_s0 + $0x380] sm:$0xff]  ;;  %v39_v38 = vld [vmem:[%s3663_s0 + $0x28] sm:$0xff] }
   0xd   :  { %78 = vmatpush.msra.mxu0 %v27_v5  ;;  %492 = vmatpush.msra.mxu1 %v27_v5  ;;  %v1882_v31 = vld [vmem:[%s3663_s0 + $0x138] sm:$0xff]  ;;  %v38_v34 = vld [vmem:[%s3663_s0 + $0x20] sm:$0xff]  ;;  %v1884_v39 = vld [vmem:[%s3663_s0 + $0x148] sm:$0xff] }
   0xe   :  { %944 = vmatpush.msra.mxu2 %v26_v6  ;;  %1395 = vmatpush.msra.mxu3 %v26_v6  ;;  %v1883_v35 = vld [vmem:[%s3663_s0 + $0x140] sm:$0xff]  ;;  %v1993_v40 = vld [vmem:[%s3663_s0 + $0x270] sm:$0xff]  ;;  %v1994_v44 = vld [vmem:[%s3663_s0 + $0x278] sm:$0xff] }
   0xf   :  { %79 = vmatpush.msra.mxu0 %v26_v6  ;;  %493 = vmatpush.msra.mxu1 %v26_v6  ;;  %v2101_v41 = vld [vmem:[%s3663_s0 + $0x390] sm:$0xff]  ;;  %v2102_v45 = vld [vmem:[%s3663_s0 + $0x398] sm:$0xff]  ;;  %v1995_v48 = vld [vmem:[%s3663_s0 + $0x280] sm:$0xff] }
  0x10   :  { %945 = vmatpush.msra.mxu2 %v25_v7  ;;  %1396 = vmatpush.msra.mxu3 %v25_v7  ;;  %v40_v42 = vld [vmem:[%s3663_s0 + $0x30] sm:$0xff]  ;;  %v41_v46 = vld [vmem:[%s3663_s0 + $0x38] sm:$0xff]  ;;  %v2103_v49 = vld [vmem:[%s3663_s0 + $0x3a0] sm:$0xff] }
  0x11   :  { %80 = vmatpush.msra.mxu0 %v25_v7  ;;  %494 = vmatpush.msra.mxu1 %v25_v7  ;;  %v1885_v43 = vld [vmem:[%s3663_s0 + $0x150] sm:$0xff]  ;;  %v1886_v47 = vld [vmem:[%s3663_s0 + $0x158] sm:$0xff]  ;;  %v42_v50 = vld [vmem:[%s3663_s0 + $0x40] sm:$0xff] }
  0x12   :  { %946 = vmatpush.msra.mxu2 %v24_v8  ;;  %1397 = vmatpush.msra.mxu3 %v24_v8  ;;  %v1887_v51 = vld [vmem:[%s3663_s0 + $0x160] sm:$0xff]  ;;  %v1996_v52 = vld [vmem:[%s3663_s0 + $0x288] sm:$0xff]  ;;  %v1997_v56 = vld [vmem:[%s3663_s0 + $0x290] sm:$0xff] }
  0x13   :  { %81 = vmatpush.msra.mxu0 %v24_v8  ;;  %495 = vmatpush.msra.mxu1 %v24_v8  ;;  %v2104_v53 = vld [vmem:[%s3663_s0 + $0x3a8] sm:$0xff]  ;;  %v2105_v57 = vld [vmem:[%s3663_s0 + $0x3b0] sm:$0xff]  ;;  %v1998_v60 = vld [vmem:[%s3663_s0 + $0x298] sm:$0xff] }
  0x14   :  { %947 = vmatpush.msra.mxu2 %v23_v9  ;;  %1398 = vmatpush.msra.mxu3 %v23_v9  ;;  %v43_v54 = vld [vmem:[%s3663_s0 + $0x48] sm:$0xff]  ;;  %v44_v58 = vld [vmem:[%s3663_s0 + $0x50] sm:$0xff]  ;;  %v2106_v61 = vld [vmem:[%s3663_s0 + $0x3b8] sm:$0xff] }
  0x15   :  { %82 = vmatpush.msra.mxu0 %v23_v9  ;;  %496 = vmatpush.msra.mxu1 %v23_v9  ;;  %v1888_v55 = vld [vmem:[%s3663_s0 + $0x168] sm:$0xff]  ;;  %v1889_v59 = vld [vmem:[%s3663_s0 + $0x170] sm:$0xff]  ;;  %v45_v62 = vld [vmem:[%s3663_s0 + $0x58] sm:$0xff] }
  0x16   :  { %948 = vmatpush.msra.mxu2 %v22_v10  ;;  %1399 = vmatpush.msra.mxu3 %v22_v10  ;;  %v1890_v63 = vld [vmem:[%s3663_s0 + $0x178] sm:$0xff]  ;;  %v1999_v0 = vld [vmem:[%s3663_s0 + $0x2a0] sm:$0xff]  ;;  %v2000_v4 = vld [vmem:[%s3663_s0 + $0x2a8] sm:$0xff] }
  0x17   :  { %83 = vmatpush.msra.mxu0 %v22_v10  ;;  %497 = vmatpush.msra.mxu1 %v22_v10  ;;  %v2107_v1 = vld [vmem:[%s3663_s0 + $0x3c0] sm:$0xff]  ;;  %v2108_v5 = vld [vmem:[%s3663_s0 + $0x3c8] sm:$0xff]  ;;  %v2001_v8 = vld [vmem:[%s3663_s0 + $0x2b0] sm:$0xff] }
  0x18   :  { %949 = vmatpush.msra.mxu2 %v21_v11  ;;  %1400 = vmatpush.msra.mxu3 %v21_v11  ;;  %v46_v2 = vld [vmem:[%s3663_s0 + $0x60] sm:$0xff]  ;;  %v47_v6 = vld [vmem:[%s3663_s0 + $0x68] sm:$0xff]  ;;  %v2109_v9 = vld [vmem:[%s3663_s0 + $0x3d0] sm:$0xff] }
  0x19   :  { %84 = vmatpush.msra.mxu0 %v21_v11  ;;  %498 = vmatpush.msra.mxu1 %v21_v11  ;;  %v1891_v3 = vld [vmem:[%s3663_s0 + $0x180] sm:$0xff]  ;;  %v1892_v7 = vld [vmem:[%s3663_s0 + $0x188] sm:$0xff]  ;;  %v48_v10 = vld [vmem:[%s3663_s0 + $0x70] sm:$0xff] }
  0x1a   :  { %950 = vmatpush.msra.mxu2 %v20_v12  ;;  %1401 = vmatpush.msra.mxu3 %v20_v12  ;;  %v1893_v11 = vld [vmem:[%s3663_s0 + $0x190] sm:$0xff] }
  0x1b   :  { %85 = vmatpush.msra.mxu0 %v20_v12  ;;  %499 = vmatpush.msra.mxu1 %v20_v12  ;;  %v2002_v12 = vld [vmem:[%s3663_s0 + $0x2b8] sm:$0xff] }
  0x1c   :  { %951 = vmatpush.msra.mxu2 %v19_v13  ;;  %1402 = vmatpush.msra.mxu3 %v19_v13 }
  0x1d   :  { %86 = vmatpush.msra.mxu0 %v19_v13  ;;  %500 = vmatpush.msra.mxu1 %v19_v13  ;;  %v2110_v13 = vld [vmem:[%s3663_s0 + $0x3d8] sm:$0xff] }
  0x1e   :  { %952 = vmatpush.msra.mxu2 %v18_v14  ;;  %1403 = vmatpush.msra.mxu3 %v18_v14 }
  0x1f   :  { %87 = vmatpush.msra.mxu0 %v18_v14  ;;  %501 = vmatpush.msra.mxu1 %v18_v14  ;;  %v49_v14 = vld [vmem:[%s3663_s0 + $0x78] sm:$0xff] }
  0x20   :  { %953 = vmatpush.msra.mxu2 %v17_v15  ;;  %1404 = vmatpush.msra.mxu3 %v17_v15 }
  0x21   :  { %954 = vmatmul.f32.vlgmr.msra.gmra.mxu2 %v1987_v16  ;;  %1405 = vmatmul.f32.vlgmr.msra.gmra.mxu3 %v2095_v17  ;;  %v198_v16 = vld [vmem:[%s3665_s3] sm:$0xff] }
  0x22   :  { %88 = vmatpush.msra.mxu0 %v17_v15  ;;  %502 = vmatpush.msra.mxu1 %v17_v15  ;;  %v1894_v15 = vld [vmem:[%s3663_s0 + $0x198] sm:$0xff]  ;;  %v1915_v17 = vld [vmem:[%s3665_s3 + $0x120] sm:$0xff]  ;;  %vm234_vm0 = vcmp.ge.f32.partialorder %v198_v16, 0.25  ;;  %v2005_v16 = vld [vmem:[%s3663_s0 + $0x2d0] sm:$0xff] }
  0x23   :  { %89 = vmatmul.f32.vlgmr.msra.gmra.mxu0 %v34_v18  ;;  %503 = vmatmul.f32.vlgmr.msra.gmra.mxu1 %v1879_v19  ;;  %v2003_v18 = vld [vmem:[%s3663_s0 + $0x2c0] sm:$0xff]  ;;  %vm649_vm1 = vcmp.ge.f32.partialorder %v1915_v17, 0.25 }
  0x24   :  { %v2485_v19 = vld [vmem:[%s3664_s2] ss:$0 sm:$0xff] }
  0x29   :  { %957 = vmatmul.f32.gmra.mxu2 %v1988_v20  ;;  %1408 = vmatmul.f32.gmra.mxu3 %v2096_v21  ;;  %v2111_v20 = vld [vmem:[%s3663_s0 + $0x3e0] sm:$0xff] }
  0x2a   :  { %v2023_v21 = vld [vmem:[%s3665_s3 + $0x240] sm:$0xff] }
  0x2b   :  { %92 = vmatmul.f32.gmra.mxu0 %v35_v22  ;;  %506 = vmatmul.f32.gmra.mxu1 %v1880_v23  ;;  %v2131_v22 = vld [vmem:[%s3665_s3 + $0x360] sm:$0xff]  ;;  %vm1100_vm2 = vcmp.ge.f32.partialorder %v2023_v21, 0.25 }
  0x2c   :  { %vm1551_vm3 = vcmp.ge.f32.partialorder %v2131_v22, 0.25 }
  0x31   :  { %960 = vmatmul.f32.gmra.mxu2 %v1989_v24  ;;  %1411 = vmatmul.f32.gmra.mxu3 %v2097_v25  ;;  %v2207_v24 = vmov 0.0  }
  0x32   :  { %v1843_v25 = vsel %vm234_vm0, 1.0, %v2207_v24 }
  0x33   :  { %95 = vmatmul.f32.gmra.mxu0 %v36_v26  ;;  %509 = vmatmul.f32.gmra.mxu1 %v1881_v27  ;;  %v1951_v27 = vsel %vm649_vm1, 1.0, %v2207_v24 }
  0x39   :  { %963 = vmatmul.f32.gmra.mxu2 %v1990_v28  ;;  %1414 = vmatmul.f32.gmra.mxu3 %v2098_v29  ;;  %v50_v28 = vld [vmem:[%s3663_s0 + $0x80] sm:$0xff] }
  0x3a   :  { %v1895_v29 = vld [vmem:[%s3663_s0 + $0x1a0] sm:$0xff] }
  0x3b   :  { %98 = vmatmul.f32.gmra.mxu0 %v37_v30  ;;  %512 = vmatmul.f32.gmra.mxu1 %v1882_v31  ;;  %v199_v30 = vld [vmem:[%s3665_s3 + $0x8] sm:$0xff] }
  0x3c   :  { %vm235_vm4 = vcmp.ge.f32.partialorder %v199_v30, 0.25  ;;  %v52_v30 = vld [vmem:[%s3663_s0 + $0x90] sm:$0xff] }
  0x41   :  { %966 = vmatmul.f32.gmra.mxu2 %v1991_v32  ;;  %1417 = vmatmul.f32.gmra.mxu3 %v2099_v33  ;;  %v1916_v33 = vld [vmem:[%s3665_s3 + $0x128] sm:$0xff] }
  0x42   :  { %vm650_vm5 = vcmp.ge.f32.partialorder %v1916_v33, 0.25 }
  0x43   :  { %101 = vmatmul.f32.gmra.mxu0 %v38_v34  ;;  %515 = vmatmul.f32.gmra.mxu1 %v1883_v35 }
  0x49   :  { %969 = vmatmul.f32.gmra.mxu2 %v1992_v36  ;;  %1420 = vmatmul.f32.gmra.mxu3 %v2100_v37  ;;  %v2059_v37 = vsel %vm1100_vm2, 1.0, %v2207_v24 }
  0x4b   :  { %104 = vmatmul.f32.gmra.mxu0 %v39_v38  ;;  %518 = vmatmul.f32.gmra.mxu1 %v1884_v39  ;;  %v2167_v39 = vsel %vm1551_vm3, 1.0, %v2207_v24 }
  0x51   :  { %972 = vmatmul.f32.gmra.mxu2 %v1993_v40  ;;  %1423 = vmatmul.f32.gmra.mxu3 %v2101_v41 }
  0x53   :  { %107 = vmatmul.f32.gmra.mxu0 %v40_v42  ;;  %521 = vmatmul.f32.gmra.mxu1 %v1885_v43 }
  0x59   :  { %975 = vmatmul.f32.gmra.mxu2 %v1994_v44  ;;  %1426 = vmatmul.f32.gmra.mxu3 %v2102_v45  ;;  %v2024_v44 = vld [vmem:[%s3665_s3 + $0x248] sm:$0xff] }
  0x5a   :  { %v2132_v45 = vld [vmem:[%s3665_s3 + $0x368] sm:$0xff]  ;;  %vm1101_vm6 = vcmp.ge.f32.partialorder %v2024_v44, 0.25 }
  0x5b   :  { %110 = vmatmul.f32.gmra.mxu0 %v41_v46  ;;  %524 = vmatmul.f32.gmra.mxu1 %v1886_v47  ;;  %v2004_v46 = vld [vmem:[%s3663_s0 + $0x2c8] sm:$0xff]  ;;  %v1844_v47 = vsel %vm235_vm4, 1.0, %v2207_v24  ;;  %vm1552_vm7 = vcmp.ge.f32.partialorder %v2132_v45, 0.25 }
  0x61   :  { %978 = vmatmul.f32.gmra.mxu2 %v1995_v48  ;;  %1429 = vmatmul.f32.gmra.mxu3 %v2103_v49  ;;  %v2112_v48 = vld [vmem:[%s3663_s0 + $0x3e8] sm:$0xff] }
  0x63   :  { %113 = vmatmul.f32.gmra.mxu0 %v42_v50  ;;  %527 = vmatmul.f32.gmra.mxu1 %v1887_v51 }
  0x69   :  { %981 = vmatmul.f32.gmra.mxu2 %v1996_v52  ;;  %1432 = vmatmul.f32.gmra.mxu3 %v2104_v53 }
  0x6b   :  { %116 = vmatmul.f32.gmra.mxu0 %v43_v54  ;;  %530 = vmatmul.f32.gmra.mxu1 %v1888_v55  ;;  %v1952_v55 = vsel %vm650_vm5, 1.0, %v2207_v24 }
  0x71   :  { %984 = vmatmul.f32.gmra.mxu2 %v1997_v56  ;;  %1435 = vmatmul.f32.gmra.mxu3 %v2105_v57  ;;  %v51_v56 = vld [vmem:[%s3663_s0 + $0x88] sm:$0xff] }
  0x72   :  { %v1896_v57 = vld [vmem:[%s3663_s0 + $0x1a8] sm:$0xff] }
  0x73   :  { %119 = vmatmul.f32.gmra.mxu0 %v44_v58  ;;  %533 = vmatmul.f32.gmra.mxu1 %v1889_v59  ;;  %v200_v58 = vld [vmem:[%s3665_s3 + $0x10] sm:$0xff] }
  0x74   :  { %vm236_vm8 = vcmp.ge.f32.partialorder %v200_v58, 0.25 }
  0x75   :  { %v1845_v17 = vsel %vm236_vm8, 1.0, %v2207_v24 }
  0x79   :  { %987 = vmatmul.f32.gmra.mxu2 %v1998_v60  ;;  %1438 = vmatmul.f32.gmra.mxu3 %v2106_v61 }
  0x7b   :  { %122 = vmatmul.f32.gmra.mxu0 %v45_v62  ;;  %536 = vmatmul.f32.gmra.mxu1 %v1890_v63  ;;  %v1917_v63 = vld [vmem:[%s3665_s3 + $0x130] sm:$0xff] }
  0x7c   :  { %vm651_vm9 = vcmp.ge.f32.partialorder %v1917_v63, 0.25 }
  0x81   :  { %990 = vmatmul.f32.gmra.mxu2 %v1999_v0  ;;  %1441 = vmatmul.f32.gmra.mxu3 %v2107_v1 }
  0x83   :  { %125 = vmatmul.f32.gmra.mxu0 %v46_v2  ;;  %539 = vmatmul.f32.gmra.mxu1 %v1891_v3 }
  0x89   :  { %993 = vmatmul.f32.gmra.mxu2 %v2000_v4  ;;  %1444 = vmatmul.f32.gmra.mxu3 %v2108_v5 }
  0x8b   :  { %128 = vmatmul.f32.gmra.mxu0 %v47_v6  ;;  %542 = vmatmul.f32.gmra.mxu1 %v1892_v7  ;;  %v2060_v6 = vsel %vm1101_vm6, 1.0, %v2207_v24 }
  0x91   :  { %996 = vmatmul.f32.gmra.mxu2 %v2001_v8  ;;  %1447 = vmatmul.f32.gmra.mxu3 %v2109_v9  ;;  %v2168_v8 = vsel %vm1552_vm7, 1.0, %v2207_v24 }
  0x93   :  { %131 = vmatmul.f32.gmra.mxu0 %v48_v10  ;;  %545 = vmatmul.f32.gmra.mxu1 %v1893_v11 }
  0x99   :  { %999 = vmatmul.f32.gmra.mxu2 %v2002_v12  ;;  %1450 = vmatmul.f32.gmra.mxu3 %v2110_v13  ;;  %v2025_v13 = vld [vmem:[%s3665_s3 + $0x250] sm:$0xff] }
  0x9a   :  { %vm1102_vm10 = vcmp.ge.f32.partialorder %v2025_v13, 0.25 }
  0x9b   :  { %134 = vmatmul.f32.gmra.mxu0 %v49_v14  ;;  %548 = vmatmul.f32.gmra.mxu1 %v1894_v15  ;;  %v2133_v14 = vld [vmem:[%s3665_s3 + $0x370] sm:$0xff] }
  0x9c   :  { %vm1553_vm11 = vcmp.ge.f32.partialorder %v2133_v14, 0.25 }
  0x9d   :  { %v2169_v45 = vsel %vm1553_vm11, 1.0, %v2207_v24 }
  0xa0   :  { %v90_v23 = vpop.f32.mrf.mxu0  ;;  %v504_v26 = vpop.f32.mrf.mxu1 }
  0xa1   :  { %1002 = vmatmul.f32.gmra.mxu2 %v2003_v18  ;;  %v91_v31 = vadd.f32 %v2485_v19, %v90_v23  ;;  %v505_v32 = vadd.f32 %v2485_v19, %v504_v26  ;;  %1453 = vmatmul.f32.gmra.mxu3 %v2111_v20  ;;  %v2113_v18 = vld [vmem:[%s3663_s0 + $0x3f0] sm:$0xff] }
  0xa3   :  { %v342_v34 = vmul.f32 %v1843_v25, %v91_v31  ;;  %v757_v35 = vmul.f32 %v1951_v27, %v505_v32  ;;  %137 = vmatmul.f32.gmra.mxu0 %v50_v28  ;;  %551 = vmatmul.f32.gmra.mxu1 %v1895_v29  ;;  %v201_v25 = vld [vmem:[%s3665_s3 + $0x18] sm:$0xff]  ;;  %v1953_v29 = vsel %vm651_vm9, 1.0, %v2207_v24  ;;  %v1897_v31 = vld [vmem:[%s3663_s0 + $0x1b0] sm:$0xff] }
  0xa4   :  { %v955_v36 = vpop.f32.mrf.mxu2  ;;  %v1406_v38 = vpop.f32.mrf.mxu3  ;;  %vm237_vm12 = vcmp.ge.f32.partialorder %v201_v25, 0.25 }
  0xa5   :  { %v378_v40 = vmul.f32 1.3333334, %v342_v34  ;;  %v793_v41 = vmul.f32 1.3333334, %v757_v35  ;;  %v956_v42 = vadd.f32 %v2485_v19, %v955_v36  ;;  %v1407_v43 = vadd.f32 %v2485_v19, %v1406_v38  ;;  %v1918_v36 = vld [vmem:[%s3665_s3 + $0x138] sm:$0xff] }
  0xa6   :  { %vm652_vm13 = vcmp.ge.f32.partialorder %v1918_v36, 0.25 }
  0xa7   :  { %v414_v49 = vmax.f32 %v378_v40, 0.0  ;;  %v829_v50 = vmax.f32 %v793_v41, 0.0  ;;  %v1208_v51 = vmul.f32 %v2059_v37, %v956_v42  ;;  %v1659_v52 = vmul.f32 %v2167_v39, %v1407_v43 }
  0xa8   :  { %v93_v53 = vpop.f32.mrf.mxu0  ;;  %v507_v54 = vpop.f32.mrf.mxu1  ;;  %v2061_v43 = vsel %vm1102_vm10, 1.0, %v2207_v24  ;;  %v1954_v63 = vsel %vm652_vm13, 1.0, %v2207_v24 }
  0xa9   :  { %v865_v59 = vmax.f32 %v414_v49, %v829_v50  ;;  %v1244_v60 = vmul.f32 1.3333334, %v1208_v51  ;;  %v1695_v61 = vmul.f32 1.3333334, %v1659_v52  ;;  %1005 = vmatmul.f32.gmra.mxu2 %v2004_v46  ;;  %v94_v62 = vadd.f32 %v2485_v19, %v93_v53  ;;  %1456 = vmatmul.f32.gmra.mxu3 %v2112_v48  ;;  %v2026_v50 = vld [vmem:[%s3665_s3 + $0x258] sm:$0xff] }
  0xaa   :  { %v508_v0 = vadd.f32 %v2485_v19, %v507_v54  ;;  %v2134_v51 = vld [vmem:[%s3665_s3 + $0x378] sm:$0xff]  ;;  %v1846_v54 = vsel %vm237_vm12, 1.0, %v2207_v24  ;;  %vm1103_vm14 = vcmp.ge.f32.partialorder %v2026_v50, 0.25 }
  0xab   :  { %v1280_v1 = vmax.f32 %v1244_v60, 0.0  ;;  %v1731_v2 = vmax.f32 %v1695_v61, 0.0  ;;  %v343_v3 = vmul.f32 %v1844_v47, %v94_v62  ;;  %140 = vmatmul.f32.gmra.mxu0 %v51_v56  ;;  %554 = vmatmul.f32.gmra.mxu1 %v1896_v57  ;;  %v2006_v53 = vld [vmem:[%s3663_s0 + $0x2d8] sm:$0xff]  ;;  %vm1554_vm15 = vcmp.ge.f32.partialorder %v2134_v51, 0.25 }
  0xac   :  { %v758_v4 = vmul.f32 %v1952_v55, %v508_v0  ;;  %v958_v5 = vpop.f32.mrf.mxu2  ;;  %v1409_v7 = vpop.f32.mrf.mxu3  ;;  %v53_v0 = vld [vmem:[%s3663_s0 + $0x98] sm:$0xff]  ;;  %v2062_v14 = vsel %vm1103_vm14, 1.0, %v2207_v24 }
  0xad   :  { %v1316_v9 = vmax.f32 %v865_v59, %v1280_v1  ;;  %v379_v10 = vmul.f32 1.3333334, %v343_v3  ;;  %v959_v11 = vadd.f32 %v2485_v19, %v958_v5  ;;  %v1410_v12 = vadd.f32 %v2485_v19, %v1409_v7  ;;  %v2114_v59 = vld [vmem:[%s3663_s0 + $0x3f8] sm:$0xff]  ;;  %v1919_v7 = vld [vmem:[%s3665_s3 + $0x140] sm:$0xff] }
  0xae   :  { %v794_v15 = vmul.f32 1.3333334, %v758_v4  ;;  %v1898_v1 = vld [vmem:[%s3663_s0 + $0x1b8] sm:$0xff]  ;;  %vm653_vm1 = vcmp.ge.f32.partialorder %v1919_v7, 0.25 }
  0xaf   :  { %v1767_v20 = vmax.f32 %v1316_v9, %v1731_v2  ;;  %v415_v21 = vmax.f32 %v379_v10, 0.0  ;;  %v1209_v22 = vmul.f32 %v2060_v6, %v959_v11  ;;  %v1660_v23 = vmul.f32 %v2168_v8, %v1410_v12  ;;  %v202_v2 = vld [vmem:[%s3665_s3 + $0x20] sm:$0xff] }
  0xb0   :  { %v830_v26 = vmax.f32 %v794_v15, 0.0  ;;  %v96_v27 = vpop.f32.mrf.mxu0  ;;  %v510_v28 = vpop.f32.mrf.mxu1  ;;  %vm238_vm0 = vcmp.ge.f32.partialorder %v202_v2, 0.25  ;;  %v1955_v36 = vsel %vm653_vm1, 1.0, %v2207_v24 }
  0xb1   :  { %1803 = vst [vmem:[%s3666_s4] sm:$0xff] %v1767_v20  ;;  %v1245_v32 = vmul.f32 1.3333334, %v1209_v22  ;;  %v1696_v33 = vmul.f32 1.3333334, %v1660_v23  ;;  %1008 = vmatmul.f32.gmra.mxu2 %v2005_v16  ;;  %v97_v34 = vadd.f32 %v2485_v19, %v96_v27  ;;  %v511_v35 = vadd.f32 %v2485_v19, %v510_v28  ;;  %1459 = vmatmul.f32.gmra.mxu3 %v2113_v18  ;;  %v2027_v22 = vld [vmem:[%s3665_s3 + $0x260] sm:$0xff] }
  0xb2   :  { %v866_v37 = vmax.f32 %v415_v21, %v830_v26  ;;  %v2170_v16 = vsel %vm1554_vm15, 1.0, %v2207_v24  ;;  %v2135_v23 = vld [vmem:[%s3665_s3 + $0x380] sm:$0xff]  ;;  %v1847_v27 = vsel %vm238_vm0, 1.0, %v2207_v24  ;;  %vm1104_vm2 = vcmp.ge.f32.partialorder %v2027_v22, 0.25 }
  0xb3   :  { %v1281_v38 = vmax.f32 %v1245_v32, 0.0  ;;  %v1732_v39 = vmax.f32 %v1696_v33, 0.0  ;;  %v344_v40 = vmul.f32 %v1845_v17, %v97_v34  ;;  %v759_v41 = vmul.f32 %v1953_v29, %v511_v35  ;;  %143 = vmatmul.f32.gmra.mxu0 %v52_v30  ;;  %557 = vmatmul.f32.gmra.mxu1 %v1897_v31  ;;  %v2007_v26 = vld [vmem:[%s3663_s0 + $0x2e0] sm:$0xff] }
  0xb4   :  { %v961_v42 = vpop.f32.mrf.mxu2  ;;  %v1412_v44 = vpop.f32.mrf.mxu3  ;;  %v2115_v32 = vld [vmem:[%s3663_s0 + $0x400] sm:$0xff]  ;;  %vm1555_vm3 = vcmp.ge.f32.partialorder %v2135_v23, 0.25  ;;  %v2063_v51 = vsel %vm1104_vm2, 1.0, %v2207_v24 }
  0xb5   :  { %v1317_v46 = vmax.f32 %v866_v37, %v1281_v38  ;;  %v380_v47 = vmul.f32 1.3333334, %v344_v40  ;;  %v795_v48 = vmul.f32 1.3333334, %v759_v41  ;;  %v962_v49 = vadd.f32 %v2485_v19, %v961_v42  ;;  %v54_v37 = vld [vmem:[%s3663_s0 + $0xa0] sm:$0xff] }
  0xb6   :  { %v1413_v52 = vadd.f32 %v2485_v19, %v1412_v44  ;;  %v1899_v38 = vld [vmem:[%s3663_s0 + $0x1c0] sm:$0xff]  ;;  %v1920_v44 = vld [vmem:[%s3665_s3 + $0x148] sm:$0xff] }
  0xb7   :  { %v1768_v55 = vmax.f32 %v1317_v46, %v1732_v39  ;;  %v416_v56 = vmax.f32 %v380_v47, 0.0  ;;  %v831_v57 = vmax.f32 %v795_v48, 0.0  ;;  %v1210_v58 = vmul.f32 %v2061_v43, %v962_v49  ;;  %v203_v39 = vld [vmem:[%s3665_s3 + $0x28] sm:$0xff] }
  0xb8   :  { %v1661_v60 = vmul.f32 %v2169_v45, %v1413_v52  ;;  %v99_v61 = vpop.f32.mrf.mxu0  ;;  %v513_v62 = vpop.f32.mrf.mxu1  ;;  %vm239_vm4 = vcmp.ge.f32.partialorder %v203_v39, 0.25  ;;  %vm654_vm5 = vcmp.ge.f32.partialorder %v1920_v44, 0.25 }
  0xb9   :  { %1804 = vst [vmem:[%s3666_s4 + $0x8] sm:$0xff] %v1768_v55  ;;  %v867_v3 = vmax.f32 %v416_v56, %v831_v57  ;;  %v1246_v4 = vmul.f32 1.3333334, %v1210_v58  ;;  %1011 = vmatmul.f32.gmra.mxu2 %v2006_v53  ;;  %v100_v5 = vadd.f32 %v2485_v19, %v99_v61  ;;  %v514_v6 = vadd.f32 %v2485_v19, %v513_v62  ;;  %v2028_v58 = vld [vmem:[%s3665_s3 + $0x268] sm:$0xff] }
  0xba   :  { %v1697_v8 = vmul.f32 1.3333334, %v1661_v60  ;;  %1462 = vmatmul.f32.gmra.mxu3 %v2114_v59  ;;  %v2171_v53 = vsel %vm1555_vm3, 1.0, %v2207_v24  ;;  %v2136_v59 = vld [vmem:[%s3665_s3 + $0x388] sm:$0xff]  ;;  %v1848_v62 = vsel %vm239_vm4, 1.0, %v2207_v24  ;;  %v1956_v7 = vsel %vm654_vm5, 1.0, %v2207_v24 }
  0xbb   :  { %v1282_v9 = vmax.f32 %v1246_v4, 0.0  ;;  %v345_v10 = vmul.f32 %v1846_v54, %v100_v5  ;;  %v760_v11 = vmul.f32 %v1954_v63, %v514_v6  ;;  %146 = vmatmul.f32.gmra.mxu0 %v53_v0  ;;  %560 = vmatmul.f32.gmra.mxu1 %v1898_v1  ;;  %v2008_v61 = vld [vmem:[%s3663_s0 + $0x2e8] sm:$0xff]  ;;  %vm1105_vm6 = vcmp.ge.f32.partialorder %v2028_v58, 0.25 }
  0xbc   :  { %v1733_v12 = vmax.f32 %v1697_v8, 0.0  ;;  %v964_v13 = vpop.f32.mrf.mxu2  ;;  %v1415_v15 = vpop.f32.mrf.mxu3  ;;  %v55_v8 = vld [vmem:[%s3663_s0 + $0xa8] sm:$0xff]  ;;  %vm1556_vm7 = vcmp.ge.f32.partialorder %v2136_v59, 0.25  ;;  %v2064_v23 = vsel %vm1105_vm6, 1.0, %v2207_v24 }
  0xbd   :  { %v1318_v17 = vmax.f32 %v867_v3, %v1282_v9  ;;  %v381_v18 = vmul.f32 1.3333334, %v345_v10  ;;  %v796_v20 = vmul.f32 1.3333334, %v760_v11  ;;  %v965_v21 = vadd.f32 %v2485_v19, %v964_v13  ;;  %v2116_v3 = vld [vmem:[%s3663_s0 + $0x408] sm:$0xff]  ;;  %v204_v10 = vld [vmem:[%s3665_s3 + $0x30] sm:$0xff] }
  0xbe   :  { %v1416_v25 = vadd.f32 %v2485_v19, %v1415_v15  ;;  %v1900_v9 = vld [vmem:[%s3663_s0 + $0x1c8] sm:$0xff]  ;;  %v1921_v15 = vld [vmem:[%s3665_s3 + $0x150] sm:$0xff]  ;;  %vm240_vm8 = vcmp.ge.f32.partialorder %v204_v10, 0.25 }
  0xbf   :  { %v1769_v28 = vmax.f32 %v1318_v17, %v1733_v12  ;;  %v417_v29 = vmax.f32 %v381_v18, 0.0  ;;  %v832_v30 = vmax.f32 %v796_v20, 0.0  ;;  %v1211_v31 = vmul.f32 %v2062_v14, %v965_v21 }
  0xc0   :  { %v1662_v33 = vmul.f32 %v2170_v16, %v1416_v25  ;;  %v102_v34 = vpop.f32.mrf.mxu0  ;;  %v516_v35 = vpop.f32.mrf.mxu1  ;;  %vm655_vm9 = vcmp.ge.f32.partialorder %v1921_v15, 0.25 }
  0xc1   :  { %1805 = vst [vmem:[%s3666_s4 + $0x10] sm:$0xff] %v1769_v28  ;;  %v868_v40 = vmax.f32 %v417_v29, %v832_v30  ;;  %v1247_v41 = vmul.f32 1.3333334, %v1211_v31  ;;  %1014 = vmatmul.f32.gmra.mxu2 %v2007_v26  ;;  %v103_v42 = vadd.f32 %v2485_v19, %v102_v34  ;;  %v517_v43 = vadd.f32 %v2485_v19, %v516_v35  ;;  %v2029_v31 = vld [vmem:[%s3665_s3 + $0x270] sm:$0xff] }
  0xc2   :  { %v1698_v45 = vmul.f32 1.3333334, %v1662_v33  ;;  %1465 = vmatmul.f32.gmra.mxu3 %v2115_v32  ;;  %v2172_v26 = vsel %vm1556_vm7, 1.0, %v2207_v24  ;;  %v2137_v32 = vld [vmem:[%s3665_s3 + $0x390] sm:$0xff]  ;;  %v1849_v35 = vsel %vm240_vm8, 1.0, %v2207_v24  ;;  %v1957_v44 = vsel %vm655_vm9, 1.0, %v2207_v24 }
  0xc3   :  { %v1283_v46 = vmax.f32 %v1247_v41, 0.0  ;;  %v346_v47 = vmul.f32 %v1847_v27, %v103_v42  ;;  %v761_v48 = vmul.f32 %v1955_v36, %v517_v43  ;;  %149 = vmatmul.f32.gmra.mxu0 %v54_v37  ;;  %563 = vmatmul.f32.gmra.mxu1 %v1899_v38  ;;  %v2009_v34 = vld [vmem:[%s3663_s0 + $0x2f0] sm:$0xff]  ;;  %vm1106_vm10 = vcmp.ge.f32.partialorder %v2029_v31, 0.25 }
  0xc4   :  { %v1734_v49 = vmax.f32 %v1698_v45, 0.0  ;;  %v967_v50 = vpop.f32.mrf.mxu2  ;;  %v1418_v52 = vpop.f32.mrf.mxu3  ;;  %v56_v45 = vld [vmem:[%s3663_s0 + $0xb0] sm:$0xff]  ;;  %vm1557_vm11 = vcmp.ge.f32.partialorder %v2137_v32, 0.25  ;;  %v2065_v59 = vsel %vm1106_vm10, 1.0, %v2207_v24 }
  0xc5   :  { %v1319_v54 = vmax.f32 %v868_v40, %v1283_v46  ;;  %v382_v55 = vmul.f32 1.3333334, %v346_v47  ;;  %v797_v56 = vmul.f32 1.3333334, %v761_v48  ;;  %v968_v57 = vadd.f32 %v2485_v19, %v967_v50  ;;  %v2117_v40 = vld [vmem:[%s3663_s0 + $0x410] sm:$0xff]  ;;  %v205_v47 = vld [vmem:[%s3665_s3 + $0x38] sm:$0xff] }
  0xc6   :  { %v1419_v60 = vadd.f32 %v2485_v19, %v1418_v52  ;;  %v1901_v46 = vld [vmem:[%s3663_s0 + $0x1d0] sm:$0xff]  ;;  %v1922_v52 = vld [vmem:[%s3665_s3 + $0x158] sm:$0xff]  ;;  %vm241_vm12 = vcmp.ge.f32.partialorder %v205_v47, 0.25 }
  0xc7   :  { %v1770_v63 = vmax.f32 %v1319_v54, %v1734_v49  ;;  %v418_v0 = vmax.f32 %v382_v55, 0.0  ;;  %v833_v1 = vmax.f32 %v797_v56, 0.0  ;;  %v1212_v2 = vmul.f32 %v2063_v51, %v968_v57 }
  0xc8   :  { %v1663_v4 = vmul.f32 %v2171_v53, %v1419_v60  ;;  %v105_v5 = vpop.f32.mrf.mxu0  ;;  %v519_v6 = vpop.f32.mrf.mxu1  ;;  %vm656_vm13 = vcmp.ge.f32.partialorder %v1922_v52, 0.25 }
  0xc9   :  { %1806 = vst [vmem:[%s3666_s4 + $0x18] sm:$0xff] %v1770_v63  ;;  %v869_v11 = vmax.f32 %v418_v0, %v833_v1  ;;  %v1248_v12 = vmul.f32 1.3333334, %v1212_v2  ;;  %1017 = vmatmul.f32.gmra.mxu2 %v2008_v61  ;;  %v106_v13 = vadd.f32 %v2485_v19, %v105_v5  ;;  %v520_v14 = vadd.f32 %v2485_v19, %v519_v6  ;;  %v2030_v2 = vld [vmem:[%s3665_s3 + $0x278] sm:$0xff] }
  0xca   :  { %v1699_v16 = vmul.f32 1.3333334, %v1663_v4  ;;  %1468 = vmatmul.f32.gmra.mxu3 %v2116_v3  ;;  %v2173_v61 = vsel %vm1557_vm11, 1.0, %v2207_v24  ;;  %v2138_v3 = vld [vmem:[%s3665_s3 + $0x398] sm:$0xff]  ;;  %v1850_v6 = vsel %vm241_vm12, 1.0, %v2207_v24  ;;  %v1958_v15 = vsel %vm656_vm13, 1.0, %v2207_v24 }
  0xcb   :  { %v1284_v17 = vmax.f32 %v1248_v12, 0.0  ;;  %v347_v18 = vmul.f32 %v1848_v62, %v106_v13  ;;  %v762_v20 = vmul.f32 %v1956_v7, %v520_v14  ;;  %152 = vmatmul.f32.gmra.mxu0 %v55_v8  ;;  %566 = vmatmul.f32.gmra.mxu1 %v1900_v9  ;;  %v2010_v5 = vld [vmem:[%s3663_s0 + $0x2f8] sm:$0xff]  ;;  %vm1107_vm14 = vcmp.ge.f32.partialorder %v2030_v2, 0.25 }
  0xcc   :  { %v1735_v21 = vmax.f32 %v1699_v16, 0.0  ;;  %v970_v22 = vpop.f32.mrf.mxu2  ;;  %v1421_v25 = vpop.f32.mrf.mxu3  ;;  %v57_v16 = vld [vmem:[%s3663_s0 + $0xb8] sm:$0xff]  ;;  %vm1558_vm15 = vcmp.ge.f32.partialorder %v2138_v3, 0.25  ;;  %v2066_v32 = vsel %vm1107_vm14, 1.0, %v2207_v24 }
  0xcd   :  { %v1320_v27 = vmax.f32 %v869_v11, %v1284_v17  ;;  %v383_v28 = vmul.f32 1.3333334, %v347_v18  ;;  %v798_v29 = vmul.f32 1.3333334, %v762_v20  ;;  %v971_v30 = vadd.f32 %v2485_v19, %v970_v22  ;;  %v2118_v11 = vld [vmem:[%s3663_s0 + $0x418] sm:$0xff]  ;;  %v206_v18 = vld [vmem:[%s3665_s3 + $0x40] sm:$0xff] }
  0xce   :  { %v1422_v33 = vadd.f32 %v2485_v19, %v1421_v25  ;;  %v1902_v17 = vld [vmem:[%s3663_s0 + $0x1d8] sm:$0xff]  ;;  %v1923_v25 = vld [vmem:[%s3665_s3 + $0x160] sm:$0xff]  ;;  %vm242_vm0 = vcmp.ge.f32.partialorder %v206_v18, 0.25 }
  0xcf   :  { %v1771_v36 = vmax.f32 %v1320_v27, %v1735_v21  ;;  %v419_v37 = vmax.f32 %v383_v28, 0.0  ;;  %v834_v38 = vmax.f32 %v798_v29, 0.0  ;;  %v1213_v39 = vmul.f32 %v2064_v23, %v971_v30 }
  0xd0   :  { %v1664_v41 = vmul.f32 %v2172_v26, %v1422_v33  ;;  %v108_v42 = vpop.f32.mrf.mxu0  ;;  %v522_v43 = vpop.f32.mrf.mxu1  ;;  %vm657_vm1 = vcmp.ge.f32.partialorder %v1923_v25, 0.25 }
  0xd1   :  { %1807 = vst [vmem:[%s3666_s4 + $0x20] sm:$0xff] %v1771_v36  ;;  %v870_v48 = vmax.f32 %v419_v37, %v834_v38  ;;  %v1249_v49 = vmul.f32 1.3333334, %v1213_v39  ;;  %1020 = vmatmul.f32.gmra.mxu2 %v2009_v34  ;;  %v109_v50 = vadd.f32 %v2485_v19, %v108_v42  ;;  %v523_v51 = vadd.f32 %v2485_v19, %v522_v43  ;;  %v2031_v39 = vld [vmem:[%s3665_s3 + $0x280] sm:$0xff] }
  0xd2   :  { %v1700_v53 = vmul.f32 1.3333334, %v1664_v41  ;;  %1471 = vmatmul.f32.gmra.mxu3 %v2117_v40  ;;  %v2174_v34 = vsel %vm1558_vm15, 1.0, %v2207_v24  ;;  %v2139_v40 = vld [vmem:[%s3665_s3 + $0x3a0] sm:$0xff]  ;;  %v1851_v43 = vsel %vm242_vm0, 1.0, %v2207_v24  ;;  %v1959_v52 = vsel %vm657_vm1, 1.0, %v2207_v24 }
  0xd3   :  { %v1285_v54 = vmax.f32 %v1249_v49, 0.0  ;;  %v348_v55 = vmul.f32 %v1849_v35, %v109_v50  ;;  %v763_v56 = vmul.f32 %v1957_v44, %v523_v51  ;;  %155 = vmatmul.f32.gmra.mxu0 %v56_v45  ;;  %569 = vmatmul.f32.gmra.mxu1 %v1901_v46  ;;  %v2011_v42 = vld [vmem:[%s3663_s0 + $0x300] sm:$0xff]  ;;  %vm1108_vm2 = vcmp.ge.f32.partialorder %v2031_v39, 0.25 }
  0xd4   :  { %v1736_v57 = vmax.f32 %v1700_v53, 0.0  ;;  %v973_v58 = vpop.f32.mrf.mxu2  ;;  %v1424_v60 = vpop.f32.mrf.mxu3  ;;  %v58_v53 = vld [vmem:[%s3663_s0 + $0xc0] sm:$0xff]  ;;  %vm1559_vm3 = vcmp.ge.f32.partialorder %v2139_v40, 0.25  ;;  %v2067_v3 = vsel %vm1108_vm2, 1.0, %v2207_v24 }
  0xd5   :  { %v1321_v62 = vmax.f32 %v870_v48, %v1285_v54  ;;  %v384_v63 = vmul.f32 1.3333334, %v348_v55  ;;  %v799_v0 = vmul.f32 1.3333334, %v763_v56  ;;  %v974_v1 = vadd.f32 %v2485_v19, %v973_v58  ;;  %v2119_v48 = vld [vmem:[%s3663_s0 + $0x420] sm:$0xff]  ;;  %v207_v55 = vld [vmem:[%s3665_s3 + $0x48] sm:$0xff] }
  0xd6   :  { %v1425_v4 = vadd.f32 %v2485_v19, %v1424_v60  ;;  %v1903_v54 = vld [vmem:[%s3663_s0 + $0x1e0] sm:$0xff]  ;;  %v1924_v60 = vld [vmem:[%s3665_s3 + $0x168] sm:$0xff]  ;;  %vm243_vm4 = vcmp.ge.f32.partialorder %v207_v55, 0.25 }
  0xd7   :  { %v1772_v7 = vmax.f32 %v1321_v62, %v1736_v57  ;;  %v420_v8 = vmax.f32 %v384_v63, 0.0  ;;  %v835_v9 = vmax.f32 %v799_v0, 0.0  ;;  %v1214_v10 = vmul.f32 %v2065_v59, %v974_v1 }
  0xd8   :  { %v1665_v12 = vmul.f32 %v2173_v61, %v1425_v4  ;;  %v111_v13 = vpop.f32.mrf.mxu0  ;;  %v525_v14 = vpop.f32.mrf.mxu1  ;;  %vm658_vm5 = vcmp.ge.f32.partialorder %v1924_v60, 0.25 }
  0xd9   :  { %1808 = vst [vmem:[%s3666_s4 + $0x28] sm:$0xff] %v1772_v7  ;;  %v871_v20 = vmax.f32 %v420_v8, %v835_v9  ;;  %v1250_v21 = vmul.f32 1.3333334, %v1214_v10  ;;  %1023 = vmatmul.f32.gmra.mxu2 %v2010_v5  ;;  %v112_v22 = vadd.f32 %v2485_v19, %v111_v13  ;;  %v526_v23 = vadd.f32 %v2485_v19, %v525_v14  ;;  %v2032_v10 = vld [vmem:[%s3665_s3 + $0x288] sm:$0xff] }
  0xda   :  { %v1701_v26 = vmul.f32 1.3333334, %v1665_v12  ;;  %1474 = vmatmul.f32.gmra.mxu3 %v2118_v11  ;;  %v2175_v5 = vsel %vm1559_vm3, 1.0, %v2207_v24  ;;  %v2140_v11 = vld [vmem:[%s3665_s3 + $0x3a8] sm:$0xff]  ;;  %v1852_v14 = vsel %vm243_vm4, 1.0, %v2207_v24  ;;  %v1960_v25 = vsel %vm658_vm5, 1.0, %v2207_v24 }
  0xdb   :  { %v1286_v27 = vmax.f32 %v1250_v21, 0.0  ;;  %v349_v28 = vmul.f32 %v1850_v6, %v112_v22  ;;  %v764_v29 = vmul.f32 %v1958_v15, %v526_v23  ;;  %158 = vmatmul.f32.gmra.mxu0 %v57_v16  ;;  %572 = vmatmul.f32.gmra.mxu1 %v1902_v17  ;;  %v2012_v13 = vld [vmem:[%s3663_s0 + $0x308] sm:$0xff]  ;;  %vm1109_vm6 = vcmp.ge.f32.partialorder %v2032_v10, 0.25 }
  0xdc   :  { %v1737_v30 = vmax.f32 %v1701_v26, 0.0  ;;  %v976_v31 = vpop.f32.mrf.mxu2  ;;  %v1427_v33 = vpop.f32.mrf.mxu3  ;;  %v59_v26 = vld [vmem:[%s3663_s0 + $0xc8] sm:$0xff]  ;;  %vm1560_vm7 = vcmp.ge.f32.partialorder %v2140_v11, 0.25  ;;  %v2068_v40 = vsel %vm1109_vm6, 1.0, %v2207_v24 }
  0xdd   :  { %v1322_v35 = vmax.f32 %v871_v20, %v1286_v27  ;;  %v385_v36 = vmul.f32 1.3333334, %v349_v28  ;;  %v800_v37 = vmul.f32 1.3333334, %v764_v29  ;;  %v977_v38 = vadd.f32 %v2485_v19, %v976_v31  ;;  %v2120_v20 = vld [vmem:[%s3663_s0 + $0x428] sm:$0xff]  ;;  %v208_v28 = vld [vmem:[%s3665_s3 + $0x50] sm:$0xff] }
  0xde   :  { %v1428_v41 = vadd.f32 %v2485_v19, %v1427_v33  ;;  %v1904_v27 = vld [vmem:[%s3663_s0 + $0x1e8] sm:$0xff]  ;;  %v1925_v33 = vld [vmem:[%s3665_s3 + $0x170] sm:$0xff]  ;;  %vm244_vm8 = vcmp.ge.f32.partialorder %v208_v28, 0.25 }
  0xdf   :  { %v1773_v44 = vmax.f32 %v1322_v35, %v1737_v30  ;;  %v421_v45 = vmax.f32 %v385_v36, 0.0  ;;  %v836_v46 = vmax.f32 %v800_v37, 0.0  ;;  %v1215_v47 = vmul.f32 %v2066_v32, %v977_v38 }
  0xe0   :  { %v1666_v49 = vmul.f32 %v2174_v34, %v1428_v41  ;;  %v114_v50 = vpop.f32.mrf.mxu0  ;;  %v528_v51 = vpop.f32.mrf.mxu1  ;;  %vm659_vm9 = vcmp.ge.f32.partialorder %v1925_v33, 0.25 }
  0xe1   :  { %1809 = vst [vmem:[%s3666_s4 + $0x30] sm:$0xff] %v1773_v44  ;;  %v872_v56 = vmax.f32 %v421_v45, %v836_v46  ;;  %v1251_v57 = vmul.f32 1.3333334, %v1215_v47  ;;  %1026 = vmatmul.f32.gmra.mxu2 %v2011_v42  ;;  %v115_v58 = vadd.f32 %v2485_v19, %v114_v50  ;;  %v529_v59 = vadd.f32 %v2485_v19, %v528_v51  ;;  %v2033_v47 = vld [vmem:[%s3665_s3 + $0x290] sm:$0xff] }
  0xe2   :  { %v1702_v61 = vmul.f32 1.3333334, %v1666_v49  ;;  %1477 = vmatmul.f32.gmra.mxu3 %v2119_v48  ;;  %v2176_v42 = vsel %vm1560_vm7, 1.0, %v2207_v24  ;;  %v2141_v48 = vld [vmem:[%s3665_s3 + $0x3b0] sm:$0xff]  ;;  %v1853_v51 = vsel %vm244_vm8, 1.0, %v2207_v24  ;;  %v1961_v60 = vsel %vm659_vm9, 1.0, %v2207_v24 }
  0xe3   :  { %v1287_v62 = vmax.f32 %v1251_v57, 0.0  ;;  %v350_v63 = vmul.f32 %v1851_v43, %v115_v58  ;;  %v765_v0 = vmul.f32 %v1959_v52, %v529_v59  ;;  %161 = vmatmul.f32.gmra.mxu0 %v58_v53  ;;  %575 = vmatmul.f32.gmra.mxu1 %v1903_v54  ;;  %v2013_v50 = vld [vmem:[%s3663_s0 + $0x310] sm:$0xff]  ;;  %vm1110_vm10 = vcmp.ge.f32.partialorder %v2033_v47, 0.25 }
  0xe4   :  { %v1738_v1 = vmax.f32 %v1702_v61, 0.0  ;;  %v979_v2 = vpop.f32.mrf.mxu2  ;;  %v1430_v4 = vpop.f32.mrf.mxu3  ;;  %v60_v61 = vld [vmem:[%s3663_s0 + $0xd0] sm:$0xff]  ;;  %vm1561_vm11 = vcmp.ge.f32.partialorder %v2141_v48, 0.25  ;;  %v2069_v11 = vsel %vm1110_vm10, 1.0, %v2207_v24 }
  0xe5   :  { %v1323_v6 = vmax.f32 %v872_v56, %v1287_v62  ;;  %v386_v7 = vmul.f32 1.3333334, %v350_v63  ;;  %v801_v8 = vmul.f32 1.3333334, %v765_v0  ;;  %v980_v9 = vadd.f32 %v2485_v19, %v979_v2  ;;  %v2121_v56 = vld [vmem:[%s3663_s0 + $0x430] sm:$0xff]  ;;  %v209_v63 = vld [vmem:[%s3665_s3 + $0x58] sm:$0xff] }
  0xe6   :  { %v1431_v12 = vadd.f32 %v2485_v19, %v1430_v4  ;;  %v1905_v62 = vld [vmem:[%s3663_s0 + $0x1f0] sm:$0xff]  ;;  %v1926_v4 = vld [vmem:[%s3665_s3 + $0x178] sm:$0xff]  ;;  %vm245_vm12 = vcmp.ge.f32.partialorder %v209_v63, 0.25 }
  0xe7   :  { %v1774_v15 = vmax.f32 %v1323_v6, %v1738_v1  ;;  %v422_v16 = vmax.f32 %v386_v7, 0.0  ;;  %v837_v17 = vmax.f32 %v801_v8, 0.0  ;;  %v1216_v18 = vmul.f32 %v2067_v3, %v980_v9 }
  0xe8   :  { %v1667_v21 = vmul.f32 %v2175_v5, %v1431_v12  ;;  %v117_v22 = vpop.f32.mrf.mxu0  ;;  %v531_v23 = vpop.f32.mrf.mxu1  ;;  %vm660_vm13 = vcmp.ge.f32.partialorder %v1926_v4, 0.25 }
  0xe9   :  { %1810 = vst [vmem:[%s3666_s4 + $0x38] sm:$0xff] %v1774_v15  ;;  %v873_v29 = vmax.f32 %v422_v16, %v837_v17  ;;  %v1252_v30 = vmul.f32 1.3333334, %v1216_v18  ;;  %1029 = vmatmul.f32.gmra.mxu2 %v2012_v13  ;;  %v118_v31 = vadd.f32 %v2485_v19, %v117_v22  ;;  %v532_v32 = vadd.f32 %v2485_v19, %v531_v23  ;;  %v2034_v18 = vld [vmem:[%s3665_s3 + $0x298] sm:$0xff] }
  0xea   :  { %v1703_v34 = vmul.f32 1.3333334, %v1667_v21  ;;  %1480 = vmatmul.f32.gmra.mxu3 %v2120_v20  ;;  %v2177_v13 = vsel %vm1561_vm11, 1.0, %v2207_v24  ;;  %v2142_v20 = vld [vmem:[%s3665_s3 + $0x3b8] sm:$0xff]  ;;  %v1854_v23 = vsel %vm245_vm12, 1.0, %v2207_v24  ;;  %v1962_v33 = vsel %vm660_vm13, 1.0, %v2207_v24 }
  0xeb   :  { %v1288_v35 = vmax.f32 %v1252_v30, 0.0  ;;  %v351_v36 = vmul.f32 %v1852_v14, %v118_v31  ;;  %v766_v37 = vmul.f32 %v1960_v25, %v532_v32  ;;  %164 = vmatmul.f32.gmra.mxu0 %v59_v26  ;;  %578 = vmatmul.f32.gmra.mxu1 %v1904_v27  ;;  %v2014_v22 = vld [vmem:[%s3663_s0 + $0x318] sm:$0xff]  ;;  %vm1111_vm14 = vcmp.ge.f32.partialorder %v2034_v18, 0.25 }
  0xec   :  { %v1739_v38 = vmax.f32 %v1703_v34, 0.0  ;;  %v982_v39 = vpop.f32.mrf.mxu2  ;;  %v1433_v41 = vpop.f32.mrf.mxu3  ;;  %v61_v34 = vld [vmem:[%s3663_s0 + $0xd8] sm:$0xff]  ;;  %vm1562_vm15 = vcmp.ge.f32.partialorder %v2142_v20, 0.25  ;;  %v2070_v48 = vsel %vm1111_vm14, 1.0, %v2207_v24 }
  0xed   :  { %v1324_v43 = vmax.f32 %v873_v29, %v1288_v35  ;;  %v387_v44 = vmul.f32 1.3333334, %v351_v36  ;;  %v802_v45 = vmul.f32 1.3333334, %v766_v37  ;;  %v983_v46 = vadd.f32 %v2485_v19, %v982_v39  ;;  %v2122_v29 = vld [vmem:[%s3663_s0 + $0x438] sm:$0xff]  ;;  %v210_v36 = vld [vmem:[%s3665_s3 + $0x60] sm:$0xff] }
  0xee   :  { %v1434_v49 = vadd.f32 %v2485_v19, %v1433_v41  ;;  %v1906_v35 = vld [vmem:[%s3663_s0 + $0x1f8] sm:$0xff]  ;;  %v1927_v41 = vld [vmem:[%s3665_s3 + $0x180] sm:$0xff]  ;;  %vm246_vm0 = vcmp.ge.f32.partialorder %v210_v36, 0.25 }
  0xef   :  { %v1775_v52 = vmax.f32 %v1324_v43, %v1739_v38  ;;  %v423_v53 = vmax.f32 %v387_v44, 0.0  ;;  %v838_v54 = vmax.f32 %v802_v45, 0.0  ;;  %v1217_v55 = vmul.f32 %v2068_v40, %v983_v46 }
  0xf0   :  { %v1668_v57 = vmul.f32 %v2176_v42, %v1434_v49  ;;  %v120_v58 = vpop.f32.mrf.mxu0  ;;  %v534_v59 = vpop.f32.mrf.mxu1  ;;  %vm661_vm1 = vcmp.ge.f32.partialorder %v1927_v41, 0.25 }
  0xf1   :  { %1811 = vst [vmem:[%s3666_s4 + $0x40] sm:$0xff] %v1775_v52  ;;  %v874_v0 = vmax.f32 %v423_v53, %v838_v54  ;;  %v1253_v1 = vmul.f32 1.3333334, %v1217_v55  ;;  %1032 = vmatmul.f32.gmra.mxu2 %v2013_v50  ;;  %v121_v2 = vadd.f32 %v2485_v19, %v120_v58  ;;  %v535_v3 = vadd.f32 %v2485_v19, %v534_v59  ;;  %v2934_v53 = vld [vmem:[%s3664_s2] ss:$0 sm:$0xff] }
  0xf2   :  { %v1704_v5 = vmul.f32 1.3333334, %v1668_v57  ;;  %1483 = vmatmul.f32.gmra.mxu3 %v2121_v56  ;;  %v2035_v55 = vld [vmem:[%s3665_s3 + $0x2a0] sm:$0xff]  ;;  %v1855_v59 = vsel %vm246_vm0, 1.0, %v2207_v24  ;;  %v1963_v4 = vsel %vm661_vm1, 1.0, %v2207_v24 }
  0xf3   :  { %v1289_v6 = vmax.f32 %v1253_v1, 0.0  ;;  %v352_v7 = vmul.f32 %v1853_v51, %v121_v2  ;;  %v767_v8 = vmul.f32 %v1961_v60, %v535_v3  ;;  %167 = vmatmul.f32.gmra.mxu0 %v60_v61  ;;  %581 = vmatmul.f32.gmra.mxu1 %v1905_v62  ;;  %v2143_v56 = vld [vmem:[%s3665_s3 + $0x3c0] sm:$0xff]  ;;  %vm1112_vm2 = vcmp.ge.f32.partialorder %v2035_v55, 0.25 }
  0xf4   :  { %v1740_v9 = vmax.f32 %v1704_v5, 0.0  ;;  %v985_v10 = vpop.f32.mrf.mxu2  ;;  %v1436_v12 = vpop.f32.mrf.mxu3  ;;  %v2015_v58 = vld [vmem:[%s3663_s0 + $0x320] sm:$0xff]  ;;  %vm1563_vm3 = vcmp.ge.f32.partialorder %v2143_v56, 0.25  ;;  %v2071_v20 = vsel %vm1112_vm2, 1.0, %v2207_v24 }
  0xf5   :  { %v1325_v14 = vmax.f32 %v874_v0, %v1289_v6  ;;  %v388_v15 = vmul.f32 1.3333334, %v352_v7  ;;  %v803_v16 = vmul.f32 1.3333334, %v767_v8  ;;  %v986_v17 = vadd.f32 %v2485_v19, %v985_v10  ;;  %v2123_v0 = vld [vmem:[%s3663_s0 + $0x440] sm:$0xff]  ;;  %v211_v7 = vld [vmem:[%s3665_s3 + $0x68] sm:$0xff] }
  0xf6   :  { %v1437_v21 = vadd.f32 %v2485_v19, %v1436_v12  ;;  %v62_v5 = vld [vmem:[%s3663_s0 + $0xe0] sm:$0xff]  ;;  %v1928_v12 = vld [vmem:[%s3665_s3 + $0x188] sm:$0xff]  ;;  %vm247_vm4 = vcmp.ge.f32.partialorder %v211_v7, 0.25 }
  0xf7   :  { %v1776_v25 = vmax.f32 %v1325_v14, %v1740_v9  ;;  %v424_v26 = vmax.f32 %v388_v15, 0.0  ;;  %v839_v27 = vmax.f32 %v803_v16, 0.0  ;;  %v1218_v28 = vmul.f32 %v2069_v11, %v986_v17  ;;  %v1907_v6 = vld [vmem:[%s3663_s0 + $0x200] sm:$0xff] }
  0xf8   :  { %v1669_v30 = vmul.f32 %v2177_v13, %v1437_v21  ;;  %v123_v31 = vpop.f32.mrf.mxu0  ;;  %v537_v32 = vpop.f32.mrf.mxu1  ;;  %vm662_vm5 = vcmp.ge.f32.partialorder %v1928_v12, 0.25 }
  0xf9   :  { %1812 = vst [vmem:[%s3666_s4 + $0x48] sm:$0xff] %v1776_v25  ;;  %v875_v37 = vmax.f32 %v424_v26, %v839_v27  ;;  %v1254_v38 = vmul.f32 1.3333334, %v1218_v28  ;;  %1035 = vmatmul.f32.gmra.mxu2 %v2014_v22  ;;  %v124_v39 = vadd.f32 %v2485_v19, %v123_v31  ;;  %v538_v40 = vadd.f32 %v2485_v19, %v537_v32  ;;  %v2036_v28 = vld [vmem:[%s3665_s3 + $0x2a8] sm:$0xff] }
  0xfa   :  { %v1705_v42 = vmul.f32 1.3333334, %v1669_v30  ;;  %1486 = vmatmul.f32.gmra.mxu3 %v2122_v29  ;;  %v2178_v19 = vsel %vm1562_vm15, 1.0, %v2207_v24  ;;  %v2179_v22 = vsel %vm1563_vm3, 1.0, %v2207_v24  ;;  %v2144_v29 = vld [vmem:[%s3665_s3 + $0x3c8] sm:$0xff]  ;;  %v1856_v32 = vsel %vm247_vm4, 1.0, %v2207_v24 }
  0xfb   :  { %v1290_v43 = vmax.f32 %v1254_v38, 0.0  ;;  %v353_v44 = vmul.f32 %v1854_v23, %v124_v39  ;;  %v768_v45 = vmul.f32 %v1962_v33, %v538_v40  ;;  %170 = vmatmul.f32.gmra.mxu0 %v61_v34  ;;  %584 = vmatmul.f32.gmra.mxu1 %v1906_v35  ;;  %v2016_v31 = vld [vmem:[%s3663_s0 + $0x328] sm:$0xff]  ;;  %v1964_v41 = vsel %vm662_vm5, 1.0, %v2207_v24 }
  0xfc   :  { %v1741_v46 = vmax.f32 %v1705_v42, 0.0  ;;  %v988_v47 = vpop.f32.mrf.mxu2  ;;  %v1439_v49 = vpop.f32.mrf.mxu3  ;;  %vm1113_vm6 = vcmp.ge.f32.partialorder %v2036_v28, 0.25  ;;  %v63_v42 = vld [vmem:[%s3663_s0 + $0xe8] sm:$0xff]  ;;  %vm1564_vm7 = vcmp.ge.f32.partialorder %v2144_v29, 0.25 }
  0xfd   :  { %v1326_v50 = vmax.f32 %v875_v37, %v1290_v43  ;;  %v389_v51 = vmul.f32 1.3333334, %v353_v44  ;;  %v804_v52 = vmul.f32 1.3333334, %v768_v45  ;;  %v989_v54 = vadd.f32 %v2934_v53, %v988_v47  ;;  %v2124_v37 = vld [vmem:[%s3663_s0 + $0x448] sm:$0xff]  ;;  %v212_v44 = vld [vmem:[%s3665_s3 + $0x70] sm:$0xff] }
  0xfe   :  { %v1440_v57 = vadd.f32 %v2934_v53, %v1439_v49  ;;  %v1908_v43 = vld [vmem:[%s3663_s0 + $0x208] sm:$0xff]  ;;  %v1929_v49 = vld [vmem:[%s3665_s3 + $0x190] sm:$0xff]  ;;  %vm248_vm8 = vcmp.ge.f32.partialorder %v212_v44, 0.25  ;;  %v2072_v56 = vsel %vm1113_vm6, 1.0, %v2207_v24 }
  0xff   :  { %v1777_v60 = vmax.f32 %v1326_v50, %v1741_v46  ;;  %v425_v61 = vmax.f32 %v389_v51, 0.0  ;;  %v840_v62 = vmax.f32 %v804_v52, 0.0  ;;  %v1219_v63 = vmul.f32 %v2070_v48, %v989_v54 }
 0x100   :  { %v1670_v1 = vmul.f32 %v2178_v19, %v1440_v57  ;;  %v126_v2 = vpop.f32.mrf.mxu0  ;;  %v540_v3 = vpop.f32.mrf.mxu1  ;;  %vm663_vm9 = vcmp.ge.f32.partialorder %v1929_v49, 0.25 }
 0x101   :  { %1813 = vst [vmem:[%s3666_s4 + $0x50] sm:$0xff] %v1777_v60  ;;  %v876_v8 = vmax.f32 %v425_v61, %v840_v62  ;;  %v1255_v9 = vmul.f32 1.3333334, %v1219_v63  ;;  %1038 = vmatmul.f32.gmra.mxu2 %v2015_v58  ;;  %v127_v10 = vadd.f32 %v2934_v53, %v126_v2  ;;  %v541_v11 = vadd.f32 %v2934_v53, %v540_v3  ;;  %v2037_v63 = vld [vmem:[%s3665_s3 + $0x2b0] sm:$0xff] }
 0x102   :  { %v1706_v13 = vmul.f32 1.3333334, %v1670_v1  ;;  %1489 = vmatmul.f32.gmra.mxu3 %v2123_v0  ;;  %v2180_v58 = vsel %vm1564_vm7, 1.0, %v2207_v24  ;;  %v2145_v0 = vld [vmem:[%s3665_s3 + $0x3d0] sm:$0xff]  ;;  %v1857_v3 = vsel %vm248_vm8, 1.0, %v2207_v24  ;;  %v1965_v12 = vsel %vm663_vm9, 1.0, %v2207_v24 }
 0x103   :  { %v1291_v14 = vmax.f32 %v1255_v9, 0.0  ;;  %v354_v15 = vmul.f32 %v1855_v59, %v127_v10  ;;  %v769_v16 = vmul.f32 %v1963_v4, %v541_v11  ;;  %173 = vmatmul.f32.gmra.mxu0 %v62_v5  ;;  %587 = vmatmul.f32.gmra.mxu1 %v1907_v6  ;;  %v2017_v2 = vld [vmem:[%s3663_s0 + $0x330] sm:$0xff]  ;;  %vm1114_vm10 = vcmp.ge.f32.partialorder %v2037_v63, 0.25 }
 0x104   :  { %v1742_v17 = vmax.f32 %v1706_v13, 0.0  ;;  %v991_v18 = vpop.f32.mrf.mxu2  ;;  %v1442_v21 = vpop.f32.mrf.mxu3  ;;  %v64_v13 = vld [vmem:[%s3663_s0 + $0xf0] sm:$0xff]  ;;  %vm1565_vm11 = vcmp.ge.f32.partialorder %v2145_v0, 0.25  ;;  %v2073_v29 = vsel %vm1114_vm10, 1.0, %v2207_v24 }
 0x105   :  { %v1327_v23 = vmax.f32 %v876_v8, %v1291_v14  ;;  %v390_v25 = vmul.f32 1.3333334, %v354_v15  ;;  %v805_v26 = vmul.f32 1.3333334, %v769_v16  ;;  %v992_v27 = vadd.f32 %v2934_v53, %v991_v18  ;;  %v2125_v8 = vld [vmem:[%s3663_s0 + $0x450] sm:$0xff]  ;;  %v213_v15 = vld [vmem:[%s3665_s3 + $0x78] sm:$0xff] }
 0x106   :  { %v1443_v30 = vadd.f32 %v2934_v53, %v1442_v21  ;;  %v1909_v14 = vld [vmem:[%s3663_s0 + $0x210] sm:$0xff]  ;;  %v1930_v21 = vld [vmem:[%s3665_s3 + $0x198] sm:$0xff]  ;;  %vm249_vm12 = vcmp.ge.f32.partialorder %v213_v15, 0.25 }
 0x107   :  { %v1778_v33 = vmax.f32 %v1327_v23, %v1742_v17  ;;  %v426_v34 = vmax.f32 %v390_v25, 0.0  ;;  %v841_v35 = vmax.f32 %v805_v26, 0.0  ;;  %v1220_v36 = vmul.f32 %v2071_v20, %v992_v27 }
 0x108   :  { %v1671_v38 = vmul.f32 %v2179_v22, %v1443_v30  ;;  %v129_v39 = vpop.f32.mrf.mxu0  ;;  %v543_v40 = vpop.f32.mrf.mxu1  ;;  %vm664_vm13 = vcmp.ge.f32.partialorder %v1930_v21, 0.25 }
 0x109   :  { %1814 = vst [vmem:[%s3666_s4 + $0x58] sm:$0xff] %v1778_v33  ;;  %v877_v45 = vmax.f32 %v426_v34, %v841_v35  ;;  %v1256_v46 = vmul.f32 1.3333334, %v1220_v36  ;;  %1041 = vmatmul.f32.gmra.mxu2 %v2016_v31  ;;  %v130_v47 = vadd.f32 %v2934_v53, %v129_v39  ;;  %v544_v48 = vadd.f32 %v2934_v53, %v543_v40  ;;  %v2038_v36 = vld [vmem:[%s3665_s3 + $0x2b8] sm:$0xff] }
 0x10a   :  { %v1707_v19 = vmul.f32 1.3333334, %v1671_v38  ;;  %1492 = vmatmul.f32.gmra.mxu3 %v2124_v37  ;;  %v2181_v31 = vsel %vm1565_vm11, 1.0, %v2207_v24  ;;  %v2146_v37 = vld [vmem:[%s3665_s3 + $0x3d8] sm:$0xff]  ;;  %v1858_v40 = vsel %vm249_vm12, 1.0, %v2207_v24  ;;  %v1966_v49 = vsel %vm664_vm13, 1.0, %v2207_v24 }
 0x10b   :  { %v1292_v50 = vmax.f32 %v1256_v46, 0.0  ;;  %v355_v51 = vmul.f32 %v1856_v32, %v130_v47  ;;  %v770_v52 = vmul.f32 %v1964_v41, %v544_v48  ;;  %176 = vmatmul.f32.gmra.mxu0 %v63_v42  ;;  %590 = vmatmul.f32.gmra.mxu1 %v1908_v43  ;;  %v2018_v39 = vld [vmem:[%s3663_s0 + $0x338] sm:$0xff]  ;;  %vm1115_vm14 = vcmp.ge.f32.partialorder %v2038_v36, 0.25 }
 0x10c   :  { %v1743_v54 = vmax.f32 %v1707_v19, 0.0  ;;  %v994_v55 = vpop.f32.mrf.mxu2  ;;  %v1445_v57 = vpop.f32.mrf.mxu3  ;;  %v65_v19 = vld [vmem:[%s3663_s0 + $0xf8] sm:$0xff]  ;;  %vm1566_vm15 = vcmp.ge.f32.partialorder %v2146_v37, 0.25  ;;  %v2074_v0 = vsel %vm1115_vm14, 1.0, %v2207_v24 }
 0x10d   :  { %v1328_v59 = vmax.f32 %v877_v45, %v1292_v50  ;;  %v391_v60 = vmul.f32 1.3333334, %v355_v51  ;;  %v806_v61 = vmul.f32 1.3333334, %v770_v52  ;;  %v995_v62 = vadd.f32 %v2934_v53, %v994_v55  ;;  %v2126_v45 = vld [vmem:[%s3663_s0 + $0x458] sm:$0xff]  ;;  %v214_v51 = vld [vmem:[%s3665_s3 + $0x80] sm:$0xff] }
 0x10e   :  { %v1446_v1 = vadd.f32 %v2934_v53, %v1445_v57  ;;  %v1910_v50 = vld [vmem:[%s3663_s0 + $0x218] sm:$0xff]  ;;  %v1931_v57 = vld [vmem:[%s3665_s3 + $0x1a0] sm:$0xff]  ;;  %vm250_vm0 = vcmp.ge.f32.partialorder %v214_v51, 0.25 }
 0x10f   :  { %v1779_v4 = vmax.f32 %v1328_v59, %v1743_v54  ;;  %v427_v5 = vmax.f32 %v391_v60, 0.0  ;;  %v842_v6 = vmax.f32 %v806_v61, 0.0  ;;  %v1221_v7 = vmul.f32 %v2072_v56, %v995_v62 }
 0x110   :  { %v1672_v9 = vmul.f32 %v2180_v58, %v1446_v1  ;;  %v132_v10 = vpop.f32.mrf.mxu0  ;;  %v546_v11 = vpop.f32.mrf.mxu1  ;;  %vm665_vm1 = vcmp.ge.f32.partialorder %v1931_v57, 0.25 }
 0x111   :  { %1815 = vst [vmem:[%s3666_s4 + $0x60] sm:$0xff] %v1779_v4  ;;  %v878_v16 = vmax.f32 %v427_v5, %v842_v6  ;;  %v1257_v17 = vmul.f32 1.3333334, %v1221_v7  ;;  %1044 = vmatmul.f32.gmra.mxu2 %v2017_v2  ;;  %v133_v18 = vadd.f32 %v2934_v53, %v132_v10  ;;  %v547_v20 = vadd.f32 %v2934_v53, %v546_v11  ;;  %v2039_v7 = vld [vmem:[%s3665_s3 + $0x2c0] sm:$0xff] }
 0x112   :  { %v1708_v22 = vmul.f32 1.3333334, %v1672_v9  ;;  %1495 = vmatmul.f32.gmra.mxu3 %v2125_v8  ;;  %v2182_v2 = vsel %vm1566_vm15, 1.0, %v2207_v24  ;;  %v2147_v8 = vld [vmem:[%s3665_s3 + $0x3e0] sm:$0xff]  ;;  %v1859_v11 = vsel %vm250_vm0, 1.0, %v2207_v24  ;;  %v1967_v21 = vsel %vm665_vm1, 1.0, %v2207_v24 }
 0x113   :  { %v1293_v23 = vmax.f32 %v1257_v17, 0.0  ;;  %v356_v25 = vmul.f32 %v1857_v3, %v133_v18  ;;  %v771_v26 = vmul.f32 %v1965_v12, %v547_v20  ;;  %179 = vmatmul.f32.gmra.mxu0 %v64_v13  ;;  %593 = vmatmul.f32.gmra.mxu1 %v1909_v14  ;;  %v2019_v10 = vld [vmem:[%s3663_s0 + $0x340] sm:$0xff]  ;;  %vm1116_vm2 = vcmp.ge.f32.partialorder %v2039_v7, 0.25 }
 0x114   :  { %v1744_v27 = vmax.f32 %v1708_v22, 0.0  ;;  %v997_v28 = vpop.f32.mrf.mxu2  ;;  %v1448_v30 = vpop.f32.mrf.mxu3  ;;  %v66_v22 = vld [vmem:[%s3663_s0 + $0x100] sm:$0xff]  ;;  %vm1567_vm3 = vcmp.ge.f32.partialorder %v2147_v8, 0.25  ;;  %v2075_v37 = vsel %vm1116_vm2, 1.0, %v2207_v24 }
 0x115   :  { %v1329_v32 = vmax.f32 %v878_v16, %v1293_v23  ;;  %v392_v33 = vmul.f32 1.3333334, %v356_v25  ;;  %v807_v34 = vmul.f32 1.3333334, %v771_v26  ;;  %v998_v35 = vadd.f32 %v2934_v53, %v997_v28  ;;  %v2127_v16 = vld [vmem:[%s3663_s0 + $0x460] sm:$0xff]  ;;  %v215_v25 = vld [vmem:[%s3665_s3 + $0x88] sm:$0xff] }
 0x116   :  { %v1449_v38 = vadd.f32 %v2934_v53, %v1448_v30  ;;  %v1911_v23 = vld [vmem:[%s3663_s0 + $0x220] sm:$0xff]  ;;  %v1932_v30 = vld [vmem:[%s3665_s3 + $0x1a8] sm:$0xff]  ;;  %vm251_vm4 = vcmp.ge.f32.partialorder %v215_v25, 0.25 }
 0x117   :  { %v1780_v41 = vmax.f32 %v1329_v32, %v1744_v27  ;;  %v428_v42 = vmax.f32 %v392_v33, 0.0  ;;  %v843_v43 = vmax.f32 %v807_v34, 0.0  ;;  %v1222_v44 = vmul.f32 %v2073_v29, %v998_v35 }
 0x118   :  { %v1673_v46 = vmul.f32 %v2181_v31, %v1449_v38  ;;  %v135_v47 = vpop.f32.mrf.mxu0  ;;  %v549_v48 = vpop.f32.mrf.mxu1  ;;  %vm666_vm5 = vcmp.ge.f32.partialorder %v1932_v30, 0.25 }
 0x119   :  { %1816 = vst [vmem:[%s3666_s4 + $0x68] sm:$0xff] %v1780_v41  ;;  %v879_v52 = vmax.f32 %v428_v42, %v843_v43  ;;  %v1258_v54 = vmul.f32 1.3333334, %v1222_v44  ;;  %1047 = vmatmul.f32.gmra.mxu2 %v2018_v39  ;;  %v136_v55 = vadd.f32 %v2934_v53, %v135_v47  ;;  %v550_v56 = vadd.f32 %v2934_v53, %v549_v48  ;;  %v2040_v44 = vld [vmem:[%s3665_s3 + $0x2c8] sm:$0xff] }
 0x11a   :  { %v1709_v58 = vmul.f32 1.3333334, %v1673_v46  ;;  %1498 = vmatmul.f32.gmra.mxu3 %v2126_v45  ;;  %v2183_v39 = vsel %vm1567_vm3, 1.0, %v2207_v24  ;;  %v2148_v45 = vld [vmem:[%s3665_s3 + $0x3e8] sm:$0xff]  ;;  %v1860_v48 = vsel %vm251_vm4, 1.0, %v2207_v24  ;;  %v1968_v57 = vsel %vm666_vm5, 1.0, %v2207_v24 }
 0x11b   :  { %v1294_v59 = vmax.f32 %v1258_v54, 0.0  ;;  %v357_v60 = vmul.f32 %v1858_v40, %v136_v55  ;;  %v772_v61 = vmul.f32 %v1966_v49, %v550_v56  ;;  %182 = vmatmul.f32.gmra.mxu0 %v65_v19  ;;  %596 = vmatmul.f32.gmra.mxu1 %v1910_v50  ;;  %v2020_v47 = vld [vmem:[%s3663_s0 + $0x348] sm:$0xff]  ;;  %vm1117_vm6 = vcmp.ge.f32.partialorder %v2040_v44, 0.25 }
 0x11c   :  { %v1745_v62 = vmax.f32 %v1709_v58, 0.0  ;;  %v1000_v63 = vpop.f32.mrf.mxu2  ;;  %v1451_v1 = vpop.f32.mrf.mxu3  ;;  %v67_v58 = vld [vmem:[%s3663_s0 + $0x108] sm:$0xff]  ;;  %vm1568_vm7 = vcmp.ge.f32.partialorder %v2148_v45, 0.25  ;;  %v2076_v8 = vsel %vm1117_vm6, 1.0, %v2207_v24 }
 0x11d   :  { %v1330_v3 = vmax.f32 %v879_v52, %v1294_v59  ;;  %v393_v4 = vmul.f32 1.3333334, %v357_v60  ;;  %v808_v5 = vmul.f32 1.3333334, %v772_v61  ;;  %v1001_v6 = vadd.f32 %v2934_v53, %v1000_v63  ;;  %v2128_v52 = vld [vmem:[%s3663_s0 + $0x468] sm:$0xff]  ;;  %v216_v60 = vld [vmem:[%s3665_s3 + $0x90] sm:$0xff] }
 0x11e   :  { %v1452_v9 = vadd.f32 %v2934_v53, %v1451_v1  ;;  %v1912_v59 = vld [vmem:[%s3663_s0 + $0x228] sm:$0xff]  ;;  %v1933_v1 = vld [vmem:[%s3665_s3 + $0x1b0] sm:$0xff]  ;;  %vm252_vm8 = vcmp.ge.f32.partialorder %v216_v60, 0.25 }
 0x11f   :  { %v1781_v12 = vmax.f32 %v1330_v3, %v1745_v62  ;;  %v429_v13 = vmax.f32 %v393_v4, 0.0  ;;  %v844_v14 = vmax.f32 %v808_v5, 0.0  ;;  %v1223_v15 = vmul.f32 %v2074_v0, %v1001_v6 }
 0x120   :  { %v1674_v17 = vmul.f32 %v2182_v2, %v1452_v9  ;;  %v138_v18 = vpop.f32.mrf.mxu0  ;;  %v552_v20 = vpop.f32.mrf.mxu1  ;;  %vm667_vm9 = vcmp.ge.f32.partialorder %v1933_v1, 0.25 }
 0x121   :  { %1817 = vst [vmem:[%s3666_s4 + $0x70] sm:$0xff] %v1781_v12  ;;  %v880_v26 = vmax.f32 %v429_v13, %v844_v14  ;;  %v1259_v27 = vmul.f32 1.3333334, %v1223_v15  ;;  %1050 = vmatmul.f32.gmra.mxu2 %v2019_v10  ;;  %v139_v28 = vadd.f32 %v2934_v53, %v138_v18  ;;  %v553_v29 = vadd.f32 %v2934_v53, %v552_v20  ;;  %v2041_v15 = vld [vmem:[%s3665_s3 + $0x2d0] sm:$0xff] }
 0x122   :  { %v1710_v31 = vmul.f32 1.3333334, %v1674_v17  ;;  %1501 = vmatmul.f32.gmra.mxu3 %v2127_v16  ;;  %v2184_v10 = vsel %vm1568_vm7, 1.0, %v2207_v24  ;;  %v2149_v16 = vld [vmem:[%s3665_s3 + $0x3f0] sm:$0xff]  ;;  %v1861_v20 = vsel %vm252_vm8, 1.0, %v2207_v24  ;;  %v1969_v30 = vsel %vm667_vm9, 1.0, %v2207_v24 }
 0x123   :  { %v1295_v32 = vmax.f32 %v1259_v27, 0.0  ;;  %v358_v33 = vmul.f32 %v1859_v11, %v139_v28  ;;  %v773_v34 = vmul.f32 %v1967_v21, %v553_v29  ;;  %185 = vmatmul.f32.gmra.mxu0 %v66_v22  ;;  %599 = vmatmul.f32.gmra.mxu1 %v1911_v23  ;;  %v2021_v18 = vld [vmem:[%s3663_s0 + $0x350] sm:$0xff]  ;;  %vm1118_vm10 = vcmp.ge.f32.partialorder %v2041_v15, 0.25 }
 0x124   :  { %v1746_v35 = vmax.f32 %v1710_v31, 0.0  ;;  %v1003_v36 = vpop.f32.mrf.mxu2  ;;  %v1454_v38 = vpop.f32.mrf.mxu3  ;;  %v68_v31 = vld [vmem:[%s3663_s0 + $0x110] sm:$0xff]  ;;  %vm1569_vm11 = vcmp.ge.f32.partialorder %v2149_v16, 0.25  ;;  %v2077_v45 = vsel %vm1118_vm10, 1.0, %v2207_v24 }
 0x125   :  { %v1331_v40 = vmax.f32 %v880_v26, %v1295_v32  ;;  %v394_v41 = vmul.f32 1.3333334, %v358_v33  ;;  %v809_v42 = vmul.f32 1.3333334, %v773_v34  ;;  %v1004_v43 = vadd.f32 %v2934_v53, %v1003_v36  ;;  %v2129_v26 = vld [vmem:[%s3663_s0 + $0x470] sm:$0xff]  ;;  %v217_v33 = vld [vmem:[%s3665_s3 + $0x98] sm:$0xff] }
 0x126   :  { %v1455_v46 = vadd.f32 %v2934_v53, %v1454_v38  ;;  %v1913_v32 = vld [vmem:[%s3663_s0 + $0x230] sm:$0xff]  ;;  %v1934_v38 = vld [vmem:[%s3665_s3 + $0x1b8] sm:$0xff]  ;;  %vm253_vm12 = vcmp.ge.f32.partialorder %v217_v33, 0.25 }
 0x127   :  { %v1782_v49 = vmax.f32 %v1331_v40, %v1746_v35  ;;  %v430_v19 = vmax.f32 %v394_v41, 0.0  ;;  %v845_v50 = vmax.f32 %v809_v42, 0.0  ;;  %v1224_v51 = vmul.f32 %v2075_v37, %v1004_v43 }
 0x128   :  { %v1675_v54 = vmul.f32 %v2183_v39, %v1455_v46  ;;  %v141_v55 = vpop.f32.mrf.mxu0  ;;  %v555_v56 = vpop.f32.mrf.mxu1  ;;  %vm668_vm13 = vcmp.ge.f32.partialorder %v1934_v38, 0.25 }
 0x129   :  { %1818 = vst [vmem:[%s3666_s4 + $0x78] sm:$0xff] %v1782_v49  ;;  %v881_v61 = vmax.f32 %v430_v19, %v845_v50  ;;  %v1260_v62 = vmul.f32 1.3333334, %v1224_v51  ;;  %1053 = vmatmul.f32.gmra.mxu2 %v2020_v47  ;;  %v142_v63 = vadd.f32 %v2934_v53, %v141_v55  ;;  %v556_v0 = vadd.f32 %v2934_v53, %v555_v56  ;;  %v2042_v51 = vld [vmem:[%s3665_s3 + $0x2d8] sm:$0xff] }
 0x12a   :  { %v1711_v2 = vmul.f32 1.3333334, %v1675_v54  ;;  %1504 = vmatmul.f32.gmra.mxu3 %v2128_v52  ;;  %v2185_v47 = vsel %vm1569_vm11, 1.0, %v2207_v24  ;;  %v2150_v52 = vld [vmem:[%s3665_s3 + $0x3f8] sm:$0xff]  ;;  %v1862_v56 = vsel %vm253_vm12, 1.0, %v2207_v24  ;;  %v1970_v1 = vsel %vm668_vm13, 1.0, %v2207_v24 }
 0x12b   :  { %v1296_v3 = vmax.f32 %v1260_v62, 0.0  ;;  %v359_v4 = vmul.f32 %v1860_v48, %v142_v63  ;;  %v774_v5 = vmul.f32 %v1968_v57, %v556_v0  ;;  %188 = vmatmul.f32.gmra.mxu0 %v67_v58  ;;  %602 = vmatmul.f32.gmra.mxu1 %v1912_v59  ;;  %v2022_v55 = vld [vmem:[%s3663_s0 + $0x358] sm:$0xff]  ;;  %vm1119_vm14 = vcmp.ge.f32.partialorder %v2042_v51, 0.25 }
 0x12c   :  { %v1747_v6 = vmax.f32 %v1711_v2, 0.0  ;;  %v1006_v7 = vpop.f32.mrf.mxu2  ;;  %v1457_v9 = vpop.f32.mrf.mxu3  ;;  %v69_v2 = vld [vmem:[%s3663_s0 + $0x118] sm:$0xff]  ;;  %vm1570_vm15 = vcmp.ge.f32.partialorder %v2150_v52, 0.25  ;;  %v2078_v16 = vsel %vm1119_vm14, 1.0, %v2207_v24 }
 0x12d   :  { %v1332_v11 = vmax.f32 %v881_v61, %v1296_v3  ;;  %v395_v12 = vmul.f32 1.3333334, %v359_v4  ;;  %v810_v13 = vmul.f32 1.3333334, %v774_v5  ;;  %v1007_v14 = vadd.f32 %v2934_v53, %v1006_v7  ;;  %v2130_v61 = vld [vmem:[%s3663_s0 + $0x478] sm:$0xff]  ;;  %v218_v4 = vld [vmem:[%s3665_s3 + $0xa0] sm:$0xff] }
 0x12e   :  { %v1458_v17 = vadd.f32 %v2934_v53, %v1457_v9  ;;  %v1914_v3 = vld [vmem:[%s3663_s0 + $0x238] sm:$0xff]  ;;  %v1935_v9 = vld [vmem:[%s3665_s3 + $0x1c0] sm:$0xff]  ;;  %vm254_vm0 = vcmp.ge.f32.partialorder %v218_v4, 0.25  ;;  %v220_v4 = vld [vmem:[%s3665_s3 + $0xb0] sm:$0xff] }
 0x12f   :  { %v1783_v21 = vmax.f32 %v1332_v11, %v1747_v6  ;;  %v431_v22 = vmax.f32 %v395_v12, 0.0  ;;  %v846_v23 = vmax.f32 %v810_v13, 0.0  ;;  %v1225_v25 = vmul.f32 %v2076_v8, %v1007_v14 }
 0x130   :  { %v1676_v27 = vmul.f32 %v2184_v10, %v1458_v17  ;;  %v144_v28 = vpop.f32.mrf.mxu0  ;;  %v558_v29 = vpop.f32.mrf.mxu1  ;;  %v2186_v17 = vsel %vm1570_vm15, 1.0, %v2207_v24  ;;  %vm669_vm1 = vcmp.ge.f32.partialorder %v1935_v9, 0.25  ;;  %v1937_v9 = vld [vmem:[%s3665_s3 + $0x1d0] sm:$0xff]  ;;  %vm256_vm8 = vcmp.ge.f32.partialorder %v220_v4, 0.25  ;;  %v222_v4 = vld [vmem:[%s3665_s3 + $0xc0] sm:$0xff] }
 0x131   :  { %1819 = vst [vmem:[%s3666_s4 + $0x80] sm:$0xff] %v1783_v21  ;;  %v882_v34 = vmax.f32 %v431_v22, %v846_v23  ;;  %v1261_v35 = vmul.f32 1.3333334, %v1225_v25  ;;  %1056 = vmatmul.f32.gmra.mxu2 %v2021_v18  ;;  %v145_v36 = vadd.f32 %v2934_v53, %v144_v28  ;;  %v559_v37 = vadd.f32 %v2934_v53, %v558_v29  ;;  %v2043_v25 = vld [vmem:[%s3665_s3 + $0x2e0] sm:$0xff] }
 0x132   :  { %v1712_v39 = vmul.f32 1.3333334, %v1676_v27  ;;  %1507 = vmatmul.f32.gmra.mxu3 %v2129_v26  ;;  %v2151_v26 = vld [vmem:[%s3665_s3 + $0x400] sm:$0xff]  ;;  %v1863_v28 = vsel %vm254_vm0, 1.0, %v2207_v24  ;;  %vm1120_vm2 = vcmp.ge.f32.partialorder %v2043_v25, 0.25  ;;  %vm671_vm9 = vcmp.ge.f32.partialorder %v1937_v9, 0.25 }
 0x133   :  { %v1297_v40 = vmax.f32 %v1261_v35, 0.0  ;;  %v360_v41 = vmul.f32 %v1861_v20, %v145_v36  ;;  %v775_v42 = vmul.f32 %v1969_v30, %v559_v37  ;;  %191 = vmatmul.f32.gmra.mxu0 %v68_v31  ;;  %605 = vmatmul.f32.gmra.mxu1 %v1913_v32  ;;  %v1971_v36 = vsel %vm669_vm1, 1.0, %v2207_v24  ;;  %v219_v37 = vld [vmem:[%s3665_s3 + $0xa8] sm:$0xff]  ;;  %v2045_v25 = vld [vmem:[%s3665_s3 + $0x2f0] sm:$0xff]  ;;  %v1939_v9 = vld [vmem:[%s3665_s3 + $0x1e0] sm:$0xff] }
 0x134   :  { %v1748_v43 = vmax.f32 %v1712_v39, 0.0  ;;  %v1009_v44 = vpop.f32.mrf.mxu2  ;;  %v1460_v46 = vpop.f32.mrf.mxu3  ;;  %vm1571_vm3 = vcmp.ge.f32.partialorder %v2151_v26, 0.25  ;;  %vm255_vm4 = vcmp.ge.f32.partialorder %v219_v37, 0.25  ;;  %v2153_v26 = vld [vmem:[%s3665_s3 + $0x410] sm:$0xff]  ;;  %vm1122_vm10 = vcmp.ge.f32.partialorder %v2045_v25, 0.25  ;;  %v221_v37 = vld [vmem:[%s3665_s3 + $0xb8] sm:$0xff] }
 0x135   :  { %v1333_v48 = vmax.f32 %v882_v34, %v1297_v40  ;;  %v396_v49 = vmul.f32 1.3333334, %v360_v41  ;;  %v811_v19 = vmul.f32 1.3333334, %v775_v42  ;;  %v1010_v50 = vadd.f32 %v2934_v53, %v1009_v44  ;;  %v1936_v42 = vld [vmem:[%s3665_s3 + $0x1c8] sm:$0xff]  ;;  %v2047_v25 = vld [vmem:[%s3665_s3 + $0x300] sm:$0xff] }
 0x136   :  { %v1461_v54 = vadd.f32 %v2934_v53, %v1460_v46  ;;  %vm670_vm5 = vcmp.ge.f32.partialorder %v1936_v42, 0.25  ;;  %vm1573_vm11 = vcmp.ge.f32.partialorder %v2153_v26, 0.25  ;;  %v1938_v42 = vld [vmem:[%s3665_s3 + $0x1d8] sm:$0xff]  ;;  %vm257_vm12 = vcmp.ge.f32.partialorder %v221_v37, 0.25  ;;  %v2155_v26 = vld [vmem:[%s3665_s3 + $0x420] sm:$0xff]  ;;  %v223_v37 = vld [vmem:[%s3665_s3 + $0xc8] sm:$0xff] }
 0x137   :  { %v1784_v57 = vmax.f32 %v1333_v48, %v1748_v43  ;;  %v432_v58 = vmax.f32 %v396_v49, 0.0  ;;  %v847_v59 = vmax.f32 %v811_v19, 0.0  ;;  %v1226_v60 = vmul.f32 %v2077_v45, %v1010_v50 }
 0x138   :  { %v1677_v62 = vmul.f32 %v2185_v47, %v1461_v54  ;;  %v147_v63 = vpop.f32.mrf.mxu0  ;;  %v561_v0 = vpop.f32.mrf.mxu1  ;;  %v2079_v49 = vsel %vm1120_vm2, 1.0, %v2207_v24  ;;  %v2187_v19 = vsel %vm1571_vm3, 1.0, %v2207_v24  ;;  %vm672_vm13 = vcmp.ge.f32.partialorder %v1938_v42, 0.25  ;;  %v1940_v42 = vld [vmem:[%s3665_s3 + $0x1e8] sm:$0xff] }
 0x139   :  { %1820 = vst [vmem:[%s3666_s4 + $0x88] sm:$0xff] %v1784_v57  ;;  %v883_v5 = vmax.f32 %v432_v58, %v847_v59  ;;  %v1262_v6 = vmul.f32 1.3333334, %v1226_v60  ;;  %1059 = vmatmul.f32.gmra.mxu2 %v2022_v55  ;;  %v148_v7 = vadd.f32 %v2934_v53, %v147_v63  ;;  %v562_v8 = vadd.f32 %v2934_v53, %v561_v0  ;;  %v2152_v57 = vld [vmem:[%s3665_s3 + $0x408] sm:$0xff] }
 0x13a   :  { %v1713_v10 = vmul.f32 1.3333334, %v1677_v62  ;;  %1510 = vmatmul.f32.gmra.mxu3 %v2130_v61  ;;  %v1864_v59 = vsel %vm255_vm4, 1.0, %v2207_v24  ;;  %vm1572_vm7 = vcmp.ge.f32.partialorder %v2152_v57, 0.25  ;;  %v2154_v57 = vld [vmem:[%s3665_s3 + $0x418] sm:$0xff]  ;;  %vm258_vm0 = vcmp.ge.f32.partialorder %v222_v4, 0.25 }
 0x13b   :  { %v1298_v11 = vmax.f32 %v1262_v6, 0.0  ;;  %v361_v12 = vmul.f32 %v1862_v56, %v148_v7  ;;  %v776_v13 = vmul.f32 %v1970_v1, %v562_v8  ;;  %194 = vmatmul.f32.gmra.mxu0 %v69_v2  ;;  %608 = vmatmul.f32.gmra.mxu1 %v1914_v3  ;;  %v2044_v56 = vld [vmem:[%s3665_s3 + $0x2e8] sm:$0xff]  ;;  %v1972_v3 = vsel %vm670_vm5, 1.0, %v2207_v24  ;;  %v224_v4 = vld [vmem:[%s3665_s3 + $0xd0] sm:$0xff] }
 0x13c   :  { %v1749_v14 = vmax.f32 %v1713_v10, 0.0  ;;  %v1012_v15 = vpop.f32.mrf.mxu2  ;;  %vm1121_vm6 = vcmp.ge.f32.partialorder %v2044_v56, 0.25  ;;  %v2046_v56 = vld [vmem:[%s3665_s3 + $0x2f8] sm:$0xff]  ;;  %vm1574_vm15 = vcmp.ge.f32.partialorder %v2154_v57, 0.25  ;;  %vm673_vm1 = vcmp.ge.f32.partialorder %v1939_v9, 0.25  ;;  %v2156_v57 = vld [vmem:[%s3665_s3 + $0x428] sm:$0xff] }
 0x13d   :  { %v1334_v18 = vmax.f32 %v883_v5, %v1298_v11  ;;  %v397_v20 = vmul.f32 1.3333334, %v361_v12  ;;  %v812_v21 = vmul.f32 1.3333334, %v776_v13  ;;  %v1013_v22 = vadd.f32 %v2934_v53, %v1012_v15  ;;  %v1463_v23 = vpop.f32.mrf.mxu3  ;;  %v1941_v9 = vld [vmem:[%s3665_s3 + $0x1f0] sm:$0xff] }
 0x13e   :  { %v1464_v27 = vadd.f32 %v2934_v53, %v1463_v23  ;;  %vm1123_vm14 = vcmp.ge.f32.partialorder %v2046_v56, 0.25  ;;  %vm1124_vm2 = vcmp.ge.f32.partialorder %v2047_v25, 0.25  ;;  %vm1575_vm3 = vcmp.ge.f32.partialorder %v2155_v26, 0.25  ;;  %v2048_v56 = vld [vmem:[%s3665_s3 + $0x308] sm:$0xff]  ;;  %v2049_v25 = vld [vmem:[%s3665_s3 + $0x310] sm:$0xff] }
 0x13f   :  { %v1785_v29 = vmax.f32 %v1334_v18, %v1749_v14  ;;  %v433_v30 = vmax.f32 %v397_v20, 0.0  ;;  %v848_v31 = vmax.f32 %v812_v21, 0.0  ;;  %v1227_v32 = vmul.f32 %v2078_v16, %v1013_v22  ;;  %v2157_v26 = vld [vmem:[%s3665_s3 + $0x430] sm:$0xff] }
 0x140   :  { %v1678_v33 = vmul.f32 %v2186_v17, %v1464_v27  ;;  %v150_v34 = vpop.f32.mrf.mxu0  ;;  %v564_v35 = vpop.f32.mrf.mxu1  ;;  %v2080_v16 = vsel %vm1121_vm6, 1.0, %v2207_v24  ;;  %v2188_v17 = vsel %vm1572_vm7, 1.0, %v2207_v24  ;;  %vm259_vm4 = vcmp.ge.f32.partialorder %v223_v37, 0.25  ;;  %v225_v37 = vld [vmem:[%s3665_s3 + $0xd8] sm:$0xff] }
 0x141   :  { %1821 = vst [vmem:[%s3666_s4 + $0x90] sm:$0xff] %v1785_v29  ;;  %v884_v38 = vmax.f32 %v433_v30, %v848_v31  ;;  %v1263_v39 = vmul.f32 1.3333334, %v1227_v32  ;;  %v151_v40 = vadd.f32 %v2934_v53, %v150_v34  ;;  %v565_v41 = vadd.f32 %v2934_v53, %v564_v35 }
 0x142   :  { %v1714_v43 = vmul.f32 1.3333334, %v1678_v33  ;;  %vm674_vm5 = vcmp.ge.f32.partialorder %v1940_v42, 0.25  ;;  %vm1125_vm6 = vcmp.ge.f32.partialorder %v2048_v56, 0.25  ;;  %vm1576_vm7 = vcmp.ge.f32.partialorder %v2156_v57, 0.25  ;;  %v1942_v42 = vld [vmem:[%s3665_s3 + $0x1f8] sm:$0xff] }
 0x143   :  { %v1299_v44 = vmax.f32 %v1263_v39, 0.0  ;;  %v362_v45 = vmul.f32 %v1863_v28, %v151_v40  ;;  %v777_v46 = vmul.f32 %v1971_v36, %v565_v41  ;;  %v1865_v28 = vsel %vm256_vm8, 1.0, %v2207_v24  ;;  %v2050_v56 = vld [vmem:[%s3665_s3 + $0x318] sm:$0xff] }
 0x144   :  { %v1750_v47 = vmax.f32 %v1714_v43, 0.0  ;;  %v1015_v48 = vpop.f32.mrf.mxu2  ;;  %v1973_v36 = vsel %vm671_vm9, 1.0, %v2207_v24  ;;  %vm260_vm8 = vcmp.ge.f32.partialorder %v224_v4, 0.25  ;;  %vm675_vm9 = vcmp.ge.f32.partialorder %v1941_v9, 0.25  ;;  %v2158_v57 = vld [vmem:[%s3665_s3 + $0x438] sm:$0xff]  ;;  %v226_v4 = vld [vmem:[%s3665_s3 + $0xe0] sm:$0xff] }
 0x145   :  { %v1335_v50 = vmax.f32 %v884_v38, %v1299_v44  ;;  %v398_v51 = vmul.f32 1.3333334, %v362_v45  ;;  %v813_v52 = vmul.f32 1.3333334, %v777_v46  ;;  %v1016_v54 = vadd.f32 %v2934_v53, %v1015_v48  ;;  %v1466_v55 = vpop.f32.mrf.mxu3  ;;  %v1943_v9 = vld [vmem:[%s3665_s3 + $0x200] sm:$0xff] }
 0x146   :  { %v1467_v58 = vadd.f32 %v2934_v53, %v1466_v55 }
 0x147   :  { %v1786_v60 = vmax.f32 %v1335_v50, %v1750_v47  ;;  %v434_v61 = vmax.f32 %v398_v51, 0.0  ;;  %v849_v62 = vmax.f32 %v813_v52, 0.0  ;;  %v1228_v63 = vmul.f32 %v2079_v49, %v1016_v54 }
 0x148   :  { %v1679_v0 = vmul.f32 %v2187_v19, %v1467_v58  ;;  %v153_v1 = vpop.f32.mrf.mxu0  ;;  %v567_v2 = vpop.f32.mrf.mxu1  ;;  %v2081_v49 = vsel %vm1122_vm10, 1.0, %v2207_v24  ;;  %v2189_v19 = vsel %vm1573_vm11, 1.0, %v2207_v24  ;;  %vm1126_vm10 = vcmp.ge.f32.partialorder %v2049_v25, 0.25  ;;  %v2051_v25 = vld [vmem:[%s3665_s3 + $0x320] sm:$0xff] }
 0x149   :  { %1822 = vst [vmem:[%s3666_s4 + $0x98] sm:$0xff] %v1786_v60  ;;  %v885_v5 = vmax.f32 %v434_v61, %v849_v62  ;;  %v1264_v6 = vmul.f32 1.3333334, %v1228_v63  ;;  %v154_v7 = vadd.f32 %v2934_v53, %v153_v1  ;;  %v568_v8 = vadd.f32 %v2934_v53, %v567_v2 }
 0x14a   :  { %v1715_v10 = vmul.f32 1.3333334, %v1679_v0  ;;  %vm1577_vm11 = vcmp.ge.f32.partialorder %v2157_v26, 0.25  ;;  %v2159_v26 = vld [vmem:[%s3665_s3 + $0x440] sm:$0xff] }
 0x14b   :  { %v1300_v11 = vmax.f32 %v1264_v6, 0.0  ;;  %v363_v12 = vmul.f32 %v1864_v59, %v154_v7  ;;  %v778_v13 = vmul.f32 %v1972_v3, %v568_v8  ;;  %v1866_v59 = vsel %vm257_vm12, 1.0, %v2207_v24 }
 0x14c   :  { %v1751_v14 = vmax.f32 %v1715_v10, 0.0  ;;  %v1018_v15 = vpop.f32.mrf.mxu2  ;;  %v1974_v3 = vsel %vm672_vm13, 1.0, %v2207_v24  ;;  %vm261_vm12 = vcmp.ge.f32.partialorder %v225_v37, 0.25  ;;  %vm676_vm13 = vcmp.ge.f32.partialorder %v1942_v42, 0.25  ;;  %v227_v37 = vld [vmem:[%s3665_s3 + $0xe8] sm:$0xff] }
 0x14d   :  { %v1336_v18 = vmax.f32 %v885_v5, %v1300_v11  ;;  %v399_v20 = vmul.f32 1.3333334, %v363_v12  ;;  %v814_v21 = vmul.f32 1.3333334, %v778_v13  ;;  %v1019_v22 = vadd.f32 %v2934_v53, %v1018_v15  ;;  %v1469_v23 = vpop.f32.mrf.mxu3  ;;  %v1944_v42 = vld [vmem:[%s3665_s3 + $0x208] sm:$0xff] }
 0x14e   :  { %v1470_v27 = vadd.f32 %v2934_v53, %v1469_v23 }
 0x14f   :  { %v1787_v29 = vmax.f32 %v1336_v18, %v1751_v14  ;;  %v435_v30 = vmax.f32 %v399_v20, 0.0  ;;  %v850_v31 = vmax.f32 %v814_v21, 0.0  ;;  %v1229_v32 = vmul.f32 %v2080_v16, %v1019_v22 }
 0x150   :  { %v1680_v33 = vmul.f32 %v2188_v17, %v1470_v27  ;;  %v156_v34 = vpop.f32.mrf.mxu0  ;;  %v570_v35 = vpop.f32.mrf.mxu1  ;;  %v2082_v16 = vsel %vm1123_vm14, 1.0, %v2207_v24  ;;  %v2190_v17 = vsel %vm1574_vm15, 1.0, %v2207_v24  ;;  %vm1127_vm14 = vcmp.ge.f32.partialorder %v2050_v56, 0.25  ;;  %v2052_v56 = vld [vmem:[%s3665_s3 + $0x328] sm:$0xff] }
 0x151   :  { %1823 = vst [vmem:[%s3666_s4 + $0xa0] sm:$0xff] %v1787_v29  ;;  %v886_v38 = vmax.f32 %v435_v30, %v850_v31  ;;  %v1265_v39 = vmul.f32 1.3333334, %v1229_v32  ;;  %v157_v40 = vadd.f32 %v2934_v53, %v156_v34  ;;  %v571_v41 = vadd.f32 %v2934_v53, %v570_v35 }
 0x152   :  { %v1716_v43 = vmul.f32 1.3333334, %v1680_v33  ;;  %vm1578_vm15 = vcmp.ge.f32.partialorder %v2158_v57, 0.25  ;;  %v2160_v57 = vld [vmem:[%s3665_s3 + $0x448] sm:$0xff] }
 0x153   :  { %v1301_v44 = vmax.f32 %v1265_v39, 0.0  ;;  %v364_v45 = vmul.f32 %v1865_v28, %v157_v40  ;;  %v779_v46 = vmul.f32 %v1973_v36, %v571_v41  ;;  %v1867_v28 = vsel %vm258_vm0, 1.0, %v2207_v24  ;;  %v3365_v39 = vld [vmem:[%s3664_s2] ss:$0 sm:$0xff] }
 0x154   :  { %v1752_v47 = vmax.f32 %v1716_v43, 0.0  ;;  %v1021_v48 = vpop.f32.mrf.mxu2  ;;  %v1975_v36 = vsel %vm673_vm1, 1.0, %v2207_v24  ;;  %vm262_vm0 = vcmp.ge.f32.partialorder %v226_v4, 0.25  ;;  %vm677_vm1 = vcmp.ge.f32.partialorder %v1943_v9, 0.25  ;;  %v228_v4 = vld [vmem:[%s3665_s3 + $0xf0] sm:$0xff] }
 0x155   :  { %v1337_v50 = vmax.f32 %v886_v38, %v1301_v44  ;;  %v400_v51 = vmul.f32 1.3333334, %v364_v45  ;;  %v815_v52 = vmul.f32 1.3333334, %v779_v46  ;;  %v1022_v54 = vadd.f32 %v2934_v53, %v1021_v48  ;;  %v1472_v55 = vpop.f32.mrf.mxu3  ;;  %v1945_v9 = vld [vmem:[%s3665_s3 + $0x210] sm:$0xff] }
 0x156   :  { %v1473_v58 = vadd.f32 %v2934_v53, %v1472_v55 }
 0x157   :  { %v1788_v60 = vmax.f32 %v1337_v50, %v1752_v47  ;;  %v436_v61 = vmax.f32 %v400_v51, 0.0  ;;  %v851_v62 = vmax.f32 %v815_v52, 0.0  ;;  %v1230_v63 = vmul.f32 %v2081_v49, %v1022_v54 }
 0x158   :  { %v1681_v0 = vmul.f32 %v2189_v19, %v1473_v58  ;;  %v159_v1 = vpop.f32.mrf.mxu0  ;;  %v573_v2 = vpop.f32.mrf.mxu1  ;;  %v2083_v49 = vsel %vm1124_vm2, 1.0, %v2207_v24  ;;  %v2191_v19 = vsel %vm1575_vm3, 1.0, %v2207_v24  ;;  %vm1128_vm2 = vcmp.ge.f32.partialorder %v2051_v25, 0.25  ;;  %v2053_v25 = vld [vmem:[%s3665_s3 + $0x330] sm:$0xff] }
 0x159   :  { %1824 = vst [vmem:[%s3666_s4 + $0xa8] sm:$0xff] %v1788_v60  ;;  %v887_v5 = vmax.f32 %v436_v61, %v851_v62  ;;  %v1266_v6 = vmul.f32 1.3333334, %v1230_v63  ;;  %v160_v7 = vadd.f32 %v2934_v53, %v159_v1  ;;  %v574_v8 = vadd.f32 %v2934_v53, %v573_v2 }
 0x15a   :  { %v1717_v10 = vmul.f32 1.3333334, %v1681_v0  ;;  %vm1579_vm3 = vcmp.ge.f32.partialorder %v2159_v26, 0.25  ;;  %v2161_v26 = vld [vmem:[%s3665_s3 + $0x450] sm:$0xff] }
 0x15b   :  { %v1302_v11 = vmax.f32 %v1266_v6, 0.0  ;;  %v365_v12 = vmul.f32 %v1866_v59, %v160_v7  ;;  %v780_v13 = vmul.f32 %v1974_v3, %v574_v8  ;;  %v1868_v59 = vsel %vm259_vm4, 1.0, %v2207_v24 }
 0x15c   :  { %v1753_v14 = vmax.f32 %v1717_v10, 0.0  ;;  %v1024_v15 = vpop.f32.mrf.mxu2  ;;  %v1976_v3 = vsel %vm674_vm5, 1.0, %v2207_v24  ;;  %vm263_vm4 = vcmp.ge.f32.partialorder %v227_v37, 0.25  ;;  %vm678_vm5 = vcmp.ge.f32.partialorder %v1944_v42, 0.25  ;;  %v229_v37 = vld [vmem:[%s3665_s3 + $0xf8] sm:$0xff] }
 0x15d   :  { %v1338_v18 = vmax.f32 %v887_v5, %v1302_v11  ;;  %v401_v20 = vmul.f32 1.3333334, %v365_v12  ;;  %v816_v21 = vmul.f32 1.3333334, %v780_v13  ;;  %v1025_v22 = vadd.f32 %v2934_v53, %v1024_v15  ;;  %v1475_v23 = vpop.f32.mrf.mxu3  ;;  %v1946_v42 = vld [vmem:[%s3665_s3 + $0x218] sm:$0xff] }
 0x15e   :  { %v1476_v27 = vadd.f32 %v2934_v53, %v1475_v23 }
 0x15f   :  { %v1789_v29 = vmax.f32 %v1338_v18, %v1753_v14  ;;  %v437_v30 = vmax.f32 %v401_v20, 0.0  ;;  %v852_v31 = vmax.f32 %v816_v21, 0.0  ;;  %v1231_v32 = vmul.f32 %v2082_v16, %v1025_v22 }
 0x160   :  { %v1682_v33 = vmul.f32 %v2190_v17, %v1476_v27  ;;  %v162_v34 = vpop.f32.mrf.mxu0  ;;  %v576_v35 = vpop.f32.mrf.mxu1  ;;  %v2084_v16 = vsel %vm1125_vm6, 1.0, %v2207_v24  ;;  %v2192_v17 = vsel %vm1576_vm7, 1.0, %v2207_v24  ;;  %vm1129_vm6 = vcmp.ge.f32.partialorder %v2052_v56, 0.25  ;;  %v2054_v56 = vld [vmem:[%s3665_s3 + $0x338] sm:$0xff] }
 0x161   :  { %1825 = vst [vmem:[%s3666_s4 + $0xb0] sm:$0xff] %v1789_v29  ;;  %v888_v53 = vmax.f32 %v437_v30, %v852_v31  ;;  %v1267_v38 = vmul.f32 1.3333334, %v1231_v32  ;;  %v163_v40 = vadd.f32 %v3365_v39, %v162_v34  ;;  %v577_v41 = vadd.f32 %v3365_v39, %v576_v35 }
 0x162   :  { %v1718_v43 = vmul.f32 1.3333334, %v1682_v33  ;;  %vm1580_vm7 = vcmp.ge.f32.partialorder %v2160_v57, 0.25  ;;  %v2162_v57 = vld [vmem:[%s3665_s3 + $0x458] sm:$0xff] }
 0x163   :  { %v1303_v44 = vmax.f32 %v1267_v38, 0.0  ;;  %v366_v45 = vmul.f32 %v1867_v28, %v163_v40  ;;  %v781_v46 = vmul.f32 %v1975_v36, %v577_v41  ;;  %v1869_v28 = vsel %vm260_vm8, 1.0, %v2207_v24 }
 0x164   :  { %v1754_v47 = vmax.f32 %v1718_v43, 0.0  ;;  %v1027_v48 = vpop.f32.mrf.mxu2  ;;  %v1977_v36 = vsel %vm675_vm9, 1.0, %v2207_v24  ;;  %vm264_vm8 = vcmp.ge.f32.partialorder %v228_v4, 0.25  ;;  %vm679_vm9 = vcmp.ge.f32.partialorder %v1945_v9, 0.25  ;;  %v230_v4 = vld [vmem:[%s3665_s3 + $0x100] sm:$0xff] }
 0x165   :  { %v1339_v50 = vmax.f32 %v888_v53, %v1303_v44  ;;  %v402_v51 = vmul.f32 1.3333334, %v366_v45  ;;  %v817_v52 = vmul.f32 1.3333334, %v781_v46  ;;  %v1028_v54 = vadd.f32 %v3365_v39, %v1027_v48  ;;  %v1478_v55 = vpop.f32.mrf.mxu3  ;;  %v1947_v9 = vld [vmem:[%s3665_s3 + $0x220] sm:$0xff] }
 0x166   :  { %v1479_v58 = vadd.f32 %v3365_v39, %v1478_v55 }
 0x167   :  { %v1790_v60 = vmax.f32 %v1339_v50, %v1754_v47  ;;  %v438_v61 = vmax.f32 %v402_v51, 0.0  ;;  %v853_v62 = vmax.f32 %v817_v52, 0.0  ;;  %v1232_v63 = vmul.f32 %v2083_v49, %v1028_v54 }
 0x168   :  { %v1683_v0 = vmul.f32 %v2191_v19, %v1479_v58  ;;  %v165_v1 = vpop.f32.mrf.mxu0  ;;  %v579_v2 = vpop.f32.mrf.mxu1  ;;  %v2085_v49 = vsel %vm1126_vm10, 1.0, %v2207_v24  ;;  %v2193_v19 = vsel %vm1577_vm11, 1.0, %v2207_v24  ;;  %vm1130_vm10 = vcmp.ge.f32.partialorder %v2053_v25, 0.25  ;;  %v2055_v25 = vld [vmem:[%s3665_s3 + $0x340] sm:$0xff] }
 0x169   :  { %1826 = vst [vmem:[%s3666_s4 + $0xb8] sm:$0xff] %v1790_v60  ;;  %v889_v5 = vmax.f32 %v438_v61, %v853_v62  ;;  %v1268_v6 = vmul.f32 1.3333334, %v1232_v63  ;;  %v166_v7 = vadd.f32 %v3365_v39, %v165_v1  ;;  %v580_v8 = vadd.f32 %v3365_v39, %v579_v2 }
 0x16a   :  { %v1719_v10 = vmul.f32 1.3333334, %v1683_v0  ;;  %vm1581_vm11 = vcmp.ge.f32.partialorder %v2161_v26, 0.25  ;;  %v2163_v26 = vld [vmem:[%s3665_s3 + $0x460] sm:$0xff] }
 0x16b   :  { %v1304_v11 = vmax.f32 %v1268_v6, 0.0  ;;  %v367_v12 = vmul.f32 %v1868_v59, %v166_v7  ;;  %v782_v13 = vmul.f32 %v1976_v3, %v580_v8  ;;  %v1870_v59 = vsel %vm261_vm12, 1.0, %v2207_v24 }
 0x16c   :  { %v1755_v14 = vmax.f32 %v1719_v10, 0.0  ;;  %v1030_v15 = vpop.f32.mrf.mxu2  ;;  %v1978_v3 = vsel %vm676_vm13, 1.0, %v2207_v24  ;;  %vm265_vm12 = vcmp.ge.f32.partialorder %v229_v37, 0.25  ;;  %vm680_vm13 = vcmp.ge.f32.partialorder %v1946_v42, 0.25  ;;  %v231_v37 = vld [vmem:[%s3665_s3 + $0x108] sm:$0xff] }
 0x16d   :  { %v1340_v18 = vmax.f32 %v889_v5, %v1304_v11  ;;  %v403_v20 = vmul.f32 1.3333334, %v367_v12  ;;  %v818_v21 = vmul.f32 1.3333334, %v782_v13  ;;  %v1031_v22 = vadd.f32 %v3365_v39, %v1030_v15  ;;  %v1481_v23 = vpop.f32.mrf.mxu3  ;;  %v1948_v42 = vld [vmem:[%s3665_s3 + $0x228] sm:$0xff] }
 0x16e   :  { %v1482_v27 = vadd.f32 %v3365_v39, %v1481_v23 }
 0x16f   :  { %v1791_v29 = vmax.f32 %v1340_v18, %v1755_v14  ;;  %v439_v30 = vmax.f32 %v403_v20, 0.0  ;;  %v854_v31 = vmax.f32 %v818_v21, 0.0  ;;  %v1233_v32 = vmul.f32 %v2084_v16, %v1031_v22 }
 0x170   :  { %v1684_v33 = vmul.f32 %v2192_v17, %v1482_v27  ;;  %v168_v34 = vpop.f32.mrf.mxu0  ;;  %v582_v35 = vpop.f32.mrf.mxu1  ;;  %v2086_v16 = vsel %vm1127_vm14, 1.0, %v2207_v24  ;;  %v2194_v17 = vsel %vm1578_vm15, 1.0, %v2207_v24  ;;  %vm1131_vm14 = vcmp.ge.f32.partialorder %v2054_v56, 0.25  ;;  %v2056_v56 = vld [vmem:[%s3665_s3 + $0x348] sm:$0xff] }
 0x171   :  { %1827 = vst [vmem:[%s3666_s4 + $0xc0] sm:$0xff] %v1791_v29  ;;  %v890_v53 = vmax.f32 %v439_v30, %v854_v31  ;;  %v1269_v38 = vmul.f32 1.3333334, %v1233_v32  ;;  %v169_v40 = vadd.f32 %v3365_v39, %v168_v34  ;;  %v583_v41 = vadd.f32 %v3365_v39, %v582_v35 }
 0x172   :  { %v1720_v43 = vmul.f32 1.3333334, %v1684_v33  ;;  %vm1582_vm15 = vcmp.ge.f32.partialorder %v2162_v57, 0.25  ;;  %v2164_v57 = vld [vmem:[%s3665_s3 + $0x468] sm:$0xff] }
 0x173   :  { %v1305_v44 = vmax.f32 %v1269_v38, 0.0  ;;  %v368_v45 = vmul.f32 %v1869_v28, %v169_v40  ;;  %v783_v46 = vmul.f32 %v1977_v36, %v583_v41  ;;  %v1871_v28 = vsel %vm262_vm0, 1.0, %v2207_v24 }
 0x174   :  { %v1756_v47 = vmax.f32 %v1720_v43, 0.0  ;;  %v1033_v48 = vpop.f32.mrf.mxu2  ;;  %v1979_v36 = vsel %vm677_vm1, 1.0, %v2207_v24  ;;  %vm266_vm0 = vcmp.ge.f32.partialorder %v230_v4, 0.25  ;;  %vm681_vm1 = vcmp.ge.f32.partialorder %v1947_v9, 0.25  ;;  %v232_v4 = vld [vmem:[%s3665_s3 + $0x110] sm:$0xff] }
 0x175   :  { %v1341_v50 = vmax.f32 %v890_v53, %v1305_v44  ;;  %v404_v51 = vmul.f32 1.3333334, %v368_v45  ;;  %v819_v52 = vmul.f32 1.3333334, %v783_v46  ;;  %v1034_v54 = vadd.f32 %v3365_v39, %v1033_v48  ;;  %v1484_v55 = vpop.f32.mrf.mxu3  ;;  %v1949_v9 = vld [vmem:[%s3665_s3 + $0x230] sm:$0xff] }
 0x176   :  { %v1485_v58 = vadd.f32 %v3365_v39, %v1484_v55 }
 0x177   :  { %v1792_v60 = vmax.f32 %v1341_v50, %v1756_v47  ;;  %v440_v61 = vmax.f32 %v404_v51, 0.0  ;;  %v855_v62 = vmax.f32 %v819_v52, 0.0  ;;  %v1234_v63 = vmul.f32 %v2085_v49, %v1034_v54 }
 0x178   :  { %v1685_v0 = vmul.f32 %v2193_v19, %v1485_v58  ;;  %v171_v1 = vpop.f32.mrf.mxu0  ;;  %v585_v2 = vpop.f32.mrf.mxu1  ;;  %v2087_v49 = vsel %vm1128_vm2, 1.0, %v2207_v24  ;;  %v2195_v19 = vsel %vm1579_vm3, 1.0, %v2207_v24  ;;  %vm1132_vm2 = vcmp.ge.f32.partialorder %v2055_v25, 0.25  ;;  %v2057_v25 = vld [vmem:[%s3665_s3 + $0x350] sm:$0xff] }
 0x179   :  { %1828 = vst [vmem:[%s3666_s4 + $0xc8] sm:$0xff] %v1792_v60  ;;  %v891_v5 = vmax.f32 %v440_v61, %v855_v62  ;;  %v1270_v6 = vmul.f32 1.3333334, %v1234_v63  ;;  %v172_v7 = vadd.f32 %v3365_v39, %v171_v1  ;;  %v586_v8 = vadd.f32 %v3365_v39, %v585_v2 }
 0x17a   :  { %v1721_v10 = vmul.f32 1.3333334, %v1685_v0  ;;  %vm1583_vm3 = vcmp.ge.f32.partialorder %v2163_v26, 0.25  ;;  %v2165_v26 = vld [vmem:[%s3665_s3 + $0x470] sm:$0xff] }
 0x17b   :  { %v1306_v11 = vmax.f32 %v1270_v6, 0.0  ;;  %v369_v12 = vmul.f32 %v1870_v59, %v172_v7  ;;  %v784_v13 = vmul.f32 %v1978_v3, %v586_v8  ;;  %v1872_v59 = vsel %vm263_vm4, 1.0, %v2207_v24 }
 0x17c   :  { %v1757_v14 = vmax.f32 %v1721_v10, 0.0  ;;  %v1036_v15 = vpop.f32.mrf.mxu2  ;;  %v1980_v3 = vsel %vm678_vm5, 1.0, %v2207_v24  ;;  %vm267_vm4 = vcmp.ge.f32.partialorder %v231_v37, 0.25  ;;  %vm682_vm5 = vcmp.ge.f32.partialorder %v1948_v42, 0.25  ;;  %v233_v37 = vld [vmem:[%s3665_s3 + $0x118] sm:$0xff] }
 0x17d   :  { %v1342_v18 = vmax.f32 %v891_v5, %v1306_v11  ;;  %v405_v20 = vmul.f32 1.3333334, %v369_v12  ;;  %v820_v21 = vmul.f32 1.3333334, %v784_v13  ;;  %v1037_v22 = vadd.f32 %v3365_v39, %v1036_v15  ;;  %v1487_v23 = vpop.f32.mrf.mxu3  ;;  %v1950_v42 = vld [vmem:[%s3665_s3 + $0x238] sm:$0xff] }
 0x17e   :  { %v1488_v27 = vadd.f32 %v3365_v39, %v1487_v23 }
 0x17f   :  { %v1793_v29 = vmax.f32 %v1342_v18, %v1757_v14  ;;  %v441_v30 = vmax.f32 %v405_v20, 0.0  ;;  %v856_v31 = vmax.f32 %v820_v21, 0.0  ;;  %v1235_v32 = vmul.f32 %v2086_v16, %v1037_v22 }
 0x180   :  { %v1686_v33 = vmul.f32 %v2194_v17, %v1488_v27  ;;  %v174_v34 = vpop.f32.mrf.mxu0  ;;  %v588_v35 = vpop.f32.mrf.mxu1  ;;  %v2088_v16 = vsel %vm1129_vm6, 1.0, %v2207_v24  ;;  %v2196_v17 = vsel %vm1580_vm7, 1.0, %v2207_v24  ;;  %vm1133_vm6 = vcmp.ge.f32.partialorder %v2056_v56, 0.25  ;;  %v2058_v56 = vld [vmem:[%s3665_s3 + $0x358] sm:$0xff] }
 0x181   :  { %1829 = vst [vmem:[%s3666_s4 + $0xd0] sm:$0xff] %v1793_v29  ;;  %v892_v53 = vmax.f32 %v441_v30, %v856_v31  ;;  %v1271_v38 = vmul.f32 1.3333334, %v1235_v32  ;;  %v175_v40 = vadd.f32 %v3365_v39, %v174_v34  ;;  %v589_v41 = vadd.f32 %v3365_v39, %v588_v35 }
 0x182   :  { %v1722_v43 = vmul.f32 1.3333334, %v1686_v33  ;;  %vm1584_vm7 = vcmp.ge.f32.partialorder %v2164_v57, 0.25  ;;  %v2166_v57 = vld [vmem:[%s3665_s3 + $0x478] sm:$0xff] }
 0x183   :  { %v1307_v44 = vmax.f32 %v1271_v38, 0.0  ;;  %v370_v45 = vmul.f32 %v1871_v28, %v175_v40  ;;  %v785_v46 = vmul.f32 %v1979_v36, %v589_v41  ;;  %v1873_v28 = vsel %vm264_vm8, 1.0, %v2207_v24 }
 0x184   :  { %v1758_v47 = vmax.f32 %v1722_v43, 0.0  ;;  %v1039_v48 = vpop.f32.mrf.mxu2  ;;  %v1981_v36 = vsel %vm679_vm9, 1.0, %v2207_v24  ;;  %vm268_vm8 = vcmp.ge.f32.partialorder %v232_v4, 0.25  ;;  %vm683_vm9 = vcmp.ge.f32.partialorder %v1949_v9, 0.25 }
 0x185   :  { %v1343_v50 = vmax.f32 %v892_v53, %v1307_v44  ;;  %v406_v51 = vmul.f32 1.3333334, %v370_v45  ;;  %v821_v52 = vmul.f32 1.3333334, %v785_v46  ;;  %v1040_v54 = vadd.f32 %v3365_v39, %v1039_v48  ;;  %v1490_v55 = vpop.f32.mrf.mxu3 }
 0x186   :  { %v1491_v58 = vadd.f32 %v3365_v39, %v1490_v55 }
 0x187   :  { %v1794_v60 = vmax.f32 %v1343_v50, %v1758_v47  ;;  %v442_v61 = vmax.f32 %v406_v51, 0.0  ;;  %v857_v62 = vmax.f32 %v821_v52, 0.0  ;;  %v1236_v63 = vmul.f32 %v2087_v49, %v1040_v54 }
 0x188   :  { %v1687_v0 = vmul.f32 %v2195_v19, %v1491_v58  ;;  %v177_v1 = vpop.f32.mrf.mxu0  ;;  %v591_v2 = vpop.f32.mrf.mxu1  ;;  %v2089_v49 = vsel %vm1130_vm10, 1.0, %v2207_v24  ;;  %v2197_v19 = vsel %vm1581_vm11, 1.0, %v2207_v24  ;;  %vm1134_vm10 = vcmp.ge.f32.partialorder %v2057_v25, 0.25 }
 0x189   :  { %1830 = vst [vmem:[%s3666_s4 + $0xd8] sm:$0xff] %v1794_v60  ;;  %v893_v5 = vmax.f32 %v442_v61, %v857_v62  ;;  %v1272_v6 = vmul.f32 1.3333334, %v1236_v63  ;;  %v178_v7 = vadd.f32 %v3365_v39, %v177_v1  ;;  %v592_v8 = vadd.f32 %v3365_v39, %v591_v2 }
 0x18a   :  { %v1723_v10 = vmul.f32 1.3333334, %v1687_v0  ;;  %vm1585_vm11 = vcmp.ge.f32.partialorder %v2165_v26, 0.25 }
 0x18b   :  { %v1308_v11 = vmax.f32 %v1272_v6, 0.0  ;;  %v371_v12 = vmul.f32 %v1872_v59, %v178_v7  ;;  %v786_v13 = vmul.f32 %v1980_v3, %v592_v8  ;;  %v1874_v59 = vsel %vm265_vm12, 1.0, %v2207_v24 }
 0x18c   :  { %v1759_v14 = vmax.f32 %v1723_v10, 0.0  ;;  %v1042_v15 = vpop.f32.mrf.mxu2  ;;  %v1982_v3 = vsel %vm680_vm13, 1.0, %v2207_v24  ;;  %vm269_vm12 = vcmp.ge.f32.partialorder %v233_v37, 0.25  ;;  %vm684_vm13 = vcmp.ge.f32.partialorder %v1950_v42, 0.25 }
 0x18d   :  { %v1344_v18 = vmax.f32 %v893_v5, %v1308_v11  ;;  %v407_v20 = vmul.f32 1.3333334, %v371_v12  ;;  %v822_v21 = vmul.f32 1.3333334, %v786_v13  ;;  %v1043_v22 = vadd.f32 %v3365_v39, %v1042_v15  ;;  %v1493_v23 = vpop.f32.mrf.mxu3 }
 0x18e   :  { %v1494_v27 = vadd.f32 %v3365_v39, %v1493_v23 }
 0x18f   :  { %v1795_v29 = vmax.f32 %v1344_v18, %v1759_v14  ;;  %v443_v30 = vmax.f32 %v407_v20, 0.0  ;;  %v858_v31 = vmax.f32 %v822_v21, 0.0  ;;  %v1237_v32 = vmul.f32 %v2088_v16, %v1043_v22 }
 0x190   :  { %v1688_v33 = vmul.f32 %v2196_v17, %v1494_v27  ;;  %v180_v34 = vpop.f32.mrf.mxu0  ;;  %v594_v35 = vpop.f32.mrf.mxu1  ;;  %v2090_v16 = vsel %vm1131_vm14, 1.0, %v2207_v24  ;;  %v2198_v17 = vsel %vm1582_vm15, 1.0, %v2207_v24  ;;  %vm1135_vm14 = vcmp.ge.f32.partialorder %v2058_v56, 0.25 }
 0x191   :  { %1831 = vst [vmem:[%s3666_s4 + $0xe0] sm:$0xff] %v1795_v29  ;;  %v894_v53 = vmax.f32 %v443_v30, %v858_v31  ;;  %v1273_v38 = vmul.f32 1.3333334, %v1237_v32  ;;  %v181_v40 = vadd.f32 %v3365_v39, %v180_v34  ;;  %v595_v41 = vadd.f32 %v3365_v39, %v594_v35 }
 0x192   :  { %v1724_v43 = vmul.f32 1.3333334, %v1688_v33  ;;  %vm1586_vm15 = vcmp.ge.f32.partialorder %v2166_v57, 0.25 }
 0x193   :  { %v1309_v44 = vmax.f32 %v1273_v38, 0.0  ;;  %v372_v45 = vmul.f32 %v1873_v28, %v181_v40  ;;  %v787_v46 = vmul.f32 %v1981_v36, %v595_v41  ;;  %v1875_v28 = vsel %vm266_vm0, 1.0, %v2207_v24 }
 0x194   :  { %v1760_v47 = vmax.f32 %v1724_v43, 0.0  ;;  %v1045_v48 = vpop.f32.mrf.mxu2  ;;  %v1983_v36 = vsel %vm681_vm1, 1.0, %v2207_v24 }
 0x195   :  { %v1345_v50 = vmax.f32 %v894_v53, %v1309_v44  ;;  %v408_v51 = vmul.f32 1.3333334, %v372_v45  ;;  %v823_v52 = vmul.f32 1.3333334, %v787_v46  ;;  %v1046_v54 = vadd.f32 %v3365_v39, %v1045_v48  ;;  %v1496_v55 = vpop.f32.mrf.mxu3 }
 0x196   :  { %v1497_v58 = vadd.f32 %v3365_v39, %v1496_v55 }
 0x197   :  { %v1796_v60 = vmax.f32 %v1345_v50, %v1760_v47  ;;  %v444_v61 = vmax.f32 %v408_v51, 0.0  ;;  %v859_v62 = vmax.f32 %v823_v52, 0.0  ;;  %v1238_v63 = vmul.f32 %v2089_v49, %v1046_v54 }
 0x198   :  { %v1689_v0 = vmul.f32 %v2197_v19, %v1497_v58  ;;  %v183_v1 = vpop.f32.mrf.mxu0  ;;  %v597_v2 = vpop.f32.mrf.mxu1  ;;  %v2091_v49 = vsel %vm1132_vm2, 1.0, %v2207_v24  ;;  %v2199_v19 = vsel %vm1583_vm3, 1.0, %v2207_v24 }
 0x199   :  { %1832 = vst [vmem:[%s3666_s4 + $0xe8] sm:$0xff] %v1796_v60  ;;  %v895_v5 = vmax.f32 %v444_v61, %v859_v62  ;;  %v1274_v6 = vmul.f32 1.3333334, %v1238_v63  ;;  %v184_v7 = vadd.f32 %v3365_v39, %v183_v1  ;;  %v598_v8 = vadd.f32 %v3365_v39, %v597_v2 }
 0x19a   :  { %v1725_v10 = vmul.f32 1.3333334, %v1689_v0 }
 0x19b   :  { %v1310_v11 = vmax.f32 %v1274_v6, 0.0  ;;  %v373_v12 = vmul.f32 %v1874_v59, %v184_v7  ;;  %v788_v13 = vmul.f32 %v1982_v3, %v598_v8  ;;  %v1876_v59 = vsel %vm267_vm4, 1.0, %v2207_v24 }
 0x19c   :  { %v1761_v14 = vmax.f32 %v1725_v10, 0.0  ;;  %v1048_v15 = vpop.f32.mrf.mxu2  ;;  %v1984_v3 = vsel %vm682_vm5, 1.0, %v2207_v24 }
 0x19d   :  { %v1346_v18 = vmax.f32 %v895_v5, %v1310_v11  ;;  %v409_v20 = vmul.f32 1.3333334, %v373_v12  ;;  %v824_v21 = vmul.f32 1.3333334, %v788_v13  ;;  %v1049_v22 = vadd.f32 %v3365_v39, %v1048_v15  ;;  %v1499_v23 = vpop.f32.mrf.mxu3 }
 0x19e   :  { %v1500_v27 = vadd.f32 %v3365_v39, %v1499_v23 }
 0x19f   :  { %v1797_v29 = vmax.f32 %v1346_v18, %v1761_v14  ;;  %v445_v30 = vmax.f32 %v409_v20, 0.0  ;;  %v860_v31 = vmax.f32 %v824_v21, 0.0  ;;  %v1239_v32 = vmul.f32 %v2090_v16, %v1049_v22 }
 0x1a0   :  { %v1690_v33 = vmul.f32 %v2198_v17, %v1500_v27  ;;  %v186_v34 = vpop.f32.mrf.mxu0  ;;  %v600_v35 = vpop.f32.mrf.mxu1  ;;  %v2092_v16 = vsel %vm1133_vm6, 1.0, %v2207_v24  ;;  %v2200_v17 = vsel %vm1584_vm7, 1.0, %v2207_v24 }
 0x1a1   :  { %1833 = vst [vmem:[%s3666_s4 + $0xf0] sm:$0xff] %v1797_v29  ;;  %v896_v53 = vmax.f32 %v445_v30, %v860_v31  ;;  %v1275_v38 = vmul.f32 1.3333334, %v1239_v32  ;;  %v187_v40 = vadd.f32 %v3365_v39, %v186_v34  ;;  %v601_v41 = vadd.f32 %v3365_v39, %v600_v35 }
 0x1a2   :  { %v1726_v43 = vmul.f32 1.3333334, %v1690_v33 }
 0x1a3   :  { %v1311_v44 = vmax.f32 %v1275_v38, 0.0  ;;  %v374_v45 = vmul.f32 %v1875_v28, %v187_v40  ;;  %v789_v46 = vmul.f32 %v1983_v36, %v601_v41  ;;  %v1877_v28 = vsel %vm268_vm8, 1.0, %v2207_v24 }
 0x1a4   :  { %v1762_v47 = vmax.f32 %v1726_v43, 0.0  ;;  %v1051_v48 = vpop.f32.mrf.mxu2  ;;  %v1985_v36 = vsel %vm683_vm9, 1.0, %v2207_v24 }
 0x1a5   :  { %v1347_v50 = vmax.f32 %v896_v53, %v1311_v44  ;;  %v410_v51 = vmul.f32 1.3333334, %v374_v45  ;;  %v825_v52 = vmul.f32 1.3333334, %v789_v46  ;;  %v1052_v54 = vadd.f32 %v3365_v39, %v1051_v48  ;;  %v1502_v55 = vpop.f32.mrf.mxu3 }
 0x1a6   :  { %v1503_v58 = vadd.f32 %v3365_v39, %v1502_v55 }
 0x1a7   :  { %v1798_v60 = vmax.f32 %v1347_v50, %v1762_v47  ;;  %v446_v61 = vmax.f32 %v410_v51, 0.0  ;;  %v861_v62 = vmax.f32 %v825_v52, 0.0  ;;  %v1240_v63 = vmul.f32 %v2091_v49, %v1052_v54 }
 0x1a8   :  { %v1691_v0 = vmul.f32 %v2199_v19, %v1503_v58  ;;  %v189_v1 = vpop.f32.mrf.mxu0  ;;  %v603_v2 = vpop.f32.mrf.mxu1  ;;  %v2093_v49 = vsel %vm1134_vm10, 1.0, %v2207_v24  ;;  %v2201_v19 = vsel %vm1585_vm11, 1.0, %v2207_v24 }
 0x1a9   :  { %1834 = vst [vmem:[%s3666_s4 + $0xf8] sm:$0xff] %v1798_v60  ;;  %v897_v5 = vmax.f32 %v446_v61, %v861_v62  ;;  %v1276_v6 = vmul.f32 1.3333334, %v1240_v63  ;;  %v190_v7 = vadd.f32 %v3365_v39, %v189_v1  ;;  %v604_v8 = vadd.f32 %v3365_v39, %v603_v2 }
 0x1aa   :  { %v1727_v10 = vmul.f32 1.3333334, %v1691_v0 }
 0x1ab   :  { %v1312_v11 = vmax.f32 %v1276_v6, 0.0  ;;  %v375_v12 = vmul.f32 %v1876_v59, %v190_v7  ;;  %v790_v13 = vmul.f32 %v1984_v3, %v604_v8  ;;  %v1878_v59 = vsel %vm269_vm12, 1.0, %v2207_v24 }
 0x1ac   :  { %v1763_v14 = vmax.f32 %v1727_v10, 0.0  ;;  %v1054_v15 = vpop.f32.mrf.mxu2  ;;  %v1986_v3 = vsel %vm684_vm13, 1.0, %v2207_v24 }
 0x1ad   :  { %v1348_v18 = vmax.f32 %v897_v5, %v1312_v11  ;;  %v411_v20 = vmul.f32 1.3333334, %v375_v12  ;;  %v826_v21 = vmul.f32 1.3333334, %v790_v13  ;;  %v1055_v22 = vadd.f32 %v3365_v39, %v1054_v15  ;;  %v1505_v23 = vpop.f32.mrf.mxu3 }
 0x1ae   :  { %v1506_v27 = vadd.f32 %v3365_v39, %v1505_v23  ;;  %v2202_v15 = vsel %vm1586_vm15, 1.0, %v2207_v24 }
 0x1af   :  { %v1799_v29 = vmax.f32 %v1348_v18, %v1763_v14  ;;  %v447_v30 = vmax.f32 %v411_v20, 0.0  ;;  %v862_v31 = vmax.f32 %v826_v21, 0.0  ;;  %v1241_v32 = vmul.f32 %v2092_v16, %v1055_v22 }
 0x1b0   :  { %v1692_v33 = vmul.f32 %v2200_v17, %v1506_v27  ;;  %v192_v34 = vpop.f32.mrf.mxu0  ;;  %v606_v35 = vpop.f32.mrf.mxu1  ;;  %v2094_v14 = vsel %vm1135_vm14, 1.0, %v2207_v24 }
 0x1b1   :  { %1835 = vst [vmem:[%s3666_s4 + $0x100] sm:$0xff] %v1799_v29  ;;  %v898_v53 = vmax.f32 %v447_v30, %v862_v31  ;;  %v1277_v38 = vmul.f32 1.3333334, %v1241_v32  ;;  %v193_v40 = vadd.f32 %v3365_v39, %v192_v34  ;;  %v607_v41 = vadd.f32 %v3365_v39, %v606_v35 }
 0x1b2   :  { %v1728_v43 = vmul.f32 1.3333334, %v1692_v33 }
 0x1b3   :  { %v1313_v44 = vmax.f32 %v1277_v38, 0.0  ;;  %v376_v45 = vmul.f32 %v1877_v28, %v193_v40  ;;  %v791_v46 = vmul.f32 %v1985_v36, %v607_v41 }
 0x1b4   :  { %v1764_v47 = vmax.f32 %v1728_v43, 0.0  ;;  %v1057_v48 = vpop.f32.mrf.mxu2 }
 0x1b5   :  { %v1349_v50 = vmax.f32 %v898_v53, %v1313_v44  ;;  %v412_v51 = vmul.f32 1.3333334, %v376_v45  ;;  %v827_v52 = vmul.f32 1.3333334, %v791_v46  ;;  %v1058_v54 = vadd.f32 %v3365_v39, %v1057_v48  ;;  %v1508_v55 = vpop.f32.mrf.mxu3 }
 0x1b6   :  { %v1509_v58 = vadd.f32 %v3365_v39, %v1508_v55 }
 0x1b7   :  { %v1800_v60 = vmax.f32 %v1349_v50, %v1764_v47  ;;  %v448_v61 = vmax.f32 %v412_v51, 0.0  ;;  %v863_v62 = vmax.f32 %v827_v52, 0.0  ;;  %v1242_v63 = vmul.f32 %v2093_v49, %v1058_v54 }
 0x1b8   :  { %v1693_v0 = vmul.f32 %v2201_v19, %v1509_v58  ;;  %v195_v1 = vpop.f32.mrf.mxu0  ;;  %v609_v2 = vpop.f32.mrf.mxu1 }
 0x1b9   :  { %1836 = vst [vmem:[%s3666_s4 + $0x108] sm:$0xff] %v1800_v60  ;;  %v899_v4 = vmax.f32 %v448_v61, %v863_v62  ;;  %v1278_v5 = vmul.f32 1.3333334, %v1242_v63  ;;  %v196_v6 = vadd.f32 %v3365_v39, %v195_v1  ;;  %v610_v7 = vadd.f32 %v3365_v39, %v609_v2 }
 0x1ba   :  { %v1729_v8 = vmul.f32 1.3333334, %v1693_v0 }
 0x1bb   :  { %v1314_v9 = vmax.f32 %v1278_v5, 0.0  ;;  %v377_v10 = vmul.f32 %v1878_v59, %v196_v6  ;;  %v792_v11 = vmul.f32 %v1986_v3, %v610_v7 }
 0x1bc   :  { %v1765_v12 = vmax.f32 %v1729_v8, 0.0  ;;  %v1060_v13 = vpop.f32.mrf.mxu2 }
 0x1bd   :  { %v1350_v16 = vmax.f32 %v899_v4, %v1314_v9  ;;  %v413_v17 = vmul.f32 1.3333334, %v377_v10  ;;  %v828_v18 = vmul.f32 1.3333334, %v792_v11  ;;  %v1061_v20 = vadd.f32 %v3365_v39, %v1060_v13  ;;  %v1511_v21 = vpop.f32.mrf.mxu3 }
 0x1be   :  { %v1512_v22 = vadd.f32 %v3365_v39, %v1511_v21 }
 0x1bf   :  { %v1801_v23 = vmax.f32 %v1350_v16, %v1765_v12  ;;  %v449_v25 = vmax.f32 %v413_v17, 0.0  ;;  %v864_v26 = vmax.f32 %v828_v18, 0.0  ;;  %v1243_v27 = vmul.f32 %v2094_v14, %v1061_v20 }
 0x1c0   :  { %v1694_v28 = vmul.f32 %v2202_v15, %v1512_v22 }
 0x1c1   :  { %1837 = vst [vmem:[%s3666_s4 + $0x110] sm:$0xff] %v1801_v23  ;;  %v900_v29 = vmax.f32 %v449_v25, %v864_v26  ;;  %v1279_v30 = vmul.f32 1.3333334, %v1243_v27 }
 0x1c2   :  { %v1730_v24 = vmul.f32 1.3333334, %v1694_v28 }
 0x1c3   :  { %v1315_v31 = vmax.f32 %v1279_v30, 0.0 }
 0x1c4   :  { %v1766_v32 = vmax.f32 %v1730_v24, 0.0 }
 0x1c5   :  { %v1351_v33 = vmax.f32 %v900_v29, %v1315_v31 }
 0x1c7   :  { %v1802_v34 = vmax.f32 %v1351_v33, %v1766_v32 }
 0x1c9   :  { %1838 = vst [vmem:[%s3666_s4 + $0x118] sm:$0xff] %v1802_v34 }

// kernel: lenet5_dropout_forward.6
= control target key start
LH: loop header
LB: loop body
LE: loop exit
PB: predicated region body
PF: predicated region fallthrough
CT: control target
= control target key end

     0   :  { %s1040_s1 = inlined_call_operand.vmem [shape: f32[256,128], index: 1, kind: input, shape index: {}]   ;;  %s1041_s2 = inlined_call_operand.vmem [shape: f32[1,128], index: 2, kind: input, shape index: {}]   ;;  %s1042_s0 = inlined_call_operand.vmem [shape: f32[4,32,256], index: 0, kind: input, shape index: {}]   ;;  %s1043_s3 = inlined_call_operand.vmem [shape: f32[4,32,128], index: 3, kind: input, shape index: {}]   ;;  %s1044_s4 = inlined_call_operand.vmem [shape: f32[32,128], index: 4, kind: output, shape index: {}]  }
   0x1   :  { %v538_v0 = vld [vmem:[%s1040_s1 + $0x78] sm:$0xff]  ;;  %v543_v1 = vld [vmem:[%s1040_s1 + $0x70] sm:$0xff]  ;;  %v562_v4 = vld [vmem:[%s1040_s1 + $0x68] sm:$0xff] }
   0x2   :  { %v548_v2 = vld [vmem:[%s1040_s1 + $0xf8] sm:$0xff]  ;;  %61 = vmatpush.msra.mxu0 %v538_v0  ;;  %156 = vmatpush.msra.mxu2 %v538_v0  ;;  %v555_v3 = vld [vmem:[%s1040_s1 + $0xf0] sm:$0xff]  ;;  %v569_v5 = vld [vmem:[%s1040_s1 + $0xe8] sm:$0xff] }
   0x3   :  { %90 = vmatpush.msra.mxu1 %v548_v2  ;;  %185 = vmatpush.msra.mxu3 %v548_v2  ;;  %v576_v6 = vld [vmem:[%s1040_s1 + $0x60] sm:$0xff]  ;;  %v590_v8 = vld [vmem:[%s1040_s1 + $0x58] sm:$0xff]  ;;  %v604_v10 = vld [vmem:[%s1040_s1 + $0x50] sm:$0xff] }
   0x4   :  { %62 = vmatpush.msra.mxu0 %v543_v1  ;;  %157 = vmatpush.msra.mxu2 %v543_v1  ;;  %v583_v7 = vld [vmem:[%s1040_s1 + $0xe0] sm:$0xff]  ;;  %v597_v9 = vld [vmem:[%s1040_s1 + $0xd8] sm:$0xff]  ;;  %v611_v11 = vld [vmem:[%s1040_s1 + $0xd0] sm:$0xff] }
   0x5   :  { %91 = vmatpush.msra.mxu1 %v555_v3  ;;  %186 = vmatpush.msra.mxu3 %v555_v3  ;;  %v618_v12 = vld [vmem:[%s1040_s1 + $0x48] sm:$0xff]  ;;  %v632_v14 = vld [vmem:[%s1040_s1 + $0x40] sm:$0xff]  ;;  %v646_v16 = vld [vmem:[%s1040_s1 + $0x38] sm:$0xff] }
   0x6   :  { %63 = vmatpush.msra.mxu0 %v562_v4  ;;  %158 = vmatpush.msra.mxu2 %v562_v4  ;;  %v625_v13 = vld [vmem:[%s1040_s1 + $0xc8] sm:$0xff]  ;;  %v639_v15 = vld [vmem:[%s1040_s1 + $0xc0] sm:$0xff]  ;;  %v653_v17 = vld [vmem:[%s1040_s1 + $0xb8] sm:$0xff] }
   0x7   :  { %92 = vmatpush.msra.mxu1 %v569_v5  ;;  %187 = vmatpush.msra.mxu3 %v569_v5  ;;  %v660_v18 = vld [vmem:[%s1040_s1 + $0x30] sm:$0xff]  ;;  %v674_v20 = vld [vmem:[%s1040_s1 + $0x28] sm:$0xff]  ;;  %v688_v22 = vld [vmem:[%s1040_s1 + $0x20] sm:$0xff] }
   0x8   :  { %64 = vmatpush.msra.mxu0 %v576_v6  ;;  %159 = vmatpush.msra.mxu2 %v576_v6  ;;  %v667_v19 = vld [vmem:[%s1040_s1 + $0xb0] sm:$0xff]  ;;  %v681_v21 = vld [vmem:[%s1040_s1 + $0xa8] sm:$0xff]  ;;  %v695_v23 = vld [vmem:[%s1040_s1 + $0xa0] sm:$0xff] }
   0x9   :  { %93 = vmatpush.msra.mxu1 %v583_v7  ;;  %188 = vmatpush.msra.mxu3 %v583_v7  ;;  %v702_v24 = vld [vmem:[%s1040_s1 + $0x18] sm:$0xff]  ;;  %v716_v26 = vld [vmem:[%s1040_s1 + $0x10] sm:$0xff]  ;;  %v730_v28 = vld [vmem:[%s1040_s1 + $0x8] sm:$0xff] }
   0xa   :  { %65 = vmatpush.msra.mxu0 %v590_v8  ;;  %160 = vmatpush.msra.mxu2 %v590_v8  ;;  %v709_v25 = vld [vmem:[%s1040_s1 + $0x98] sm:$0xff]  ;;  %v723_v27 = vld [vmem:[%s1040_s1 + $0x90] sm:$0xff]  ;;  %v737_v29 = vld [vmem:[%s1040_s1 + $0x88] sm:$0xff] }
   0xb   :  { %94 = vmatpush.msra.mxu1 %v597_v9  ;;  %189 = vmatpush.msra.mxu3 %v597_v9  ;;  %v744_v30 = vld [vmem:[%s1040_s1] sm:$0xff]  ;;  %v51_v34 = vld [vmem:[%s1042_s0 + $0x8] sm:$0xff]  ;;  %v52_v36 = vld [vmem:[%s1042_s0 + $0x10] sm:$0xff] }
   0xc   :  { %66 = vmatpush.msra.mxu0 %v604_v10  ;;  %161 = vmatpush.msra.mxu2 %v604_v10  ;;  %v50_v31 = vld [vmem:[%s1042_s0] sm:$0xff]  ;;  %v460_v35 = vld [vmem:[%s1042_s0 + $0x48] sm:$0xff]  ;;  %v461_v37 = vld [vmem:[%s1042_s0 + $0x50] sm:$0xff] }
   0xd   :  { %95 = vmatpush.msra.mxu1 %v611_v11  ;;  %190 = vmatpush.msra.mxu3 %v611_v11  ;;  %v459_v32 = vld [vmem:[%s1042_s0 + $0x40] sm:$0xff]  ;;  %v53_v38 = vld [vmem:[%s1042_s0 + $0x18] sm:$0xff]  ;;  %v55_v42 = vld [vmem:[%s1042_s0 + $0x28] sm:$0xff] }
   0xe   :  { %67 = vmatpush.msra.mxu0 %v618_v12  ;;  %162 = vmatpush.msra.mxu2 %v618_v12  ;;  %v759_v33 = vld [vmem:[%s1040_s1 + $0x80] sm:$0xff]  ;;  %v462_v39 = vld [vmem:[%s1042_s0 + $0x58] sm:$0xff]  ;;  %v464_v43 = vld [vmem:[%s1042_s0 + $0x68] sm:$0xff] }
   0xf   :  { %96 = vmatpush.msra.mxu1 %v625_v13  ;;  %191 = vmatpush.msra.mxu3 %v625_v13  ;;  %v54_v40 = vld [vmem:[%s1042_s0 + $0x20] sm:$0xff]  ;;  %v56_v44 = vld [vmem:[%s1042_s0 + $0x30] sm:$0xff]  ;;  %v57_v46 = vld [vmem:[%s1042_s0 + $0x38] sm:$0xff] }
  0x10   :  { %68 = vmatpush.msra.mxu0 %v632_v14  ;;  %163 = vmatpush.msra.mxu2 %v632_v14  ;;  %v463_v41 = vld [vmem:[%s1042_s0 + $0x60] sm:$0xff]  ;;  %v465_v45 = vld [vmem:[%s1042_s0 + $0x70] sm:$0xff]  ;;  %v466_v47 = vld [vmem:[%s1042_s0 + $0x78] sm:$0xff] }
  0x11   :  { %97 = vmatpush.msra.mxu1 %v639_v15  ;;  %192 = vmatpush.msra.mxu3 %v639_v15  ;;  %v475_v48 = vld [vmem:[%s1042_s0 + $0x80] sm:$0xff]  ;;  %v476_v50 = vld [vmem:[%s1042_s0 + $0x88] sm:$0xff]  ;;  %v477_v52 = vld [vmem:[%s1042_s0 + $0x90] sm:$0xff] }
  0x12   :  { %69 = vmatpush.msra.mxu0 %v646_v16  ;;  %164 = vmatpush.msra.mxu2 %v646_v16  ;;  %v491_v49 = vld [vmem:[%s1042_s0 + $0xc0] sm:$0xff]  ;;  %v492_v51 = vld [vmem:[%s1042_s0 + $0xc8] sm:$0xff]  ;;  %v493_v53 = vld [vmem:[%s1042_s0 + $0xd0] sm:$0xff] }
  0x13   :  { %98 = vmatpush.msra.mxu1 %v653_v17  ;;  %193 = vmatpush.msra.mxu3 %v653_v17  ;;  %v478_v54 = vld [vmem:[%s1042_s0 + $0x98] sm:$0xff]  ;;  %v479_v56 = vld [vmem:[%s1042_s0 + $0xa0] sm:$0xff]  ;;  %v480_v58 = vld [vmem:[%s1042_s0 + $0xa8] sm:$0xff] }
  0x14   :  { %70 = vmatpush.msra.mxu0 %v660_v18  ;;  %165 = vmatpush.msra.mxu2 %v660_v18  ;;  %v494_v55 = vld [vmem:[%s1042_s0 + $0xd8] sm:$0xff]  ;;  %v495_v57 = vld [vmem:[%s1042_s0 + $0xe0] sm:$0xff]  ;;  %v496_v59 = vld [vmem:[%s1042_s0 + $0xe8] sm:$0xff] }
  0x15   :  { %99 = vmatpush.msra.mxu1 %v667_v19  ;;  %194 = vmatpush.msra.mxu3 %v667_v19  ;;  %v481_v60 = vld [vmem:[%s1042_s0 + $0xb0] sm:$0xff]  ;;  %v482_v62 = vld [vmem:[%s1042_s0 + $0xb8] sm:$0xff] }
  0x16   :  { %71 = vmatpush.msra.mxu0 %v674_v20  ;;  %166 = vmatpush.msra.mxu2 %v674_v20  ;;  %v497_v61 = vld [vmem:[%s1042_s0 + $0xf0] sm:$0xff]  ;;  %v498_v63 = vld [vmem:[%s1042_s0 + $0xf8] sm:$0xff] }
  0x17   :  { %100 = vmatpush.msra.mxu1 %v681_v21  ;;  %195 = vmatpush.msra.mxu3 %v681_v21 }
  0x18   :  { %72 = vmatpush.msra.mxu0 %v688_v22  ;;  %167 = vmatpush.msra.mxu2 %v688_v22 }
  0x19   :  { %101 = vmatpush.msra.mxu1 %v695_v23  ;;  %196 = vmatpush.msra.mxu3 %v695_v23 }
  0x1a   :  { %73 = vmatpush.msra.mxu0 %v702_v24  ;;  %168 = vmatpush.msra.mxu2 %v702_v24 }
  0x1b   :  { %102 = vmatpush.msra.mxu1 %v709_v25  ;;  %197 = vmatpush.msra.mxu3 %v709_v25 }
  0x1c   :  { %74 = vmatpush.msra.mxu0 %v716_v26  ;;  %169 = vmatpush.msra.mxu2 %v716_v26 }
  0x1d   :  { %103 = vmatpush.msra.mxu1 %v723_v27  ;;  %198 = vmatpush.msra.mxu3 %v723_v27 }
  0x1e   :  { %75 = vmatpush.msra.mxu0 %v730_v28  ;;  %170 = vmatpush.msra.mxu2 %v730_v28 }
  0x1f   :  { %104 = vmatpush.msra.mxu1 %v737_v29  ;;  %199 = vmatpush.msra.mxu3 %v737_v29 }
  0x20   :  { %76 = vmatpush.msra.mxu0 %v744_v30  ;;  %171 = vmatpush.msra.mxu2 %v744_v30 }
  0x21   :  { %77 = vmatmul.f32.vlgmr.msra.gmra.mxu0 %v50_v31  ;;  %172 = vmatmul.f32.vlgmr.msra.gmra.mxu2 %v459_v32 }
  0x22   :  { %356 = vmatpush.msrb.mxu2 %v538_v0  ;;  %105 = vmatpush.msra.mxu1 %v759_v33 }
  0x23   :  { %200 = vmatpush.msra.mxu3 %v759_v33  ;;  %256 = vmatpush.msrb.mxu0 %v538_v0 }
  0x24   :  { %106 = vmatmul.f32.vlgmr.msra.gmra.mxu1 %v51_v34  ;;  %201 = vmatmul.f32.vlgmr.msra.gmra.mxu3 %v460_v35 }
  0x25   :  { %357 = vmatpush.msrb.mxu2 %v543_v1  ;;  %385 = vmatpush.msrb.mxu3 %v548_v2 }
  0x26   :  { %257 = vmatpush.msrb.mxu0 %v543_v1  ;;  %285 = vmatpush.msrb.mxu1 %v548_v2 }
  0x27   :  { %358 = vmatpush.msrb.mxu2 %v562_v4  ;;  %386 = vmatpush.msrb.mxu3 %v555_v3 }
  0x28   :  { %258 = vmatpush.msrb.mxu0 %v562_v4  ;;  %286 = vmatpush.msrb.mxu1 %v555_v3 }
  0x29   :  { %359 = vmatpush.msrb.mxu2 %v576_v6  ;;  %387 = vmatpush.msrb.mxu3 %v569_v5 }
  0x2a   :  { %259 = vmatpush.msrb.mxu0 %v576_v6  ;;  %287 = vmatpush.msrb.mxu1 %v569_v5 }
  0x2b   :  { %80 = vmatmul.f32.gmra.mxu0 %v52_v36  ;;  %175 = vmatmul.f32.gmra.mxu2 %v461_v37  ;;  %v499_v36 = vld [vmem:[%s1043_s3 + $0x60] sm:$0xff] }
  0x2c   :  { %360 = vmatpush.msrb.mxu2 %v590_v8  ;;  %388 = vmatpush.msrb.mxu3 %v583_v7  ;;  %vm419_vm5 = vcmp.ge.f32.partialorder %v499_v36, 0.25 }
  0x2d   :  { %260 = vmatpush.msrb.mxu0 %v590_v8  ;;  %288 = vmatpush.msrb.mxu1 %v583_v7 }
  0x2e   :  { %109 = vmatmul.f32.gmra.mxu1 %v53_v38  ;;  %204 = vmatmul.f32.gmra.mxu3 %v462_v39 }
  0x2f   :  { %361 = vmatpush.msrb.mxu2 %v604_v10  ;;  %389 = vmatpush.msrb.mxu3 %v597_v9 }
  0x30   :  { %261 = vmatpush.msrb.mxu0 %v604_v10  ;;  %289 = vmatpush.msrb.mxu1 %v597_v9 }
  0x31   :  { %362 = vmatpush.msrb.mxu2 %v618_v12  ;;  %390 = vmatpush.msrb.mxu3 %v611_v11 }
  0x32   :  { %262 = vmatpush.msrb.mxu0 %v618_v12  ;;  %290 = vmatpush.msrb.mxu1 %v611_v11 }
  0x33   :  { %363 = vmatpush.msrb.mxu2 %v632_v14  ;;  %391 = vmatpush.msrb.mxu3 %v625_v13 }
  0x34   :  { %263 = vmatpush.msrb.mxu0 %v632_v14  ;;  %291 = vmatpush.msrb.mxu1 %v625_v13  ;;  %v928_v13 = vld [vmem:[%s1041_s2] ss:$0 sm:$0xff] }
  0x35   :  { %83 = vmatmul.f32.gmra.mxu0 %v54_v40  ;;  %178 = vmatmul.f32.gmra.mxu2 %v463_v41  ;;  %v467_v14 = vld [vmem:[%s1043_s3 + $0x20] sm:$0xff]  ;;  %v484_v40 = vld [vmem:[%s1043_s3 + $0x48] sm:$0xff] }
  0x36   :  { %364 = vmatpush.msrb.mxu2 %v646_v16  ;;  %392 = vmatpush.msrb.mxu3 %v639_v15  ;;  %vm219_vm0 = vcmp.ge.f32.partialorder %v467_v14, 0.25  ;;  %vm320_vm6 = vcmp.ge.f32.partialorder %v484_v40, 0.25  ;;  %v122_v14 = vld [vmem:[%s1043_s3 + $0x18] sm:$0xff] }
  0x37   :  { %264 = vmatpush.msrb.mxu0 %v646_v16  ;;  %292 = vmatpush.msrb.mxu1 %v639_v15  ;;  %vm126_vm11 = vcmp.ge.f32.partialorder %v122_v14, 0.25 }
  0x38   :  { %112 = vmatmul.f32.gmra.mxu1 %v55_v42  ;;  %207 = vmatmul.f32.gmra.mxu3 %v464_v43 }
  0x39   :  { %365 = vmatpush.msrb.mxu2 %v660_v18  ;;  %393 = vmatpush.msrb.mxu3 %v653_v17 }
  0x3a   :  { %265 = vmatpush.msrb.mxu0 %v660_v18  ;;  %293 = vmatpush.msrb.mxu1 %v653_v17  ;;  %v119_v17 = vld [vmem:[%s1043_s3] sm:$0xff] }
  0x3b   :  { %366 = vmatpush.msrb.mxu2 %v674_v20  ;;  %394 = vmatpush.msrb.mxu3 %v667_v19  ;;  %vm123_vm1 = vcmp.ge.f32.partialorder %v119_v17, 0.25 }
  0x3c   :  { %266 = vmatpush.msrb.mxu0 %v674_v20  ;;  %294 = vmatpush.msrb.mxu1 %v667_v19  ;;  %v483_v20 = vld [vmem:[%s1043_s3 + $0x40] sm:$0xff] }
  0x3d   :  { %367 = vmatpush.msrb.mxu2 %v688_v22  ;;  %395 = vmatpush.msrb.mxu3 %v681_v21  ;;  %vm319_vm2 = vcmp.ge.f32.partialorder %v483_v20, 0.25 }
  0x3e   :  { %267 = vmatpush.msrb.mxu0 %v688_v22  ;;  %295 = vmatpush.msrb.mxu1 %v681_v21  ;;  %v509_v22 = vmov 0.0  }
  0x3f   :  { %86 = vmatmul.f32.gmra.mxu0 %v56_v44  ;;  %181 = vmatmul.f32.gmra.mxu2 %v465_v45  ;;  %v487_v35 = vsel %vm319_vm2, 1.0, %v509_v22 }
  0x40   :  { %368 = vmatpush.msrb.mxu2 %v702_v24  ;;  %396 = vmatpush.msrb.mxu3 %v695_v23 }
  0x41   :  { %268 = vmatpush.msrb.mxu0 %v702_v24  ;;  %296 = vmatpush.msrb.mxu1 %v695_v23  ;;  %v471_v23 = vsel %vm219_vm0, 1.0, %v509_v22 }
  0x42   :  { %115 = vmatmul.f32.gmra.mxu1 %v57_v46  ;;  %210 = vmatmul.f32.gmra.mxu3 %v466_v47  ;;  %v469_v46 = vld [vmem:[%s1043_s3 + $0x30] sm:$0xff] }
  0x43   :  { %369 = vmatpush.msrb.mxu2 %v716_v26  ;;  %397 = vmatpush.msrb.mxu3 %v709_v25  ;;  %vm221_vm7 = vcmp.ge.f32.partialorder %v469_v46, 0.25 }
  0x44   :  { %269 = vmatpush.msrb.mxu0 %v716_v26  ;;  %297 = vmatpush.msrb.mxu1 %v709_v25  ;;  %v468_v25 = vld [vmem:[%s1043_s3 + $0x28] sm:$0xff] }
  0x45   :  { %370 = vmatpush.msrb.mxu2 %v730_v28  ;;  %398 = vmatpush.msrb.mxu3 %v723_v27  ;;  %vm220_vm3 = vcmp.ge.f32.partialorder %v468_v25, 0.25 }
  0x46   :  { %270 = vmatpush.msrb.mxu0 %v730_v28  ;;  %298 = vmatpush.msrb.mxu1 %v723_v27  ;;  %v455_v27 = vsel %vm123_vm1, 1.0, %v509_v22  ;;  %v120_v28 = vld [vmem:[%s1043_s3 + $0x8] sm:$0xff]  ;;  %v472_v42 = vsel %vm220_vm3, 1.0, %v509_v22 }
  0x47   :  { %371 = vmatpush.msrb.mxu2 %v744_v30  ;;  %399 = vmatpush.msrb.mxu3 %v737_v29  ;;  %vm124_vm4 = vcmp.ge.f32.partialorder %v120_v28, 0.25 }
  0x48   :  { %271 = vmatpush.msrb.mxu0 %v744_v30  ;;  %299 = vmatpush.msrb.mxu1 %v737_v29  ;;  %v456_v45 = vsel %vm124_vm4, 1.0, %v509_v22 }
  0x49   :  { %272 = vmatmul.f32.vlgmr.msrb.gmra.mxu0 %v475_v48  ;;  %372 = vmatmul.f32.vlgmr.msrb.gmra.mxu2 %v491_v49  ;;  %v121_v49 = vld [vmem:[%s1043_s3 + $0x10] sm:$0xff] }
  0x4a   :  { %400 = vmatpush.msrb.mxu3 %v759_v33  ;;  %300 = vmatpush.msrb.mxu1 %v759_v33  ;;  %vm125_vm8 = vcmp.ge.f32.partialorder %v121_v49, 0.25 }
  0x4b   :  { %301 = vmatmul.f32.vlgmr.msrb.gmra.mxu1 %v476_v50  ;;  %401 = vmatmul.f32.vlgmr.msrb.gmra.mxu3 %v492_v51 }
  0x51   :  { %275 = vmatmul.f32.gmra.mxu0 %v477_v52  ;;  %375 = vmatmul.f32.gmra.mxu2 %v493_v53 }
  0x53   :  { %304 = vmatmul.f32.gmra.mxu1 %v478_v54  ;;  %404 = vmatmul.f32.gmra.mxu3 %v494_v55 }
  0x59   :  { %278 = vmatmul.f32.gmra.mxu0 %v479_v56  ;;  %378 = vmatmul.f32.gmra.mxu2 %v495_v57  ;;  %v503_v56 = vsel %vm419_vm5, 1.0, %v509_v22 }
  0x5b   :  { %307 = vmatmul.f32.gmra.mxu1 %v480_v58  ;;  %407 = vmatmul.f32.gmra.mxu3 %v496_v59 }
  0x61   :  { %281 = vmatmul.f32.gmra.mxu0 %v481_v60  ;;  %381 = vmatmul.f32.gmra.mxu2 %v497_v61 }
  0x63   :  { %310 = vmatmul.f32.gmra.mxu1 %v482_v62  ;;  %410 = vmatmul.f32.gmra.mxu3 %v498_v63  ;;  %v488_v63 = vsel %vm320_vm6, 1.0, %v509_v22 }
  0x9e   :  { %v78_v0 = vpop.f32.mrf.mxu0 }
  0x9f   :  { %v79_v18 = vadd.f32 %v928_v13, %v78_v0  ;;  %v500_v0 = vld [vmem:[%s1043_s3 + $0x68] sm:$0xff] }
  0xa0   :  { %vm420_vm9 = vcmp.ge.f32.partialorder %v500_v0, 0.25 }
  0xa1   :  { %v107_v1 = vpop.f32.mrf.mxu1 }
  0xa2   :  { %v108_v24 = vadd.f32 %v107_v1, %v79_v18 }
  0xa4   :  { %v173_v2 = vpop.f32.mrf.mxu2  ;;  %v135_v37 = vmul.f32 %v455_v27, %v108_v24 }
  0xa5   :  { %v174_v15 = vadd.f32 %v928_v13, %v173_v2 }
  0xa6   :  { %v139_v48 = vmul.f32 1.3333334, %v135_v37 }
  0xa7   :  { %v202_v3 = vpop.f32.mrf.mxu3 }
  0xa8   :  { %v81_v4 = vpop.f32.mrf.mxu0  ;;  %v203_v21 = vadd.f32 %v202_v3, %v174_v15  ;;  %v143_v1 = vmax.f32 %v139_v48, 0.0 }
  0xa9   :  { %v82_v33 = vadd.f32 %v928_v13, %v81_v4 }
  0xaa   :  { %v231_v31 = vmul.f32 %v471_v23, %v203_v21  ;;  %v457_v21 = vsel %vm125_vm8, 1.0, %v509_v22 }
  0xab   :  { %v110_v5 = vpop.f32.mrf.mxu1 }
  0xac   :  { %v235_v41 = vmul.f32 1.3333334, %v231_v31  ;;  %v111_v44 = vadd.f32 %v110_v5, %v82_v33  ;;  %v485_v5 = vld [vmem:[%s1043_s3 + $0x50] sm:$0xff] }
  0xad   :  { %vm321_vm10 = vcmp.ge.f32.partialorder %v485_v5, 0.25  ;;  %v502_v5 = vld [vmem:[%s1043_s3 + $0x78] sm:$0xff] }
  0xae   :  { %v176_v6 = vpop.f32.mrf.mxu2  ;;  %v239_v57 = vmax.f32 %v235_v41, 0.0  ;;  %v136_v60 = vmul.f32 %v456_v45, %v111_v44  ;;  %v489_v41 = vsel %vm321_vm10, 1.0, %v509_v22  ;;  %vm422_vm15 = vcmp.ge.f32.partialorder %v502_v5, 0.25 }
  0xaf   :  { %v177_v29 = vadd.f32 %v928_v13, %v176_v6 }
  0xb0   :  { %v140_v18 = vmul.f32 1.3333334, %v136_v60 }
  0xb1   :  { %v205_v7 = vpop.f32.mrf.mxu3 }
  0xb2   :  { %v84_v8 = vpop.f32.mrf.mxu0  ;;  %v206_v39 = vadd.f32 %v205_v7, %v177_v29  ;;  %v144_v37 = vmax.f32 %v140_v18, 0.0 }
  0xb3   :  { %v85_v61 = vadd.f32 %v928_v13, %v84_v8  ;;  %v473_v8 = vsel %vm221_vm7, 1.0, %v509_v22 }
  0xb4   :  { %v232_v52 = vmul.f32 %v472_v42, %v206_v39  ;;  %v501_v42 = vld [vmem:[%s1043_s3 + $0x70] sm:$0xff] }
  0xb5   :  { %v919_v9 = vpop.f32.mrf.mxu1  ;;  %vm421_vm13 = vcmp.ge.f32.partialorder %v501_v42, 0.25 }
  0xb6   :  { %v236_v6 = vmul.f32 1.3333334, %v232_v52  ;;  %v114_v20 = vadd.f32 %v919_v9, %v85_v61  ;;  %v504_v9 = vsel %vm420_vm9, 1.0, %v509_v22 }
  0xb8   :  { %v179_v10 = vpop.f32.mrf.mxu2  ;;  %v240_v28 = vmax.f32 %v236_v6, 0.0 }
  0xb9   :  { %v180_v53 = vadd.f32 %v928_v13, %v179_v10  ;;  %v243_v10 = vmax.f32 %v143_v1, %v239_v57 }
  0xba   :  { %v244_v45 = vmax.f32 %v144_v37, %v240_v28 }
  0xbb   :  { %v921_v11 = vpop.f32.mrf.mxu3 }
  0xbc   :  { %v923_v12 = vpop.f32.mrf.mxu0  ;;  %v209_v7 = vadd.f32 %v921_v11, %v180_v53 }
  0xbd   :  { %v88_v39 = vadd.f32 %v928_v13, %v923_v12  ;;  %v486_v12 = vld [vmem:[%s1043_s3 + $0x58] sm:$0xff] }
  0xbe   :  { %v233_v29 = vmul.f32 %v473_v8, %v209_v7  ;;  %vm322_vm14 = vcmp.ge.f32.partialorder %v486_v12, 0.25 }
  0xbf   :  { %v934_v16 = vpop.f32.mrf.mxu1 }
  0xc0   :  { %v237_v46 = vmul.f32 1.3333334, %v233_v29  ;;  %v117_v52 = vadd.f32 %v934_v16, %v88_v39 }
  0xc2   :  { %v940_v19 = vpop.f32.mrf.mxu2 }
  0xc3   :  { %v183_v33 = vadd.f32 %v928_v13, %v940_v19 }
  0xc5   :  { %v949_v26 = vpop.f32.mrf.mxu3 }
  0xc6   :  { %v273_v30 = vpop.f32.mrf.mxu0  ;;  %v212_v48 = vadd.f32 %v949_v26, %v183_v33  ;;  %v505_v26 = vsel %vm421_vm13, 1.0, %v509_v22 }
  0xc7   :  { %v274_v32 = vadd.f32 %v928_v13, %v273_v30  ;;  %v470_v30 = vld [vmem:[%s1043_s3 + $0x38] sm:$0xff] }
  0xc8   :  { %v302_v34 = vpop.f32.mrf.mxu1  ;;  %vm222_vm12 = vcmp.ge.f32.partialorder %v470_v30, 0.25 }
  0xc9   :  { %v303_v38 = vadd.f32 %v302_v34, %v274_v32  ;;  %v474_v53 = vsel %vm222_vm12, 1.0, %v509_v22 }
  0xcb   :  { %v331_v43 = vmul.f32 %v487_v35, %v303_v38  ;;  %v137_v38 = vmul.f32 %v457_v21, %v114_v20 }
  0xcc   :  { %v373_v47 = vpop.f32.mrf.mxu2 }
  0xcd   :  { %v335_v50 = vmul.f32 1.3333334, %v331_v43  ;;  %v374_v51 = vadd.f32 %v928_v13, %v373_v47  ;;  %v458_v47 = vsel %vm126_vm11, 1.0, %v509_v22 }
  0xce   :  { %v276_v54 = vpop.f32.mrf.mxu0  ;;  %v402_v55 = vpop.f32.mrf.mxu3 }
  0xcf   :  { %v277_v58 = vadd.f32 %v928_v13, %v276_v54  ;;  %v403_v59 = vadd.f32 %v402_v55, %v374_v51  ;;  %v339_v2 = vmax.f32 %v335_v50, 0.0  ;;  %v141_v51 = vmul.f32 1.3333334, %v137_v38 }
  0xd0   :  { %v305_v62 = vpop.f32.mrf.mxu1 }
  0xd1   :  { %v431_v3 = vmul.f32 %v503_v56, %v403_v59  ;;  %v306_v4 = vadd.f32 %v305_v62, %v277_v58  ;;  %v343_v11 = vmax.f32 %v243_v10, %v339_v2  ;;  %v241_v59 = vmax.f32 %v237_v46, 0.0 }
  0xd2   :  { %v234_v62 = vmul.f32 %v474_v53, %v212_v48  ;;  %v145_v16 = vmax.f32 %v141_v51, 0.0  ;;  %v138_v2 = vmul.f32 %v458_v47, %v117_v52 }
  0xd3   :  { %v435_v15 = vmul.f32 1.3333334, %v431_v3  ;;  %v332_v17 = vmul.f32 %v488_v63, %v306_v4  ;;  %v490_v4 = vsel %vm322_vm14, 1.0, %v509_v22 }
  0xd4   :  { %v376_v23 = vpop.f32.mrf.mxu2  ;;  %v245_v10 = vmax.f32 %v145_v16, %v241_v59  ;;  %v238_v14 = vmul.f32 1.3333334, %v234_v62  ;;  %v142_v18 = vmul.f32 1.3333334, %v138_v2 }
  0xd5   :  { %v439_v24 = vmax.f32 %v435_v15, 0.0  ;;  %v336_v25 = vmul.f32 1.3333334, %v332_v17  ;;  %v377_v27 = vadd.f32 %v928_v13, %v376_v23 }
  0xd6   :  { %v279_v31 = vpop.f32.mrf.mxu0  ;;  %v405_v32 = vpop.f32.mrf.mxu3  ;;  %v242_v28 = vmax.f32 %v238_v14, 0.0 }
  0xd7   :  { %v443_v34 = vmax.f32 %v343_v11, %v439_v24  ;;  %v280_v35 = vadd.f32 %v928_v13, %v279_v31  ;;  %v406_v36 = vadd.f32 %v405_v32, %v377_v27  ;;  %v340_v19 = vmax.f32 %v336_v25, 0.0 }
  0xd8   :  { %v308_v40 = vpop.f32.mrf.mxu1  ;;  %v506_v27 = vsel %vm422_vm15, 1.0, %v509_v22  ;;  %v146_v31 = vmax.f32 %v142_v18, 0.0 }
  0xd9   :  { %447 = vst [vmem:[%s1044_s4] sm:$0xff] %v443_v34  ;;  %v432_v43 = vmul.f32 %v504_v9, %v406_v36  ;;  %v309_v44 = vadd.f32 %v308_v40, %v280_v35  ;;  %v344_v55 = vmax.f32 %v244_v45, %v340_v19 }
  0xda   :  { %v246_v33 = vmax.f32 %v146_v31, %v242_v28 }
  0xdb   :  { %v436_v49 = vmul.f32 1.3333334, %v432_v43  ;;  %v333_v50 = vmul.f32 %v489_v41, %v309_v44 }
  0xdc   :  { %v379_v54 = vpop.f32.mrf.mxu2 }
  0xdd   :  { %v440_v56 = vmax.f32 %v436_v49, 0.0  ;;  %v337_v57 = vmul.f32 1.3333334, %v333_v50  ;;  %v380_v58 = vadd.f32 %v928_v13, %v379_v54 }
  0xde   :  { %v282_v60 = vpop.f32.mrf.mxu0  ;;  %v408_v61 = vpop.f32.mrf.mxu3 }
  0xdf   :  { %v444_v63 = vmax.f32 %v344_v55, %v440_v56  ;;  %v283_v0 = vadd.f32 %v928_v13, %v282_v60  ;;  %v409_v1 = vadd.f32 %v408_v61, %v380_v58  ;;  %v341_v6 = vmax.f32 %v337_v57, 0.0 }
  0xe0   :  { %v311_v3 = vpop.f32.mrf.mxu1 }
  0xe1   :  { %448 = vst [vmem:[%s1044_s4 + $0x8] sm:$0xff] %v444_v63  ;;  %v433_v7 = vmul.f32 %v505_v26, %v409_v1  ;;  %v312_v8 = vadd.f32 %v311_v3, %v283_v0  ;;  %v345_v21 = vmax.f32 %v245_v10, %v341_v6 }
  0xe3   :  { %v437_v15 = vmul.f32 1.3333334, %v433_v7  ;;  %v334_v17 = vmul.f32 %v490_v4, %v312_v8 }
  0xe4   :  { %v382_v20 = vpop.f32.mrf.mxu2 }
  0xe5   :  { %v441_v23 = vmax.f32 %v437_v15, 0.0  ;;  %v338_v11 = vmul.f32 1.3333334, %v334_v17  ;;  %v383_v24 = vadd.f32 %v928_v13, %v382_v20 }
  0xe6   :  { %v411_v25 = vpop.f32.mrf.mxu3 }
  0xe7   :  { %v445_v29 = vmax.f32 %v345_v21, %v441_v23  ;;  %v412_v30 = vadd.f32 %v411_v25, %v383_v24  ;;  %v342_v32 = vmax.f32 %v338_v11, 0.0 }
  0xe9   :  { %449 = vst [vmem:[%s1044_s4 + $0x10] sm:$0xff] %v445_v29  ;;  %v434_v9 = vmul.f32 %v506_v27, %v412_v30  ;;  %v346_v35 = vmax.f32 %v246_v33, %v342_v32 }
  0xeb   :  { %v438_v34 = vmul.f32 1.3333334, %v434_v9 }
  0xed   :  { %v442_v36 = vmax.f32 %v438_v34, 0.0 }
  0xef   :  { %v446_v37 = vmax.f32 %v346_v35, %v442_v36 }
  0xf1   :  { %450 = vst [vmem:[%s1044_s4 + $0x18] sm:$0xff] %v446_v37 }

// kernel: lenet5_dropout_forward.7
= control target key start
LH: loop header
LB: loop body
LE: loop exit
PB: predicated region body
PF: predicated region fallthrough
CT: control target
= control target key end

     0   :  { %s476_s1 = inlined_call_operand.vmem [shape: f32[256,128], index: 1, kind: input, shape index: {}]   ;;  %s477_s3 = inlined_call_operand.vmem [shape: f32[128,128], index: 3, kind: input, shape index: {}]   ;;  %s478_s2 = inlined_call_operand.vmem [shape: f32[1,128], index: 2, kind: input, shape index: {}]   ;;  %s479_s0 = inlined_call_operand.vmem [shape: f32[8,256], index: 0, kind: input, shape index: {}]   ;;  %s480_s4 = inlined_call_operand.vmem [shape: f32[1,128], index: 4, kind: input, shape index: {}]   ;;  %s481_s5 = inlined_call_operand.vmem [shape: f32[128,128], index: 5, kind: input, shape index: {}]   ;;  %s482_s7 = inlined_call_operand.vmem [shape: f32[2,8,128], index: 7, kind: input, shape index: {}]   ;;  %s483_s6 = inlined_call_operand.vmem [shape: f32[1,128], index: 6, kind: input, shape index: {}]   ;;  %s484_s8 = inlined_call_operand.vmem [shape: f32[8,128], index: 8, kind: output, shape index: {}]  }
   0x1   :  { %v46_v0 = vld [vmem:[%s476_s1 + $0x78] sm:$0xff]  ;;  %v45_v1 = vld [vmem:[%s476_s1 + $0x70] sm:$0xff]  ;;  %v44_v4 = vld [vmem:[%s476_s1 + $0x68] sm:$0xff] }
   0x2   :  { %v62_v2 = vld [vmem:[%s476_s1 + $0xf8] sm:$0xff]  ;;  %67 = vmatpush.msra.mxu0 %v46_v0  ;;  %v61_v3 = vld [vmem:[%s476_s1 + $0xf0] sm:$0xff]  ;;  %v60_v5 = vld [vmem:[%s476_s1 + $0xe8] sm:$0xff] }
   0x3   :  { %87 = vmatpush.msra.mxu1 %v62_v2  ;;  %v43_v6 = vld [vmem:[%s476_s1 + $0x60] sm:$0xff]  ;;  %v42_v8 = vld [vmem:[%s476_s1 + $0x58] sm:$0xff]  ;;  %v41_v10 = vld [vmem:[%s476_s1 + $0x50] sm:$0xff]  ;;  %v214_v2 = vmov 0.0  }
   0x4   :  { %68 = vmatpush.msra.mxu0 %v45_v1  ;;  %v59_v7 = vld [vmem:[%s476_s1 + $0xe0] sm:$0xff]  ;;  %v58_v9 = vld [vmem:[%s476_s1 + $0xd8] sm:$0xff]  ;;  %v57_v11 = vld [vmem:[%s476_s1 + $0xd0] sm:$0xff] }
   0x5   :  { %88 = vmatpush.msra.mxu1 %v61_v3  ;;  %v40_v12 = vld [vmem:[%s476_s1 + $0x48] sm:$0xff]  ;;  %v129_v14 = vld [vmem:[%s477_s3 + $0x78] sm:$0xff]  ;;  %v128_v15 = vld [vmem:[%s477_s3 + $0x70] sm:$0xff] }
   0x6   :  { %69 = vmatpush.msra.mxu0 %v44_v4  ;;  %v56_v13 = vld [vmem:[%s476_s1 + $0xc8] sm:$0xff]  ;;  %v39_v16 = vld [vmem:[%s476_s1 + $0x40] sm:$0xff]  ;;  %134 = vmatpush.msra.mxu2 %v129_v14  ;;  %v38_v19 = vld [vmem:[%s476_s1 + $0x38] sm:$0xff] }
   0x7   :  { %89 = vmatpush.msra.mxu1 %v60_v5  ;;  %v55_v17 = vld [vmem:[%s476_s1 + $0xc0] sm:$0xff]  ;;  %v127_v18 = vld [vmem:[%s477_s3 + $0x68] sm:$0xff]  ;;  %v54_v20 = vld [vmem:[%s476_s1 + $0xb8] sm:$0xff] }
   0x8   :  { %70 = vmatpush.msra.mxu0 %v43_v6  ;;  %135 = vmatpush.msra.mxu2 %v128_v15  ;;  %v126_v21 = vld [vmem:[%s477_s3 + $0x60] sm:$0xff]  ;;  %v37_v22 = vld [vmem:[%s476_s1 + $0x30] sm:$0xff]  ;;  %v125_v24 = vld [vmem:[%s477_s3 + $0x58] sm:$0xff] }
   0x9   :  { %90 = vmatpush.msra.mxu1 %v59_v7  ;;  %v53_v23 = vld [vmem:[%s476_s1 + $0xb0] sm:$0xff]  ;;  %v36_v25 = vld [vmem:[%s476_s1 + $0x28] sm:$0xff]  ;;  %v35_v28 = vld [vmem:[%s476_s1 + $0x20] sm:$0xff] }
   0xa   :  { %71 = vmatpush.msra.mxu0 %v42_v8  ;;  %136 = vmatpush.msra.mxu2 %v127_v18  ;;  %v52_v26 = vld [vmem:[%s476_s1 + $0xa8] sm:$0xff]  ;;  %v124_v27 = vld [vmem:[%s477_s3 + $0x50] sm:$0xff]  ;;  %v51_v29 = vld [vmem:[%s476_s1 + $0xa0] sm:$0xff] }
   0xb   :  { %91 = vmatpush.msra.mxu1 %v58_v9  ;;  %v123_v30 = vld [vmem:[%s477_s3 + $0x48] sm:$0xff]  ;;  %v34_v31 = vld [vmem:[%s476_s1 + $0x18] sm:$0xff]  ;;  %v122_v33 = vld [vmem:[%s477_s3 + $0x40] sm:$0xff] }
   0xc   :  { %72 = vmatpush.msra.mxu0 %v41_v10  ;;  %137 = vmatpush.msra.mxu2 %v126_v21  ;;  %v50_v32 = vld [vmem:[%s476_s1 + $0x98] sm:$0xff]  ;;  %v33_v34 = vld [vmem:[%s476_s1 + $0x10] sm:$0xff]  ;;  %v32_v37 = vld [vmem:[%s476_s1 + $0x8] sm:$0xff] }
   0xd   :  { %92 = vmatpush.msra.mxu1 %v57_v11  ;;  %v49_v35 = vld [vmem:[%s476_s1 + $0x90] sm:$0xff]  ;;  %v121_v36 = vld [vmem:[%s477_s3 + $0x38] sm:$0xff]  ;;  %v48_v38 = vld [vmem:[%s476_s1 + $0x88] sm:$0xff] }
   0xe   :  { %73 = vmatpush.msra.mxu0 %v40_v12  ;;  %138 = vmatpush.msra.mxu2 %v125_v24  ;;  %v120_v39 = vld [vmem:[%s477_s3 + $0x30] sm:$0xff]  ;;  %v31_v40 = vld [vmem:[%s476_s1] sm:$0xff]  ;;  %v30_v43 = vld [vmem:[%s479_s0 + $0x8] sm:$0xff] }
   0xf   :  { %93 = vmatpush.msra.mxu1 %v56_v13  ;;  %v47_v41 = vld [vmem:[%s476_s1 + $0x80] sm:$0xff]  ;;  %v119_v44 = vld [vmem:[%s477_s3 + $0x28] sm:$0xff]  ;;  %v117_v46 = vld [vmem:[%s477_s3 + $0x18] sm:$0xff] }
  0x10   :  { %74 = vmatpush.msra.mxu0 %v39_v16  ;;  %139 = vmatpush.msra.mxu2 %v124_v27  ;;  %v29_v42 = vld [vmem:[%s479_s0] sm:$0xff]  ;;  %v116_v47 = vld [vmem:[%s477_s3 + $0x10] sm:$0xff]  ;;  %v115_v48 = vld [vmem:[%s477_s3 + $0x8] sm:$0xff] }
  0x11   :  { %94 = vmatpush.msra.mxu1 %v55_v17  ;;  %v118_v45 = vld [vmem:[%s477_s3 + $0x20] sm:$0xff]  ;;  %v177_v50 = vld [vmem:[%s481_s5 + $0x78] sm:$0xff]  ;;  %v176_v51 = vld [vmem:[%s481_s5 + $0x70] sm:$0xff] }
  0x12   :  { %75 = vmatpush.msra.mxu0 %v38_v19  ;;  %140 = vmatpush.msra.mxu2 %v123_v30  ;;  %v114_v49 = vld [vmem:[%s477_s3] sm:$0xff]  ;;  %v175_v52 = vld [vmem:[%s481_s5 + $0x68] sm:$0xff]  ;;  %v173_v54 = vld [vmem:[%s481_s5 + $0x58] sm:$0xff] }
  0x13   :  { %95 = vmatpush.msra.mxu1 %v54_v20  ;;  %182 = vmatpush.msra.mxu3 %v177_v50  ;;  %v174_v53 = vld [vmem:[%s481_s5 + $0x60] sm:$0xff]  ;;  %v172_v55 = vld [vmem:[%s481_s5 + $0x50] sm:$0xff]  ;;  %v171_v56 = vld [vmem:[%s481_s5 + $0x48] sm:$0xff] }
  0x14   :  { %76 = vmatpush.msra.mxu0 %v37_v22  ;;  %141 = vmatpush.msra.mxu2 %v122_v33  ;;  %v170_v57 = vld [vmem:[%s481_s5 + $0x40] sm:$0xff]  ;;  %v169_v58 = vld [vmem:[%s481_s5 + $0x38] sm:$0xff]  ;;  %v168_v59 = vld [vmem:[%s481_s5 + $0x30] sm:$0xff] }
  0x15   :  { %96 = vmatpush.msra.mxu1 %v53_v23  ;;  %183 = vmatpush.msra.mxu3 %v176_v51  ;;  %v107_v60 = vld [vmem:[%s482_s7] sm:$0xff]  ;;  %v167_v62 = vld [vmem:[%s481_s5 + $0x28] sm:$0xff]  ;;  %v165_v9 = vld [vmem:[%s481_s5 + $0x18] sm:$0xff] }
  0x16   :  { %77 = vmatpush.msra.mxu0 %v36_v25  ;;  %142 = vmatpush.msra.mxu2 %v121_v36  ;;  %v211_v61 = vld [vmem:[%s478_s2] ss:$0 sm:$0xff]  ;;  %vm108_vm0 = vcmp.ge.f32.partialorder %v107_v60, 0.5  ;;  %v164_v10 = vld [vmem:[%s481_s5 + $0x10] sm:$0xff]  ;;  %v163_v11 = vld [vmem:[%s481_s5 + $0x8] sm:$0xff] }
  0x17   :  { %97 = vmatpush.msra.mxu1 %v52_v26  ;;  %184 = vmatpush.msra.mxu3 %v175_v52  ;;  %v207_v3 = vsel %vm108_vm0, 1.0, %v214_v2  ;;  %v166_v8 = vld [vmem:[%s481_s5 + $0x20] sm:$0xff]  ;;  %v208_v13 = vld [vmem:[%s482_s7 + $0x8] sm:$0xff] }
  0x18   :  { %78 = vmatpush.msra.mxu0 %v35_v28  ;;  %143 = vmatpush.msra.mxu2 %v120_v39  ;;  %v162_v12 = vld [vmem:[%s481_s5] sm:$0xff]  ;;  %vm156_vm1 = vcmp.ge.f32.partialorder %v208_v13, 0.5 }
  0x19   :  { %98 = vmatpush.msra.mxu1 %v51_v29  ;;  %185 = vmatpush.msra.mxu3 %v174_v53  ;;  %v212_v14 = vld [vmem:[%s480_s4] ss:$0 sm:$0xff]  ;;  %v209_v16 = vsel %vm156_vm1, 1.0, %v214_v2 }
  0x1a   :  { %79 = vmatpush.msra.mxu0 %v34_v31  ;;  %144 = vmatpush.msra.mxu2 %v119_v44  ;;  %v213_v21 = vld [vmem:[%s483_s6] ss:$0 sm:$0xff] }
  0x1b   :  { %99 = vmatpush.msra.mxu1 %v50_v32  ;;  %186 = vmatpush.msra.mxu3 %v173_v54 }
  0x1c   :  { %80 = vmatpush.msra.mxu0 %v33_v34  ;;  %145 = vmatpush.msra.mxu2 %v118_v45 }
  0x1d   :  { %100 = vmatpush.msra.mxu1 %v49_v35  ;;  %187 = vmatpush.msra.mxu3 %v172_v55 }
  0x1e   :  { %81 = vmatpush.msra.mxu0 %v32_v37  ;;  %146 = vmatpush.msra.mxu2 %v117_v46 }
  0x1f   :  { %101 = vmatpush.msra.mxu1 %v48_v38  ;;  %188 = vmatpush.msra.mxu3 %v171_v56 }
  0x20   :  { %82 = vmatpush.msra.mxu0 %v31_v40  ;;  %147 = vmatpush.msra.mxu2 %v116_v47 }
  0x21   :  { %102 = vmatpush.msra.mxu1 %v47_v41  ;;  %83 = vmatmul.f32.vlgmr.msra.gmra.mxu0 %v29_v42 }
  0x22   :  { %103 = vmatmul.f32.vlgmr.msra.gmra.mxu1 %v30_v43  ;;  %148 = vmatpush.msra.mxu2 %v115_v48 }
  0x23   :  { %189 = vmatpush.msra.mxu3 %v170_v57 }
  0x24   :  { %149 = vmatpush.msra.mxu2 %v114_v49 }
  0x25   :  { %190 = vmatpush.msra.mxu3 %v169_v58 }
  0x27   :  { %191 = vmatpush.msra.mxu3 %v168_v59 }
  0x29   :  { %192 = vmatpush.msra.mxu3 %v167_v62 }
  0x2b   :  { %193 = vmatpush.msra.mxu3 %v166_v8 }
  0x2d   :  { %194 = vmatpush.msra.mxu3 %v165_v9 }
  0x2f   :  { %195 = vmatpush.msra.mxu3 %v164_v10 }
  0x31   :  { %196 = vmatpush.msra.mxu3 %v163_v11 }
  0x33   :  { %197 = vmatpush.msra.mxu3 %v162_v12 }
  0x9e   :  { %v84_v63 = vpop.f32.mrf.mxu0 }
  0x9f   :  { %v104_v0 = vpop.f32.mrf.mxu1  ;;  %v85_v1 = vadd.f32 %v211_v61, %v84_v63 }
  0xa1   :  { %v105_v4 = vadd.f32 %v104_v0, %v85_v1 }
  0xa3   :  { %v111_v5 = vmul.f32 %v207_v3, %v105_v4 }
  0xa5   :  { %v112_v6 = vmul.f32 2.0, %v111_v5 }
  0xa7   :  { %v113_v7 = vmax.f32 %v112_v6, 0.0 }
  0xa9   :  { %150 = vmatmul.f32.vlgmr.msra.gmra.mxu2 %v113_v7 }
 0x12c   :  { %v151_v15 = vpop.f32.mrf.mxu2 }
 0x12d   :  { %v152_v17 = vadd.f32 %v212_v14, %v151_v15 }
 0x12f   :  { %v159_v18 = vmul.f32 %v209_v16, %v152_v17 }
 0x131   :  { %v160_v19 = vmul.f32 2.0, %v159_v18 }
 0x133   :  { %v161_v20 = vmax.f32 %v160_v19, 0.0 }
 0x135   :  { %198 = vmatmul.f32.vlgmr.msra.gmra.mxu3 %v161_v20 }
 0x1b8   :  { %v199_v22 = vpop.f32.mrf.mxu3 }
 0x1b9   :  { %v200_v23 = vadd.f32 %v213_v21, %v199_v22 }
 0x1bb   :  { %202 = vst [vmem:[%s484_s8] sm:$0xff] %v200_v23 }

</bundles_post_ra>
